<compile_context>
chip_gen: v7x
topology: tpu7x:2x2x1
jax: 0.10.0
libtpu: 0.0.40
codegen_flags: <defaults>
</compile_context>

<pallas_src>
import jax
import jax.numpy as jnp
import numpy as np
from jax.experimental import pallas as pl
from jax.experimental.pallas import tpu as pltpu

# ---------------- config (small synthetic shapes) ----------------
B = 2
T_ENC = 8
E = 32            # in_features (encoder output dim)
MEM_DIM = 8       # memory_dim (mel dim)
R = 7             # reduction factor r
QUERY_DIM = 256
ATTN_DIM = 128
PRENET_H1 = 256
PRENET_H2 = 128
DEC_DIM = 256
MEL_OUT = MEM_DIM * R            # 56
STOP_IN = DEC_DIM + MEL_OUT      # 312
N_FRAMES = 21                    # multiple of R
T_DEC = N_FRAMES // R
OUT_LANES = 128                  # lane-dense packed output width


# ---------------- deterministic parameter init ----------------
def init_params(key):
    def lin(k, fan_in, fan_out):
        k1, k2 = jax.random.split(k)
        s = 1.0 / np.sqrt(fan_in)
        W = jax.random.uniform(k1, (fan_in, fan_out), jnp.float32, -s, s)
        b = jax.random.uniform(k2, (1, fan_out), jnp.float32, -s, s)
        return W, b

    def gru(k, in_dim, hid):
        k1, k2, k3, k4 = jax.random.split(k, 4)
        s = 1.0 / np.sqrt(hid)
        Wih = jax.random.uniform(k1, (in_dim, 3 * hid), jnp.float32, -s, s)
        Whh = jax.random.uniform(k2, (hid, 3 * hid), jnp.float32, -s, s)
        bih = jax.random.uniform(k3, (1, 3 * hid), jnp.float32, -s, s)
        bhh = jax.random.uniform(k4, (1, 3 * hid), jnp.float32, -s, s)
        return Wih, Whh, bih, bhh

    ks = jax.random.split(key, 11)
    return {
        "pre1": lin(ks[0], MEM_DIM, PRENET_H1),
        "pre2": lin(ks[1], PRENET_H1, PRENET_H2),
        "arnn": gru(ks[2], PRENET_H2 + E, QUERY_DIM),   # cat(prenet_out, context)
        "attn_in": lin(ks[3], E, ATTN_DIM),
        "attn_q": lin(ks[4], QUERY_DIM, ATTN_DIM),
        "attn_v": lin(ks[5], ATTN_DIM, 1),
        "proj": lin(ks[6], QUERY_DIM + E, DEC_DIM),
        "dec0": gru(ks[7], DEC_DIM, DEC_DIM),
        "dec1": gru(ks[8], DEC_DIM, DEC_DIM),
        "mel": lin(ks[9], DEC_DIM, MEL_OUT),
        "stop": lin(ks[10], STOP_IN, 1),
    }


# ---------------- Pallas kernel: recurrent decode loop ----------------
def decoder_kernel(
    inputs_ref, proc_ref, maskb_ref, gxp_ref,
    ctx_ih_ref, whh_ref, bhh_ref,
    qproj_ref, ctx_proj_ref, proj_b_ref,
    av_ref, out_w_ref, out_b_ref,
    out_ref,
):
    f32 = jnp.float32
    bf16 = jnp.bfloat16

    Bk, t_enc, e_dim = inputs_ref.shape
    t_dec = out_ref.shape[0]
    hid = whh_ref.shape[0]           # attention-RNN hidden (query) dim
    attn_dim = av_ref.shape[-1]      # attention projection dim

    # Hoist every weight / constant VMEM read above the unrolled loop (loaded once).
    inputs = inputs_ref[...]         # (B, T_enc, E)      f32
    proc = proc_ref[...]             # (B, T_enc, A)      f32 (+ aq_b folded in)
    mask_bias = maskb_ref[...]       # (B, T_enc)         f32 (av_b / -1e9 folded in)
    ctx_ih = ctx_ih_ref[...]         # (E, 3*hid)         bf16
    whh = whh_ref[...]               # (hid, 3*hid)       bf16
    bhh = bhh_ref[...]               # (1, 3*hid)         f32
    qproj = qproj_ref[...]           # (hid, A + DEC)     bf16 fused [aq_w | proj_w[:hid]]
    ctx_proj = ctx_proj_ref[...]     # (E, DEC)           bf16
    proj_b = proj_b_ref[...]         # (1, DEC)           f32
    av = av_ref[...]                 # (1, 1, A)          f32
    w_out = out_w_ref[...]           # (DEC, 128)         bf16 lane-dense mel+stop
    b_out = out_b_ref[...]           # (1, 128)           f32

    def mm(x_bf, w_bf):
        # bf16 operands through the MXU, f32 accumulation.
        return jnp.dot(x_bf, w_bf, preferred_element_type=f32)

    # ---- _init_states ----
    arnn_h = jnp.zeros((Bk, hid), f32)
    arnn_h_bf = arnn_h.astype(bf16)
    ctx_bf = jnp.zeros((Bk, e_dim), bf16)

    # Static, fully-unrolled decode loop (T_DEC is small and compile-time known).
    for t in range(t_dec):
        # ---- attention RNN: GRUCell(cat(prenet_out, context), h), gates [r,z,n] ----
        # gx_p[t] already holds prenet(mem[t-1]) @ Wih[:128] + bih (non-recurrent,
        # hoisted to the wrapper); only the ctx half stays on the serial chain.
        gx = gxp_ref[t] + mm(ctx_bf, ctx_ih)                       # (B, 3*hid)
        gh = mm(arnn_h_bf, whh) + bhh                              # (B, 3*hid)
        r = jax.nn.sigmoid(gx[:, :hid] + gh[:, :hid])
        z = jax.nn.sigmoid(gx[:, hid:2 * hid] + gh[:, hid:2 * hid])
        n = jnp.tanh(gx[:, 2 * hid:] + r * gh[:, 2 * hid:])
        arnn_h = (1.0 - z) * n + z * arnn_h
        arnn_h_bf = arnn_h.astype(bf16)

        # ---- fused same-LHS projection: [query_layer | proj_to_decoder_in(h-part)] ----
        qp = mm(arnn_h_bf, qproj)                                  # (B, A + DEC)
        pq = qp[:, :attn_dim]                                      # (B, A)
        proj_h = qp[:, attn_dim:]                                  # (B, DEC)

        # ---- Bahdanau additive attention (elementwise / softmax in f32) ----
        energies = jnp.tanh(proc + pq[:, None, :])                 # (B, T, A)
        scores = jnp.sum(energies * av, axis=-1) + mask_bias       # (B, T)
        m = jnp.max(scores, axis=-1, keepdims=True)
        ex = jnp.exp(scores - m)
        attn = ex * pl.reciprocal(jnp.sum(ex, axis=-1, keepdims=True), approx=True)
        ctx = jnp.sum(attn[:, :, None] * inputs, axis=1)           # (B, E)
        ctx_bf = ctx.astype(bf16)

        # ---- project_to_decoder_in via split-weight sum (no lane concat) ----
        # NOTE: the reference's 2-layer decoder-GRU hidden states never feed any
        # output (decode_input/decoder_input typo) -> dead compute elided here.
        dec_in = proj_h + mm(ctx_bf, ctx_proj) + proj_b            # (B, DEC)

        # ---- lane-dense fused mel + stop projection ----
        # w_out columns: [0:56) = mel_w, 64 = stop (mel->stop folded in), rest 0.
        ms = mm(dec_in.astype(bf16), w_out) + b_out                # (B, 128)
        out_ref[t] = ms                                            # full 128-lane store
        out_ref[t, :, MEL_OUT:MEL_OUT + t_enc] = attn              # insert attn lanes


# ---------------- wrapper ----------------
def decoder_forward(params, inputs, memory, mask):
    f32 = jnp.float32
    bf16 = jnp.bfloat16
    Bn, n_frames, mdim = memory.shape
    t_dec = n_frames // R
    t_enc = inputs.shape[1]
    stop_lane = MEL_OUT + t_enc

    pre_w1, pre_b1 = params["pre1"]
    pre_w2, pre_b2 = params["pre2"]
    arnn_wih, arnn_whh, arnn_bih, arnn_bhh = params["arnn"]
    ain_w, ain_b = params["attn_in"]
    aq_w, aq_b = params["attn_q"]
    av_w, av_b = params["attn_v"]
    proj_w, proj_b = params["proj"]
    mel_w, mel_b = params["mel"]
    stop_w, stop_b = params["stop"]

    # ---- non-recurrent precompute hoisted out of the kernel (plain XLA, f32) ----
    # _reshape_memory + teacher-forced memory_input for every step.
    mem_r = memory.reshape(Bn, t_dec, mdim * R).transpose(1, 0, 2)          # (T_dec,B,mem*r)
    mem_in = jnp.concatenate(
        [jnp.zeros((1, Bn, mdim), f32), mem_r[:-1, :, :mdim]], axis=0)      # (T_dec,B,mem)
    # Prenet (eval mode) for all steps in one batched pass.
    p1 = jnp.maximum(mem_in @ pre_w1 + pre_b1, 0.0)
    p2 = jnp.maximum(p1 @ pre_w2 + pre_b2, 0.0)                             # (T_dec,B,128)
    # Non-recurrent half of the attention-RNN input gates (+ bih folded in).
    gx_p = p2 @ arnn_wih[:PRENET_H2] + arnn_bih                             # (T_dec,B,768)

    # attention.init_states: processed_inputs, with the query bias aq_b folded in.
    proc = jnp.einsum("bte,ea->bta", inputs, ain_w) + (ain_b + aq_b)[None]  # (B,T_enc,128)
    # Additive mask bias: av_b for valid positions, -1e9 fill for padded ones.
    mask_bias = jnp.where(mask > 0.5, av_b[0, 0], jnp.float32(-1e9))        # (B,T_enc)

    # Split / fused weights (no lane-concat LHS inside the kernel).
    ctx_ih_w = arnn_wih[PRENET_H2:]                                         # (E, 768)
    qproj_w = jnp.concatenate([aq_w, proj_w[:QUERY_DIM]], axis=1)           # (256, 384)
    ctx_proj_w = proj_w[QUERY_DIM:]                                         # (E, 256)

    # Lane-dense fused mel+stop output projection: mel at lanes [0:56),
    # stop at lane `stop_lane` with the mel->stop contribution folded algebraically:
    #   stop = dec_in @ (stop_w[:256] + mel_w @ stop_w[256:]) + (stop_b + mel_b @ stop_w[256:])
    stop_col = stop_w[:DEC_DIM] + mel_w @ stop_w[DEC_DIM:]                  # (256, 1)
    stop_bias = stop_b + mel_b @ stop_w[DEC_DIM:]                           # (1, 1)
    out_w = jnp.zeros((DEC_DIM, OUT_LANES), f32)
    out_w = out_w.at[:, :MEL_OUT].set(mel_w).at[:, stop_lane].set(stop_col[:, 0])
    out_b = jnp.zeros((1, OUT_LANES), f32)
    out_b = out_b.at[:, :MEL_OUT].set(mel_b).at[:, stop_lane].set(stop_bias[0])

    av_row = av_w.T.reshape(1, 1, ATTN_DIM)                                 # (1, 1, 128)

    # bf16 weights (MXU operands); biases / elementwise vectors stay f32.
    args = [
        inputs, proc, mask_bias, gx_p,
        ctx_ih_w.astype(bf16), arnn_whh.astype(bf16), arnn_bhh,
        qproj_w.astype(bf16), ctx_proj_w.astype(bf16), proj_b,
        av_row, out_w.astype(bf16), out_b,
    ]

    def full_spec(a):
        nd = a.ndim
        return pl.BlockSpec(a.shape, lambda i, _nd=nd: (0,) * _nd)

    in_specs = [full_spec(a) for a in args]
    out_spec = pl.BlockSpec((t_dec, Bn, OUT_LANES), lambda i: (0, 0, 0))
    out_shape = jax.ShapeDtypeStruct((t_dec, Bn, OUT_LANES), f32)

    packed = pl.pallas_call(
        decoder_kernel,
        out_shape=out_shape,
        grid_spec=pltpu.PrefetchScalarGridSpec(
            num_scalar_prefetch=0,
            grid=(1,),                       # single invocation; loop runs in-kernel
            in_specs=in_specs,
            out_specs=out_spec,
        ),
        compiler_params=pltpu.CompilerParams(
            dimension_semantics=("arbitrary",),
            # <2 MiB actually resident (incl. double-buffering); 4 MiB leaves margin.
            vmem_limit_bytes=4 * 1024 * 1024,
        ),
    )(*args)

    # _parse_outputs (unpack the lane-dense packed output)
    outputs = packed[:, :, :MEL_OUT].transpose(1, 0, 2)                     # (B, T_dec, mem*r)
    attentions = packed[:, :, MEL_OUT:MEL_OUT + t_enc].transpose(1, 0, 2)   # (B, T_dec, T_enc)
    stop_tokens = packed[:, :, stop_lane].transpose(1, 0)                   # (B, T_dec)
    return outputs, attentions, stop_tokens


# ---------------- pure-JAX f32 reference (faithful to the PyTorch module) ----------------
def decoder_reference(params, inputs, memory, mask):
    Bn = inputs.shape[0]
    mem_r = memory.reshape(Bn, -1, MEM_DIM * R).transpose(1, 0, 2)

    def lin(p, x):
        return x @ p[0] + p[1]

    def gru(p, x, h):
        wih, whh, bih, bhh = p
        gx = x @ wih + bih
        gh = h @ whh + bhh
        H = h.shape[-1]
        r = jax.nn.sigmoid(gx[:, :H] + gh[:, :H])
        z = jax.nn.sigmoid(gx[:, H:2 * H] + gh[:, H:2 * H])
        n = jnp.tanh(gx[:, 2 * H:] + r * gh[:, 2 * H:])
        return (1.0 - z) * n + z * h

    mem_in = jnp.zeros((Bn, MEM_DIM), jnp.float32)
    arnn_h = jnp.zeros((Bn, QUERY_DIM), jnp.float32)
    d_h = [jnp.zeros((Bn, DEC_DIM), jnp.float32) for _ in range(2)]
    ctx = jnp.zeros((Bn, E), jnp.float32)
    proc = jnp.einsum("bte,ea->bta", inputs, params["attn_in"][0]) + params["attn_in"][1][None]

    outs, attns, stops = [], [], []
    for t in range(mem_r.shape[0]):
        if t > 0:
            mem_in = mem_r[t - 1][:, :MEM_DIM]
        p1 = jnp.maximum(lin(params["pre1"], mem_in), 0.0)
        p2 = jnp.maximum(lin(params["pre2"], p1), 0.0)
        arnn_h = gru(params["arnn"], jnp.concatenate([p2, ctx], -1), arnn_h)
        pq = lin(params["attn_q"], arnn_h)
        en = jnp.tanh(proc + pq[:, None, :])
        sc = jnp.sum(en * params["attn_v"][0][:, 0][None, None, :], axis=-1) + params["attn_v"][1]
        sc = jnp.where(mask > 0.5, sc, -1e9)
        m = jnp.max(sc, axis=-1, keepdims=True)
        ex = jnp.exp(sc - m)
        w = ex / jnp.sum(ex, axis=-1, keepdims=True)
        ctx = jnp.sum(w[:, :, None] * inputs, axis=1)
        dec_in = lin(params["proj"], jnp.concatenate([arnn_h, ctx], -1))
        # Dead decoder-GRU updates kept here (faithful to the reference typo) to
        # demonstrate the kernel -- which elides them -- produces identical outputs.
        d_h[0] = gru(params["dec0"], dec_in, d_h[0])
        d_h[1] = gru(params["dec1"], dec_in, d_h[1])
        decoder_output = dec_in
        mel = lin(params["mel"], decoder_output)
        stop = lin(params["stop"], jnp.concatenate([decoder_output, mel], -1))
        outs.append(mel[:, :R * MEM_DIM])
        attns.append(w)
        stops.append(stop)
    outputs = jnp.stack(outs).transpose(1, 0, 2)
    attentions = jnp.stack(attns).transpose(1, 0, 2)
    stop_tokens = jnp.stack(stops).transpose(1, 0, 2)[..., 0]
    return outputs, attentions, stop_tokens


if __name__ == "__main__":
    key = jax.random.PRNGKey(0)
    kp, ki, km = jax.random.split(key, 3)
    params = init_params(kp)

    inputs = jax.random.normal(ki, (B, T_ENC, E), jnp.float32)
    memory = jax.random.normal(km, (B, N_FRAMES, MEM_DIM), jnp.float32)
    lengths = jnp.array([T_ENC, T_ENC - 2])
    mask = (jnp.arange(T_ENC)[None, :] < lengths[:, None]).astype(jnp.float32)

    outs, attns, stops = decoder_forward(params, inputs, memory, mask)
    jax.block_until_ready((outs, attns, stops))

    r_outs, r_attns, r_stops = decoder_reference(params, inputs, memory, mask)
    assert outs.shape == (B, T_DEC, MEM_DIM * R)
    assert attns.shape == (B, T_DEC, T_ENC)
    assert stops.shape == (B, T_DEC)
    # Tolerance loosened vs pure-f32: kernel uses bf16 MXU weights (f32 accumulation)
    # and an approx EUP reciprocal in the softmax.
    TOL = dict(atol=2e-2, rtol=2e-2)
    assert np.allclose(np.asarray(outs), np.asarray(r_outs), **TOL)
    assert np.allclose(np.asarray(attns), np.asarray(r_attns), **TOL)
    assert np.allclose(np.asarray(stops), np.asarray(r_stops), **TOL)
    print("KERNEL_OK")
</pallas_src>

<mosaic_0001>
module attributes {stable_mosaic.version = 11 : i64} {
  func.func @decoder_kernel(%arg0: i32, %arg1: memref<2x8x32xf32, #tpu.memory_space<vmem>>, %arg2: memref<2x8x128xf32, #tpu.memory_space<vmem>>, %arg3: memref<2x8xf32, #tpu.memory_space<vmem>>, %arg4: memref<3x2x768xf32, #tpu.memory_space<vmem>>, %arg5: memref<32x768xbf16, #tpu.memory_space<vmem>>, %arg6: memref<256x768xbf16, #tpu.memory_space<vmem>>, %arg7: memref<1x768xf32, #tpu.memory_space<vmem>>, %arg8: memref<256x384xbf16, #tpu.memory_space<vmem>>, %arg9: memref<32x256xbf16, #tpu.memory_space<vmem>>, %arg10: memref<1x256xf32, #tpu.memory_space<vmem>>, %arg11: memref<1x1x128xf32, #tpu.memory_space<vmem>>, %arg12: memref<256x128xbf16, #tpu.memory_space<vmem>>, %arg13: memref<1x128xf32, #tpu.memory_space<vmem>>, %arg14: memref<3x2x128xf32, #tpu.memory_space<vmem>>) attributes {dimension_semantics = [#tpu.dimension_semantics<arbitrary>], iteration_bounds = array<i64: 1>, scalar_prefetch = 0 : i64, scratch_operands = 0 : i64, tpu.core_type = #tpu.core_type<tc>, window_params = [{pipeline_mode = #tpu.pipeline_mode<synchronous>, transform_indices = @transform_0, window_bounds = array<i64: 2, 8, 32>}, {pipeline_mode = #tpu.pipeline_mode<synchronous>, transform_indices = @transform_1, window_bounds = array<i64: 2, 8, 128>}, {pipeline_mode = #tpu.pipeline_mode<synchronous>, transform_indices = @transform_2, window_bounds = array<i64: 2, 8>}, {pipeline_mode = #tpu.pipeline_mode<synchronous>, transform_indices = @transform_3, window_bounds = array<i64: 3, 2, 768>}, {pipeline_mode = #tpu.pipeline_mode<synchronous>, transform_indices = @transform_4, window_bounds = array<i64: 32, 768>}, {pipeline_mode = #tpu.pipeline_mode<synchronous>, transform_indices = @transform_5, window_bounds = array<i64: 256, 768>}, {pipeline_mode = #tpu.pipeline_mode<synchronous>, transform_indices = @transform_6, window_bounds = array<i64: 1, 768>}, {pipeline_mode = #tpu.pipeline_mode<synchronous>, transform_indices = @transform_7, window_bounds = array<i64: 256, 384>}, {pipeline_mode = #tpu.pipeline_mode<synchronous>, transform_indices = @transform_8, window_bounds = array<i64: 32, 256>}, {pipeline_mode = #tpu.pipeline_mode<synchronous>, transform_indices = @transform_9, window_bounds = array<i64: 1, 256>}, {pipeline_mode = #tpu.pipeline_mode<synchronous>, transform_indices = @transform_10, window_bounds = array<i64: 1, 1, 128>}, {pipeline_mode = #tpu.pipeline_mode<synchronous>, transform_indices = @transform_11, window_bounds = array<i64: 256, 128>}, {pipeline_mode = #tpu.pipeline_mode<synchronous>, transform_indices = @transform_12, window_bounds = array<i64: 1, 128>}, {pipeline_mode = #tpu.pipeline_mode<synchronous>, transform_indices = @transform_13, window_bounds = array<i64: 3, 2, 128>}]} {
    %c0 = arith.constant 0 : index
    %c0_0 = arith.constant 0 : index
    %c0_1 = arith.constant 0 : index
    %0 = vector.load %arg1[%c0, %c0_0, %c0_1] : memref<2x8x32xf32, #tpu.memory_space<vmem>>, vector<2x8x32xf32>
    %c0_2 = arith.constant 0 : index
    %c0_3 = arith.constant 0 : index
    %c0_4 = arith.constant 0 : index
    %1 = vector.load %arg2[%c0_2, %c0_3, %c0_4] : memref<2x8x128xf32, #tpu.memory_space<vmem>>, vector<2x8x128xf32>
    %c0_5 = arith.constant 0 : index
    %c0_6 = arith.constant 0 : index
    %2 = vector.load %arg3[%c0_5, %c0_6] : memref<2x8xf32, #tpu.memory_space<vmem>>, vector<2x8xf32>
    %c0_7 = arith.constant 0 : index
    %c0_8 = arith.constant 0 : index
    %3 = vector.load %arg5[%c0_7, %c0_8] : memref<32x768xbf16, #tpu.memory_space<vmem>>, vector<32x768xbf16>
    %c0_9 = arith.constant 0 : index
    %c0_10 = arith.constant 0 : index
    %4 = vector.load %arg6[%c0_9, %c0_10] : memref<256x768xbf16, #tpu.memory_space<vmem>>, vector<256x768xbf16>
    %c0_11 = arith.constant 0 : index
    %c0_12 = arith.constant 0 : index
    %5 = vector.load %arg7[%c0_11, %c0_12] : memref<1x768xf32, #tpu.memory_space<vmem>>, vector<1x768xf32>
    %c0_13 = arith.constant 0 : index
    %c0_14 = arith.constant 0 : index
    %6 = vector.load %arg8[%c0_13, %c0_14] : memref<256x384xbf16, #tpu.memory_space<vmem>>, vector<256x384xbf16>
    %c0_15 = arith.constant 0 : index
    %c0_16 = arith.constant 0 : index
    %7 = vector.load %arg9[%c0_15, %c0_16] : memref<32x256xbf16, #tpu.memory_space<vmem>>, vector<32x256xbf16>
    %c0_17 = arith.constant 0 : index
    %c0_18 = arith.constant 0 : index
    %8 = vector.load %arg10[%c0_17, %c0_18] : memref<1x256xf32, #tpu.memory_space<vmem>>, vector<1x256xf32>
    %c0_19 = arith.constant 0 : index
    %c0_20 = arith.constant 0 : index
    %c0_21 = arith.constant 0 : index
    %9 = vector.load %arg11[%c0_19, %c0_20, %c0_21] : memref<1x1x128xf32, #tpu.memory_space<vmem>>, vector<1x1x128xf32>
    %c0_22 = arith.constant 0 : index
    %c0_23 = arith.constant 0 : index
    %10 = vector.load %arg12[%c0_22, %c0_23] : memref<256x128xbf16, #tpu.memory_space<vmem>>, vector<256x128xbf16>
    %c0_24 = arith.constant 0 : index
    %c0_25 = arith.constant 0 : index
    %11 = vector.load %arg13[%c0_24, %c0_25] : memref<1x128xf32, #tpu.memory_space<vmem>>, vector<1x128xf32>
    %cst = arith.constant 0.000000e+00 : f32
    %12 = vector.broadcast %cst : f32 to vector<2x256xf32>
    %13 = arith.truncf %12 : vector<2x256xf32> to vector<2x256xbf16>
    %cst_26 = arith.constant 0.000000e+00 : bf16
    %14 = vector.broadcast %cst_26 : bf16 to vector<2x32xbf16>
    %c0_27 = arith.constant 0 : index
    %c0_28 = arith.constant 0 : index
    %c0_29 = arith.constant 0 : index
    %15 = vector.load %arg4[%c0_27, %c0_28, %c0_29] : memref<3x2x768xf32, #tpu.memory_space<vmem>>, vector<1x2x768xf32>
    %16 = vector.shape_cast %15 : vector<1x2x768xf32> to vector<2x768xf32>
    %cst_30 = arith.constant dense<0.000000e+00> : vector<2x768xf32>
    %17 = tpu.matmul %14, %3, %cst_30 {dimension_numbers = #tpu.dot_dimension_numbers<[1], [0], [0], [1], [0, 0, 1, 1], [], []>} : vector<2x32xbf16>, vector<32x768xbf16>, vector<2x768xf32> -> vector<2x768xf32>
    %18 = arith.addf %16, %17 : vector<2x768xf32>
    %cst_31 = arith.constant dense<0.000000e+00> : vector<2x768xf32>
    %19 = tpu.matmul %13, %4, %cst_31 {dimension_numbers = #tpu.dot_dimension_numbers<[1], [0], [0], [1], [0, 0, 1, 1], [], []>} : vector<2x256xbf16>, vector<256x768xbf16>, vector<2x768xf32> -> vector<2x768xf32>
    %20 = vector.broadcast %5 : vector<1x768xf32> to vector<2x768xf32>
    %21 = arith.addf %19, %20 : vector<2x768xf32>
    %22 = vector.extract_strided_slice %18 {offsets = [0, 0], sizes = [2, 256], strides = [1, 1]} : vector<2x768xf32> to vector<2x256xf32>
    %23 = vector.extract_strided_slice %21 {offsets = [0, 0], sizes = [2, 256], strides = [1, 1]} : vector<2x768xf32> to vector<2x256xf32>
    %24 = arith.addf %22, %23 : vector<2x256xf32>
    %25 = arith.negf %24 : vector<2x256xf32>
    %26 = math.exp %25 : vector<2x256xf32>
    %cst_32 = arith.constant 1.000000e+00 : f32
    %27 = vector.broadcast %cst_32 : f32 to vector<2x256xf32>
    %28 = arith.addf %27, %26 : vector<2x256xf32>
    %29 = arith.divf %27, %28 : vector<2x256xf32>
    %30 = vector.extract_strided_slice %18 {offsets = [0, 256], sizes = [2, 256], strides = [1, 1]} : vector<2x768xf32> to vector<2x256xf32>
    %31 = vector.extract_strided_slice %21 {offsets = [0, 256], sizes = [2, 256], strides = [1, 1]} : vector<2x768xf32> to vector<2x256xf32>
    %32 = arith.addf %30, %31 : vector<2x256xf32>
    %33 = arith.negf %32 : vector<2x256xf32>
    %34 = math.exp %33 : vector<2x256xf32>
    %cst_33 = arith.constant 1.000000e+00 : f32
    %35 = vector.broadcast %cst_33 : f32 to vector<2x256xf32>
    %36 = arith.addf %35, %34 : vector<2x256xf32>
    %37 = arith.divf %35, %36 : vector<2x256xf32>
    %38 = vector.extract_strided_slice %18 {offsets = [0, 512], sizes = [2, 256], strides = [1, 1]} : vector<2x768xf32> to vector<2x256xf32>
    %39 = vector.extract_strided_slice %21 {offsets = [0, 512], sizes = [2, 256], strides = [1, 1]} : vector<2x768xf32> to vector<2x256xf32>
    %40 = arith.mulf %29, %39 : vector<2x256xf32>
    %41 = arith.addf %38, %40 : vector<2x256xf32>
    %42 = math.tanh %41 : vector<2x256xf32>
    %cst_34 = arith.constant 1.000000e+00 : f32
    %43 = vector.broadcast %cst_34 : f32 to vector<2x256xf32>
    %44 = arith.subf %43, %37 : vector<2x256xf32>
    %45 = arith.mulf %44, %42 : vector<2x256xf32>
    %46 = arith.mulf %37, %12 : vector<2x256xf32>
    %47 = arith.addf %45, %46 : vector<2x256xf32>
    %48 = arith.truncf %47 : vector<2x256xf32> to vector<2x256xbf16>
    %cst_35 = arith.constant dense<0.000000e+00> : vector<2x384xf32>
    %49 = tpu.matmul %48, %6, %cst_35 {dimension_numbers = #tpu.dot_dimension_numbers<[1], [0], [0], [1], [0, 0, 1, 1], [], []>} : vector<2x256xbf16>, vector<256x384xbf16>, vector<2x384xf32> -> vector<2x384xf32>
    %50 = vector.extract_strided_slice %49 {offsets = [0, 0], sizes = [2, 128], strides = [1, 1]} : vector<2x384xf32> to vector<2x128xf32>
    %51 = vector.extract_strided_slice %49 {offsets = [0, 128], sizes = [2, 256], strides = [1, 1]} : vector<2x384xf32> to vector<2x256xf32>
    %52 = vector.shape_cast %50 : vector<2x128xf32> to vector<2x1x128xf32>
    %53 = vector.broadcast %52 : vector<2x1x128xf32> to vector<2x8x128xf32>
    %54 = arith.addf %1, %53 : vector<2x8x128xf32>
    %55 = math.tanh %54 : vector<2x8x128xf32>
    %56 = vector.broadcast %9 : vector<1x1x128xf32> to vector<2x8x128xf32>
    %57 = arith.mulf %55, %56 : vector<2x8x128xf32>
    %cst_36 = arith.constant dense<0.000000e+00> : vector<2x8xf32>
    %58 = vector.multi_reduction <add>, %57, %cst_36 [2] : vector<2x8x128xf32> to vector<2x8xf32>
    %59 = arith.addf %58, %2 : vector<2x8xf32>
    %cst_37 = arith.constant dense<0xFF800000> : vector<2xf32>
    %60 = vector.multi_reduction <maximumf>, %59, %cst_37 [1] : vector<2x8xf32> to vector<2xf32>
    %61 = vector.shape_cast %60 : vector<2xf32> to vector<2x1xf32>
    %62 = vector.broadcast %61 : vector<2x1xf32> to vector<2x8xf32>
    %63 = arith.subf %59, %62 : vector<2x8xf32>
    %64 = math.exp %63 : vector<2x8xf32>
    %cst_38 = arith.constant dense<0.000000e+00> : vector<2xf32>
    %65 = vector.multi_reduction <add>, %64, %cst_38 [1] : vector<2x8xf32> to vector<2xf32>
    %66 = vector.shape_cast %65 : vector<2xf32> to vector<2x1xf32>
    %67 = tpu.reciprocal %66 {approx = true} : vector<2x1xf32> -> vector<2x1xf32>
    %68 = vector.broadcast %67 : vector<2x1xf32> to vector<2x8xf32>
    %69 = arith.mulf %64, %68 : vector<2x8xf32>
    %70 = vector.shape_cast %69 : vector<2x8xf32> to vector<2x8x1xf32>
    %71 = vector.broadcast %70 : vector<2x8x1xf32> to vector<2x8x32xf32>
    %72 = arith.mulf %71, %0 : vector<2x8x32xf32>
    %cst_39 = arith.constant dense<0.000000e+00> : vector<2x32xf32>
    %73 = vector.multi_reduction <add>, %72, %cst_39 [1] : vector<2x8x32xf32> to vector<2x32xf32>
    %74 = arith.truncf %73 : vector<2x32xf32> to vector<2x32xbf16>
    %cst_40 = arith.constant dense<0.000000e+00> : vector<2x256xf32>
    %75 = tpu.matmul %74, %7, %cst_40 {dimension_numbers = #tpu.dot_dimension_numbers<[1], [0], [0], [1], [0, 0, 1, 1], [], []>} : vector<2x32xbf16>, vector<32x256xbf16>, vector<2x256xf32> -> vector<2x256xf32>
    %76 = arith.addf %51, %75 : vector<2x256xf32>
    %77 = vector.broadcast %8 : vector<1x256xf32> to vector<2x256xf32>
    %78 = arith.addf %76, %77 : vector<2x256xf32>
    %79 = arith.truncf %78 : vector<2x256xf32> to vector<2x256xbf16>
    %cst_41 = arith.constant dense<0.000000e+00> : vector<2x128xf32>
    %80 = tpu.matmul %79, %10, %cst_41 {dimension_numbers = #tpu.dot_dimension_numbers<[1], [0], [0], [1], [0, 0, 1, 1], [], []>} : vector<2x256xbf16>, vector<256x128xbf16>, vector<2x128xf32> -> vector<2x128xf32>
    %81 = vector.broadcast %11 : vector<1x128xf32> to vector<2x128xf32>
    %82 = arith.addf %80, %81 : vector<2x128xf32>
    %c0_42 = arith.constant 0 : index
    %c0_43 = arith.constant 0 : index
    %c0_44 = arith.constant 0 : index
    %83 = vector.load %arg14[%c0_42, %c0_43, %c0_44] : memref<3x2x128xf32, #tpu.memory_space<vmem>>, vector<1x2x128xf32>
    %84 = vector.shape_cast %83 : vector<1x2x128xf32> to vector<2x128xf32>
    %85 = vector.shape_cast %82 : vector<2x128xf32> to vector<1x2x128xf32>
    tpu.vector_store %arg14[%c0_42, %c0_43, %c0_44], %85 {strides = array<i32>} : memref<3x2x128xf32, #tpu.memory_space<vmem>>, vector<1x2x128xf32>,
    %c0_45 = arith.constant 0 : index
    %c0_46 = arith.constant 0 : index
    %c56 = arith.constant 56 : index
    %86 = vector.load %arg14[%c0_45, %c0_46, %c56] : memref<3x2x128xf32, #tpu.memory_space<vmem>>, vector<1x2x8xf32>
    %87 = vector.shape_cast %86 : vector<1x2x8xf32> to vector<2x8xf32>
    %88 = vector.shape_cast %69 : vector<2x8xf32> to vector<1x2x8xf32>
    tpu.vector_store %arg14[%c0_45, %c0_46, %c56], %88 {strides = array<i32>} : memref<3x2x128xf32, #tpu.memory_space<vmem>>, vector<1x2x8xf32>,
    %c1 = arith.constant 1 : index
    %c0_47 = arith.constant 0 : index
    %c0_48 = arith.constant 0 : index
    %89 = vector.load %arg4[%c1, %c0_47, %c0_48] : memref<3x2x768xf32, #tpu.memory_space<vmem>>, vector<1x2x768xf32>
    %90 = vector.shape_cast %89 : vector<1x2x768xf32> to vector<2x768xf32>
    %cst_49 = arith.constant dense<0.000000e+00> : vector<2x768xf32>
    %91 = tpu.matmul %74, %3, %cst_49 {dimension_numbers = #tpu.dot_dimension_numbers<[1], [0], [0], [1], [0, 0, 1, 1], [], []>} : vector<2x32xbf16>, vector<32x768xbf16>, vector<2x768xf32> -> vector<2x768xf32>
    %92 = arith.addf %90, %91 : vector<2x768xf32>
    %cst_50 = arith.constant dense<0.000000e+00> : vector<2x768xf32>
    %93 = tpu.matmul %48, %4, %cst_50 {dimension_numbers = #tpu.dot_dimension_numbers<[1], [0], [0], [1], [0, 0, 1, 1], [], []>} : vector<2x256xbf16>, vector<256x768xbf16>, vector<2x768xf32> -> vector<2x768xf32>
    %94 = vector.broadcast %5 : vector<1x768xf32> to vector<2x768xf32>
    %95 = arith.addf %93, %94 : vector<2x768xf32>
    %96 = vector.extract_strided_slice %92 {offsets = [0, 0], sizes = [2, 256], strides = [1, 1]} : vector<2x768xf32> to vector<2x256xf32>
    %97 = vector.extract_strided_slice %95 {offsets = [0, 0], sizes = [2, 256], strides = [1, 1]} : vector<2x768xf32> to vector<2x256xf32>
    %98 = arith.addf %96, %97 : vector<2x256xf32>
    %99 = arith.negf %98 : vector<2x256xf32>
    %100 = math.exp %99 : vector<2x256xf32>
    %cst_51 = arith.constant 1.000000e+00 : f32
    %101 = vector.broadcast %cst_51 : f32 to vector<2x256xf32>
    %102 = arith.addf %101, %100 : vector<2x256xf32>
    %103 = arith.divf %101, %102 : vector<2x256xf32>
    %104 = vector.extract_strided_slice %92 {offsets = [0, 256], sizes = [2, 256], strides = [1, 1]} : vector<2x768xf32> to vector<2x256xf32>
    %105 = vector.extract_strided_slice %95 {offsets = [0, 256], sizes = [2, 256], strides = [1, 1]} : vector<2x768xf32> to vector<2x256xf32>
    %106 = arith.addf %104, %105 : vector<2x256xf32>
    %107 = arith.negf %106 : vector<2x256xf32>
    %108 = math.exp %107 : vector<2x256xf32>
    %cst_52 = arith.constant 1.000000e+00 : f32
    %109 = vector.broadcast %cst_52 : f32 to vector<2x256xf32>
    %110 = arith.addf %109, %108 : vector<2x256xf32>
    %111 = arith.divf %109, %110 : vector<2x256xf32>
    %112 = vector.extract_strided_slice %92 {offsets = [0, 512], sizes = [2, 256], strides = [1, 1]} : vector<2x768xf32> to vector<2x256xf32>
    %113 = vector.extract_strided_slice %95 {offsets = [0, 512], sizes = [2, 256], strides = [1, 1]} : vector<2x768xf32> to vector<2x256xf32>
    %114 = arith.mulf %103, %113 : vector<2x256xf32>
    %115 = arith.addf %112, %114 : vector<2x256xf32>
    %116 = math.tanh %115 : vector<2x256xf32>
    %cst_53 = arith.constant 1.000000e+00 : f32
    %117 = vector.broadcast %cst_53 : f32 to vector<2x256xf32>
    %118 = arith.subf %117, %111 : vector<2x256xf32>
    %119 = arith.mulf %118, %116 : vector<2x256xf32>
    %120 = arith.mulf %111, %47 : vector<2x256xf32>
    %121 = arith.addf %119, %120 : vector<2x256xf32>
    %122 = arith.truncf %121 : vector<2x256xf32> to vector<2x256xbf16>
    %cst_54 = arith.constant dense<0.000000e+00> : vector<2x384xf32>
    %123 = tpu.matmul %122, %6, %cst_54 {dimension_numbers = #tpu.dot_dimension_numbers<[1], [0], [0], [1], [0, 0, 1, 1], [], []>} : vector<2x256xbf16>, vector<256x384xbf16>, vector<2x384xf32> -> vector<2x384xf32>
    %124 = vector.extract_strided_slice %123 {offsets = [0, 0], sizes = [2, 128], strides = [1, 1]} : vector<2x384xf32> to vector<2x128xf32>
    %125 = vector.extract_strided_slice %123 {offsets = [0, 128], sizes = [2, 256], strides = [1, 1]} : vector<2x384xf32> to vector<2x256xf32>
    %126 = vector.shape_cast %124 : vector<2x128xf32> to vector<2x1x128xf32>
    %127 = vector.broadcast %126 : vector<2x1x128xf32> to vector<2x8x128xf32>
    %128 = arith.addf %1, %127 : vector<2x8x128xf32>
    %129 = math.tanh %128 : vector<2x8x128xf32>
    %130 = vector.broadcast %9 : vector<1x1x128xf32> to vector<2x8x128xf32>
    %131 = arith.mulf %129, %130 : vector<2x8x128xf32>
    %cst_55 = arith.constant dense<0.000000e+00> : vector<2x8xf32>
    %132 = vector.multi_reduction <add>, %131, %cst_55 [2] : vector<2x8x128xf32> to vector<2x8xf32>
    %133 = arith.addf %132, %2 : vector<2x8xf32>
    %cst_56 = arith.constant dense<0xFF800000> : vector<2xf32>
    %134 = vector.multi_reduction <maximumf>, %133, %cst_56 [1] : vector<2x8xf32> to vector<2xf32>
    %135 = vector.shape_cast %134 : vector<2xf32> to vector<2x1xf32>
    %136 = vector.broadcast %135 : vector<2x1xf32> to vector<2x8xf32>
    %137 = arith.subf %133, %136 : vector<2x8xf32>
    %138 = math.exp %137 : vector<2x8xf32>
    %cst_57 = arith.constant dense<0.000000e+00> : vector<2xf32>
    %139 = vector.multi_reduction <add>, %138, %cst_57 [1] : vector<2x8xf32> to vector<2xf32>
    %140 = vector.shape_cast %139 : vector<2xf32> to vector<2x1xf32>
    %141 = tpu.reciprocal %140 {approx = true} : vector<2x1xf32> -> vector<2x1xf32>
    %142 = vector.broadcast %141 : vector<2x1xf32> to vector<2x8xf32>
    %143 = arith.mulf %138, %142 : vector<2x8xf32>
    %144 = vector.shape_cast %143 : vector<2x8xf32> to vector<2x8x1xf32>
    %145 = vector.broadcast %144 : vector<2x8x1xf32> to vector<2x8x32xf32>
    %146 = arith.mulf %145, %0 : vector<2x8x32xf32>
    %cst_58 = arith.constant dense<0.000000e+00> : vector<2x32xf32>
    %147 = vector.multi_reduction <add>, %146, %cst_58 [1] : vector<2x8x32xf32> to vector<2x32xf32>
    %148 = arith.truncf %147 : vector<2x32xf32> to vector<2x32xbf16>
    %cst_59 = arith.constant dense<0.000000e+00> : vector<2x256xf32>
    %149 = tpu.matmul %148, %7, %cst_59 {dimension_numbers = #tpu.dot_dimension_numbers<[1], [0], [0], [1], [0, 0, 1, 1], [], []>} : vector<2x32xbf16>, vector<32x256xbf16>, vector<2x256xf32> -> vector<2x256xf32>
    %150 = arith.addf %125, %149 : vector<2x256xf32>
    %151 = vector.broadcast %8 : vector<1x256xf32> to vector<2x256xf32>
    %152 = arith.addf %150, %151 : vector<2x256xf32>
    %153 = arith.truncf %152 : vector<2x256xf32> to vector<2x256xbf16>
    %cst_60 = arith.constant dense<0.000000e+00> : vector<2x128xf32>
    %154 = tpu.matmul %153, %10, %cst_60 {dimension_numbers = #tpu.dot_dimension_numbers<[1], [0], [0], [1], [0, 0, 1, 1], [], []>} : vector<2x256xbf16>, vector<256x128xbf16>, vector<2x128xf32> -> vector<2x128xf32>
    %155 = vector.broadcast %11 : vector<1x128xf32> to vector<2x128xf32>
    %156 = arith.addf %154, %155 : vector<2x128xf32>
    %c1_61 = arith.constant 1 : index
    %c0_62 = arith.constant 0 : index
    %c0_63 = arith.constant 0 : index
    %157 = vector.load %arg14[%c1_61, %c0_62, %c0_63] : memref<3x2x128xf32, #tpu.memory_space<vmem>>, vector<1x2x128xf32>
    %158 = vector.shape_cast %157 : vector<1x2x128xf32> to vector<2x128xf32>
    %159 = vector.shape_cast %156 : vector<2x128xf32> to vector<1x2x128xf32>
    tpu.vector_store %arg14[%c1_61, %c0_62, %c0_63], %159 {strides = array<i32>} : memref<3x2x128xf32, #tpu.memory_space<vmem>>, vector<1x2x128xf32>,
    %c1_64 = arith.constant 1 : index
    %c0_65 = arith.constant 0 : index
    %c56_66 = arith.constant 56 : index
    %160 = vector.load %arg14[%c1_64, %c0_65, %c56_66] : memref<3x2x128xf32, #tpu.memory_space<vmem>>, vector<1x2x8xf32>
    %161 = vector.shape_cast %160 : vector<1x2x8xf32> to vector<2x8xf32>
    %162 = vector.shape_cast %143 : vector<2x8xf32> to vector<1x2x8xf32>
    tpu.vector_store %arg14[%c1_64, %c0_65, %c56_66], %162 {strides = array<i32>} : memref<3x2x128xf32, #tpu.memory_space<vmem>>, vector<1x2x8xf32>,
    %c2 = arith.constant 2 : index
    %c0_67 = arith.constant 0 : index
    %c0_68 = arith.constant 0 : index
    %163 = vector.load %arg4[%c2, %c0_67, %c0_68] : memref<3x2x768xf32, #tpu.memory_space<vmem>>, vector<1x2x768xf32>
    %164 = vector.shape_cast %163 : vector<1x2x768xf32> to vector<2x768xf32>
    %cst_69 = arith.constant dense<0.000000e+00> : vector<2x768xf32>
    %165 = tpu.matmul %148, %3, %cst_69 {dimension_numbers = #tpu.dot_dimension_numbers<[1], [0], [0], [1], [0, 0, 1, 1], [], []>} : vector<2x32xbf16>, vector<32x768xbf16>, vector<2x768xf32> -> vector<2x768xf32>
    %166 = arith.addf %164, %165 : vector<2x768xf32>
    %cst_70 = arith.constant dense<0.000000e+00> : vector<2x768xf32>
    %167 = tpu.matmul %122, %4, %cst_70 {dimension_numbers = #tpu.dot_dimension_numbers<[1], [0], [0], [1], [0, 0, 1, 1], [], []>} : vector<2x256xbf16>, vector<256x768xbf16>, vector<2x768xf32> -> vector<2x768xf32>
    %168 = vector.broadcast %5 : vector<1x768xf32> to vector<2x768xf32>
    %169 = arith.addf %167, %168 : vector<2x768xf32>
    %170 = vector.extract_strided_slice %166 {offsets = [0, 0], sizes = [2, 256], strides = [1, 1]} : vector<2x768xf32> to vector<2x256xf32>
    %171 = vector.extract_strided_slice %169 {offsets = [0, 0], sizes = [2, 256], strides = [1, 1]} : vector<2x768xf32> to vector<2x256xf32>
    %172 = arith.addf %170, %171 : vector<2x256xf32>
    %173 = arith.negf %172 : vector<2x256xf32>
    %174 = math.exp %173 : vector<2x256xf32>
    %cst_71 = arith.constant 1.000000e+00 : f32
    %175 = vector.broadcast %cst_71 : f32 to vector<2x256xf32>
    %176 = arith.addf %175, %174 : vector<2x256xf32>
    %177 = arith.divf %175, %176 : vector<2x256xf32>
    %178 = vector.extract_strided_slice %166 {offsets = [0, 256], sizes = [2, 256], strides = [1, 1]} : vector<2x768xf32> to vector<2x256xf32>
    %179 = vector.extract_strided_slice %169 {offsets = [0, 256], sizes = [2, 256], strides = [1, 1]} : vector<2x768xf32> to vector<2x256xf32>
    %180 = arith.addf %178, %179 : vector<2x256xf32>
    %181 = arith.negf %180 : vector<2x256xf32>
    %182 = math.exp %181 : vector<2x256xf32>
    %cst_72 = arith.constant 1.000000e+00 : f32
    %183 = vector.broadcast %cst_72 : f32 to vector<2x256xf32>
    %184 = arith.addf %183, %182 : vector<2x256xf32>
    %185 = arith.divf %183, %184 : vector<2x256xf32>
    %186 = vector.extract_strided_slice %166 {offsets = [0, 512], sizes = [2, 256], strides = [1, 1]} : vector<2x768xf32> to vector<2x256xf32>
    %187 = vector.extract_strided_slice %169 {offsets = [0, 512], sizes = [2, 256], strides = [1, 1]} : vector<2x768xf32> to vector<2x256xf32>
    %188 = arith.mulf %177, %187 : vector<2x256xf32>
    %189 = arith.addf %186, %188 : vector<2x256xf32>
    %190 = math.tanh %189 : vector<2x256xf32>
    %cst_73 = arith.constant 1.000000e+00 : f32
    %191 = vector.broadcast %cst_73 : f32 to vector<2x256xf32>
    %192 = arith.subf %191, %185 : vector<2x256xf32>
    %193 = arith.mulf %192, %190 : vector<2x256xf32>
    %194 = arith.mulf %185, %121 : vector<2x256xf32>
    %195 = arith.addf %193, %194 : vector<2x256xf32>
    %196 = arith.truncf %195 : vector<2x256xf32> to vector<2x256xbf16>
    %cst_74 = arith.constant dense<0.000000e+00> : vector<2x384xf32>
    %197 = tpu.matmul %196, %6, %cst_74 {dimension_numbers = #tpu.dot_dimension_numbers<[1], [0], [0], [1], [0, 0, 1, 1], [], []>} : vector<2x256xbf16>, vector<256x384xbf16>, vector<2x384xf32> -> vector<2x384xf32>
    %198 = vector.extract_strided_slice %197 {offsets = [0, 0], sizes = [2, 128], strides = [1, 1]} : vector<2x384xf32> to vector<2x128xf32>
    %199 = vector.extract_strided_slice %197 {offsets = [0, 128], sizes = [2, 256], strides = [1, 1]} : vector<2x384xf32> to vector<2x256xf32>
    %200 = vector.shape_cast %198 : vector<2x128xf32> to vector<2x1x128xf32>
    %201 = vector.broadcast %200 : vector<2x1x128xf32> to vector<2x8x128xf32>
    %202 = arith.addf %1, %201 : vector<2x8x128xf32>
    %203 = math.tanh %202 : vector<2x8x128xf32>
    %204 = vector.broadcast %9 : vector<1x1x128xf32> to vector<2x8x128xf32>
    %205 = arith.mulf %203, %204 : vector<2x8x128xf32>
    %cst_75 = arith.constant dense<0.000000e+00> : vector<2x8xf32>
    %206 = vector.multi_reduction <add>, %205, %cst_75 [2] : vector<2x8x128xf32> to vector<2x8xf32>
    %207 = arith.addf %206, %2 : vector<2x8xf32>
    %cst_76 = arith.constant dense<0xFF800000> : vector<2xf32>
    %208 = vector.multi_reduction <maximumf>, %207, %cst_76 [1] : vector<2x8xf32> to vector<2xf32>
    %209 = vector.shape_cast %208 : vector<2xf32> to vector<2x1xf32>
    %210 = vector.broadcast %209 : vector<2x1xf32> to vector<2x8xf32>
    %211 = arith.subf %207, %210 : vector<2x8xf32>
    %212 = math.exp %211 : vector<2x8xf32>
    %cst_77 = arith.constant dense<0.000000e+00> : vector<2xf32>
    %213 = vector.multi_reduction <add>, %212, %cst_77 [1] : vector<2x8xf32> to vector<2xf32>
    %214 = vector.shape_cast %213 : vector<2xf32> to vector<2x1xf32>
    %215 = tpu.reciprocal %214 {approx = true} : vector<2x1xf32> -> vector<2x1xf32>
    %216 = vector.broadcast %215 : vector<2x1xf32> to vector<2x8xf32>
    %217 = arith.mulf %212, %216 : vector<2x8xf32>
    %218 = vector.shape_cast %217 : vector<2x8xf32> to vector<2x8x1xf32>
    %219 = vector.broadcast %218 : vector<2x8x1xf32> to vector<2x8x32xf32>
    %220 = arith.mulf %219, %0 : vector<2x8x32xf32>
    %cst_78 = arith.constant dense<0.000000e+00> : vector<2x32xf32>
    %221 = vector.multi_reduction <add>, %220, %cst_78 [1] : vector<2x8x32xf32> to vector<2x32xf32>
    %222 = arith.truncf %221 : vector<2x32xf32> to vector<2x32xbf16>
    %cst_79 = arith.constant dense<0.000000e+00> : vector<2x256xf32>
    %223 = tpu.matmul %222, %7, %cst_79 {dimension_numbers = #tpu.dot_dimension_numbers<[1], [0], [0], [1], [0, 0, 1, 1], [], []>} : vector<2x32xbf16>, vector<32x256xbf16>, vector<2x256xf32> -> vector<2x256xf32>
    %224 = arith.addf %199, %223 : vector<2x256xf32>
    %225 = vector.broadcast %8 : vector<1x256xf32> to vector<2x256xf32>
    %226 = arith.addf %224, %225 : vector<2x256xf32>
    %227 = arith.truncf %226 : vector<2x256xf32> to vector<2x256xbf16>
    %cst_80 = arith.constant dense<0.000000e+00> : vector<2x128xf32>
    %228 = tpu.matmul %227, %10, %cst_80 {dimension_numbers = #tpu.dot_dimension_numbers<[1], [0], [0], [1], [0, 0, 1, 1], [], []>} : vector<2x256xbf16>, vector<256x128xbf16>, vector<2x128xf32> -> vector<2x128xf32>
    %229 = vector.broadcast %11 : vector<1x128xf32> to vector<2x128xf32>
    %230 = arith.addf %228, %229 : vector<2x128xf32>
    %c2_81 = arith.constant 2 : index
    %c0_82 = arith.constant 0 : index
    %c0_83 = arith.constant 0 : index
    %231 = vector.load %arg14[%c2_81, %c0_82, %c0_83] : memref<3x2x128xf32, #tpu.memory_space<vmem>>, vector<1x2x128xf32>
    %232 = vector.shape_cast %231 : vector<1x2x128xf32> to vector<2x128xf32>
    %233 = vector.shape_cast %230 : vector<2x128xf32> to vector<1x2x128xf32>
    tpu.vector_store %arg14[%c2_81, %c0_82, %c0_83], %233 {strides = array<i32>} : memref<3x2x128xf32, #tpu.memory_space<vmem>>, vector<1x2x128xf32>,
    %c2_84 = arith.constant 2 : index
    %c0_85 = arith.constant 0 : index
    %c56_86 = arith.constant 56 : index
    %234 = vector.load %arg14[%c2_84, %c0_85, %c56_86] : memref<3x2x128xf32, #tpu.memory_space<vmem>>, vector<1x2x8xf32>
    %235 = vector.shape_cast %234 : vector<1x2x8xf32> to vector<2x8xf32>
    %236 = vector.shape_cast %217 : vector<2x8xf32> to vector<1x2x8xf32>
    tpu.vector_store %arg14[%c2_84, %c0_85, %c56_86], %236 {strides = array<i32>} : memref<3x2x128xf32, #tpu.memory_space<vmem>>, vector<1x2x8xf32>,
    return
  }
  func.func @transform_0(%arg0: i32) -> (i32, i32, i32) {
    %c0_i32 = arith.constant 0 : i32
    %c0_i32_0 = arith.constant 0 : i32
    %c0_i32_1 = arith.constant 0 : i32
    %c0_i32_2 = arith.constant 0 : i32
    return %c0_i32, %c0_i32_0, %c0_i32_1 : i32, i32, i32
  }
  func.func @transform_1(%arg0: i32) -> (i32, i32, i32) {
    %c0_i32 = arith.constant 0 : i32
    %c0_i32_0 = arith.constant 0 : i32
    %c0_i32_1 = arith.constant 0 : i32
    %c0_i32_2 = arith.constant 0 : i32
    return %c0_i32, %c0_i32_0, %c0_i32_1 : i32, i32, i32
  }
  func.func @transform_2(%arg0: i32) -> (i32, i32) {
    %c0_i32 = arith.constant 0 : i32
    %c0_i32_0 = arith.constant 0 : i32
    %c0_i32_1 = arith.constant 0 : i32
    return %c0_i32, %c0_i32_0 : i32, i32
  }
  func.func @transform_3(%arg0: i32) -> (i32, i32, i32) {
    %c0_i32 = arith.constant 0 : i32
    %c0_i32_0 = arith.constant 0 : i32
    %c0_i32_1 = arith.constant 0 : i32
    %c0_i32_2 = arith.constant 0 : i32
    return %c0_i32, %c0_i32_0, %c0_i32_1 : i32, i32, i32
  }
  func.func @transform_4(%arg0: i32) -> (i32, i32) {
    %c0_i32 = arith.constant 0 : i32
    %c0_i32_0 = arith.constant 0 : i32
    %c0_i32_1 = arith.constant 0 : i32
    return %c0_i32, %c0_i32_0 : i32, i32
  }
  func.func @transform_5(%arg0: i32) -> (i32, i32) {
    %c0_i32 = arith.constant 0 : i32
    %c0_i32_0 = arith.constant 0 : i32
    %c0_i32_1 = arith.constant 0 : i32
    return %c0_i32, %c0_i32_0 : i32, i32
  }
  func.func @transform_6(%arg0: i32) -> (i32, i32) {
    %c0_i32 = arith.constant 0 : i32
    %c0_i32_0 = arith.constant 0 : i32
    %c0_i32_1 = arith.constant 0 : i32
    return %c0_i32, %c0_i32_0 : i32, i32
  }
  func.func @transform_7(%arg0: i32) -> (i32, i32) {
    %c0_i32 = arith.constant 0 : i32
    %c0_i32_0 = arith.constant 0 : i32
    %c0_i32_1 = arith.constant 0 : i32
    return %c0_i32, %c0_i32_0 : i32, i32
  }
  func.func @transform_8(%arg0: i32) -> (i32, i32) {
    %c0_i32 = arith.constant 0 : i32
    %c0_i32_0 = arith.constant 0 : i32
    %c0_i32_1 = arith.constant 0 : i32
    return %c0_i32, %c0_i32_0 : i32, i32
  }
  func.func @transform_9(%arg0: i32) -> (i32, i32) {
    %c0_i32 = arith.constant 0 : i32
    %c0_i32_0 = arith.constant 0 : i32
    %c0_i32_1 = arith.constant 0 : i32
    return %c0_i32, %c0_i32_0 : i32, i32
  }
  func.func @transform_10(%arg0: i32) -> (i32, i32, i32) {
    %c0_i32 = arith.constant 0 : i32
    %c0_i32_0 = arith.constant 0 : i32
    %c0_i32_1 = arith.constant 0 : i32
    %c0_i32_2 = arith.constant 0 : i32
    return %c0_i32, %c0_i32_0, %c0_i32_1 : i32, i32, i32
  }
  func.func @transform_11(%arg0: i32) -> (i32, i32) {
    %c0_i32 = arith.constant 0 : i32
    %c0_i32_0 = arith.constant 0 : i32
    %c0_i32_1 = arith.constant 0 : i32
    return %c0_i32, %c0_i32_0 : i32, i32
  }
  func.func @transform_12(%arg0: i32) -> (i32, i32) {
    %c0_i32 = arith.constant 0 : i32
    %c0_i32_0 = arith.constant 0 : i32
    %c0_i32_1 = arith.constant 0 : i32
    return %c0_i32, %c0_i32_0 : i32, i32
  }
  func.func @transform_13(%arg0: i32) -> (i32, i32, i32) {
    %c0_i32 = arith.constant 0 : i32
    %c0_i32_0 = arith.constant 0 : i32
    %c0_i32_1 = arith.constant 0 : i32
    %c0_i32_2 = arith.constant 0 : i32
    return %c0_i32, %c0_i32_0, %c0_i32_1 : i32, i32, i32
  }
}

</mosaic_0001>

<bundles_post_ra>
// kernel: tpu_custom_call.1
= control target key start
LH: loop header
LB: loop body
LE: loop exit
PB: predicated region body
PF: predicated region fallthrough
CT: control target
= control target key end

     0   :  { %18 = vsyncpa [#allocation3], 0  ;;  %s5834_s0 = inlined_call_operand.hbm [shape: f32[2,8,32], index: 0, kind: input, shape index: {}]   ;;  %s5835_s1 = inlined_call_operand.hbm [shape: f32[2,8,128], index: 1, kind: input, shape index: {}]   ;;  %s5836_s2 = inlined_call_operand.vmem [shape: f32[2,8], index: 2, kind: input, shape index: {}]   ;;  %s5837_s3 = inlined_call_operand.hbm [shape: f32[3,2,768], index: 3, kind: input, shape index: {}]   ;;  %s5838_s4 = inlined_call_operand.hbm [shape: bf16[32,768], index: 4, kind: input, shape index: {}]   ;;  %s5839_s5 = inlined_call_operand.hbm [shape: bf16[256,768], index: 5, kind: input, shape index: {}]   ;;  %s5840_s6 = inlined_call_operand.vmem [shape: f32[1,768], index: 6, kind: input, shape index: {}]   ;;  %s5841_s7 = inlined_call_operand.hbm [shape: bf16[256,384], index: 7, kind: input, shape index: {}]   ;;  %s5842_s8 = inlined_call_operand.hbm [shape: bf16[32,256], index: 8, kind: input, shape index: {}]   ;;  %s5843_s9 = inlined_call_operand.vmem [shape: f32[1,256], index: 9, kind: input, shape index: {}]   ;;  %s5844_s10 = inlined_call_operand.vmem [shape: f32[1,1,128], index: 10, kind: input, shape index: {}]   ;;  %s5845_s11 = inlined_call_operand.hbm [shape: bf16[256,128], index: 11, kind: input, shape index: {}]   ;;  %s5846_s12 = inlined_call_operand.vmem [shape: f32[1,128], index: 12, kind: input, shape index: {}]   ;;  %s5847_s13 = inlined_call_operand.hbm [shape: f32[3,2,128], index: 13, kind: output, shape index: {}]  }
   0x1   :  { %19 = vsyncpa [#allocation6], 0 }
   0x2   :  { %20 = vsyncpa [#allocation9], 0 }
   0x3   :  { %21 = vsyncpa [#allocation12], 0 }
   0x4   :  { %22 = vsyncpa [#allocation15], 0 }
   0x5   :  { %23 = vsyncpa [#allocation4], 0  ;;  %s4503_s25 = smov [#allocation5]   ;;  %s4504_s27 = smov [#allocation8]  }
   0x6   :  { %s41_s26 = sshll.u32 %s4503_s25, 4  ;;  %s67_s28 = sshll.u32 %s4504_s27, 4  ;;  %s42_s26 = int_to_ptr.vmem [resolvable:$true] %s41_s26  ;;  %s4595_s28 = int_to_ptr.vmem [resolvable:$true] %s67_s28 }
   0x7   :  { %s4293_s14 = scalar_lea.hbm %s5835_s1, 256 }
   0x8   :  { %p4294_p0 = scmp.ne.s32.totalorder %s5835_s1, %s4293_s14  ;;  %p4297_p1 = scmp.lt.u32.totalorder %s4293_s14, %s5835_s1 }
   0xa   :  { %p4299_p2 = pnand %p4297_p1, %p4294_p0 }
   0xc   :  { %4302 = shalt.err (!%p4299_p2)
}
   0xd   :  { %s4303_s19 = scalar_lea.vmem %s42_s26, 256  ;;  %p4308_p4 = scmp.lt.s32.totalorder %s42_s26, %s42_s26 }
   0xe   :  { %p4304_p3 = scmp.ne.s32.totalorder %s42_s26, %s4303_s19  ;;  %p4309_p5 = scmp.lt.s32.totalorder %s4303_s19, %s4303_s19 }
  0x10   :  { %p4310_p6 = por %p4309_p5, %p4308_p4 }
  0x12   :  { %p4311_p7 = pnand %p4310_p6, %p4304_p3 }
  0x14   :  { %4314 = shalt.err (!%p4311_p7)
}
  0x15   :  { %s4505_s20 = smov 128   ;;  %s4506_s21 = smov 8  }
  0x16   :  { %47 = dma.hbm_to_vmem [thread:$0]  %s5835_s1, 256, %s42_s26, [#allocation6], %s4505_s20, %s4505_s20, %s4506_s21  }
  0x17   :  { %s4315_s27 = scalar_lea.hbm %s5838_s4, 1536 }
  0x18   :  { %p4316_p8 = scmp.ne.s32.totalorder %s5838_s4, %s4315_s27  ;;  %p4319_p9 = scmp.lt.u32.totalorder %s4315_s27, %s5838_s4 }
  0x1a   :  { %p4321_p10 = pnand %p4319_p9, %p4316_p8 }
  0x1c   :  { %4324 = shalt.err (!%p4321_p10)
}
  0x1d   :  { %s4325_s16 = scalar_lea.vmem %s4595_s28, 1536  ;;  %p4330_p12 = scmp.lt.s32.totalorder %s4595_s28, %s4595_s28 }
  0x1e   :  { %p4326_p11 = scmp.ne.s32.totalorder %s4595_s28, %s4325_s16  ;;  %p4331_p13 = scmp.lt.s32.totalorder %s4325_s16, %s4325_s16 }
  0x20   :  { %p4332_p0 = por %p4331_p13, %p4330_p12 }
  0x22   :  { %p4333_p1 = pnand %p4332_p0, %p4326_p11 }
  0x24   :  { %4336 = shalt.err (!%p4333_p1)
}
  0x25   :  { %s4507_s1 = smov 384   ;;  %s4508_s26 = smov 24  }
  0x26   :  { %73 = dma.hbm_to_vmem [thread:$0]  %s5838_s4, 1536, %s4595_s28, [#allocation9], %s4507_s1, %s4507_s1, %s4508_s26  }
  0x27   :  { %s4509_s19 = smov [#allocation11]   ;;  %s4510_s23 = smov [#allocation2]  }
  0x28   :  { %s93_s22 = sshll.u32 %s4509_s19, 4  ;;  %s29_s24 = sshll.u32 %s4510_s23, 4  ;;  %s94_s22 = int_to_ptr.vmem [resolvable:$true] %s93_s22  ;;  %s4632_s24 = int_to_ptr.vmem [resolvable:$true] %s29_s24 }
  0x29   :  { %s4337_s29 = scalar_lea.hbm %s5841_s7, 6144 }
  0x2a   :  { %p4338_p2 = scmp.ne.s32.totalorder %s5841_s7, %s4337_s29  ;;  %p4341_p3 = scmp.lt.u32.totalorder %s4337_s29, %s5841_s7 }
  0x2c   :  { %p4343_p4 = pnand %p4341_p3, %p4338_p2 }
  0x2e   :  { %4346 = shalt.err (!%p4343_p4)
}
  0x2f   :  { %s4347_s4 = scalar_lea.vmem %s94_s22, 6144  ;;  %p4352_p6 = scmp.lt.s32.totalorder %s94_s22, %s94_s22 }
  0x30   :  { %p4348_p5 = scmp.ne.s32.totalorder %s94_s22, %s4347_s4  ;;  %p4353_p7 = scmp.lt.s32.totalorder %s4347_s4, %s4347_s4 }
  0x32   :  { %p4354_p8 = por %p4353_p7, %p4352_p6 }
  0x34   :  { %p4355_p9 = pnand %p4354_p8, %p4348_p5 }
  0x36   :  { %4358 = shalt.err (!%p4355_p9)
}
  0x37   :  { %s4511_s28 = smov 192   ;;  %s4512_s17 = smov 12  }
  0x38   :  { %99 = dma.hbm_to_vmem [thread:$0]  %s5841_s7, 6144, %s94_s22, [#allocation12], %s4511_s28, %s4511_s28, %s4512_s17  }
  0x39   :  { %s4359_s27 = scalar_lea.hbm %s5834_s0, 256 }
  0x3a   :  { %p4360_p10 = scmp.ne.s32.totalorder %s5834_s0, %s4359_s27  ;;  %p4363_p11 = scmp.lt.u32.totalorder %s4359_s27, %s5834_s0 }
  0x3c   :  { %p4365_p12 = pnand %p4363_p11, %p4360_p10 }
  0x3e   :  { %4368 = shalt.err (!%p4365_p12)
}
  0x3f   :  { %s4369_s16 = scalar_lea.vmem %s4632_s24, 256  ;;  %p4374_p0 = scmp.lt.s32.totalorder %s4632_s24, %s4632_s24 }
  0x40   :  { %p4370_p13 = scmp.ne.s32.totalorder %s4632_s24, %s4369_s16  ;;  %p4375_p1 = scmp.lt.s32.totalorder %s4369_s16, %s4369_s16 }
  0x42   :  { %p4376_p2 = por %p4375_p1, %p4374_p0 }
  0x44   :  { %p4377_p3 = pnand %p4376_p2, %p4370_p13 }
  0x46   :  { %4380 = shalt.err (!%p4377_p3)
}
  0x47   :  { %35 = dma.hbm_to_vmem [thread:$0]  %s5834_s0, 256, %s4632_s24, [#allocation3], %s4505_s20, %s4505_s20, %s4506_s21  }
  0x48   :  { %s4513_s4 = smov [#allocation7]   ;;  %s4514_s19 = smov [#allocation10]  }
  0x49   :  { %s55_s18 = sshll.u32 %s4513_s4, 4  ;;  %s79_s23 = sshll.u32 %s4514_s19, 4  ;;  %s56_s18 = int_to_ptr.vmem [resolvable:$true] %s55_s18  ;;  %s4669_s23 = int_to_ptr.vmem [resolvable:$true] %s79_s23 }
  0x4a   :  { %s4381_s29 = scalar_lea.hbm %s5837_s3, 576 }
  0x4b   :  { %p4382_p4 = scmp.ne.s32.totalorder %s5837_s3, %s4381_s29  ;;  %p4385_p5 = scmp.lt.u32.totalorder %s4381_s29, %s5837_s3 }
  0x4d   :  { %p4387_p6 = pnand %p4385_p5, %p4382_p4 }
  0x4f   :  { %4390 = shalt.err (!%p4387_p6)
}
  0x50   :  { %s4391_s0 = scalar_lea.vmem %s56_s18, 576  ;;  %p4396_p8 = scmp.lt.s32.totalorder %s56_s18, %s56_s18 }
  0x51   :  { %p4392_p7 = scmp.ne.s32.totalorder %s56_s18, %s4391_s0  ;;  %p4397_p9 = scmp.lt.s32.totalorder %s4391_s0, %s4391_s0 }
  0x53   :  { %p4398_p10 = por %p4397_p9, %p4396_p8 }
  0x55   :  { %p4399_p11 = pnand %p4398_p10, %p4392_p7 }
  0x57   :  { %4402 = shalt.err (!%p4399_p11)
}
  0x58   :  { %61 = dma.hbm_to_vmem [thread:$0]  %s5837_s3, 576, %s56_s18, [#allocation6], %s4511_s28, %s4511_s28, %s4512_s17  }
  0x59   :  { %s4403_s19 = scalar_lea.hbm %s5839_s5, 12288 }
  0x5a   :  { %p4404_p12 = scmp.ne.s32.totalorder %s5839_s5, %s4403_s19  ;;  %p4407_p13 = scmp.lt.u32.totalorder %s4403_s19, %s5839_s5 }
  0x5c   :  { %p4409_p0 = pnand %p4407_p13, %p4404_p12 }
  0x5e   :  { %4412 = shalt.err (!%p4409_p0)
}
  0x5f   :  { %s4413_s14 = scalar_lea.vmem %s4669_s23, 12288  ;;  %p4418_p2 = scmp.lt.s32.totalorder %s4669_s23, %s4669_s23 }
  0x60   :  { %p4414_p1 = scmp.ne.s32.totalorder %s4669_s23, %s4413_s14  ;;  %p4419_p3 = scmp.lt.s32.totalorder %s4413_s14, %s4413_s14 }
  0x62   :  { %p4420_p4 = por %p4419_p3, %p4418_p2 }
  0x64   :  { %p4421_p5 = pnand %p4420_p4, %p4414_p1 }
  0x66   :  { %4424 = shalt.err (!%p4421_p5)
}
  0x67   :  { %85 = dma.hbm_to_vmem [thread:$0]  %s5839_s5, 12288, %s4669_s23, [#allocation9], %s4507_s1, %s4507_s1, %s4508_s26  }
  0x68   :  { %s4515_s17 = smov [#allocation13]   ;;  %s4516_s15 = smov [#allocation14]  }
  0x69   :  { %s105_s18 = sshll.u32 %s4515_s17, 4  ;;  %s121_s16 = sshll.u32 %s4516_s15, 4  ;;  %s106_s18 = int_to_ptr.vmem [resolvable:$true] %s105_s18  ;;  %s4706_s16 = int_to_ptr.vmem [resolvable:$true] %s121_s16 }
  0x6a   :  { %s4425_s7 = scalar_lea.hbm %s5842_s8, 512 }
  0x6b   :  { %p4426_p6 = scmp.ne.s32.totalorder %s5842_s8, %s4425_s7  ;;  %p4429_p7 = scmp.lt.u32.totalorder %s4425_s7, %s5842_s8 }
  0x6d   :  { %p4431_p8 = pnand %p4429_p7, %p4426_p6 }
  0x6f   :  { %4434 = shalt.err (!%p4431_p8)
}
  0x70   :  { %s4435_s5 = scalar_lea.vmem %s106_s18, 512  ;;  %p4440_p10 = scmp.lt.s32.totalorder %s106_s18, %s106_s18 }
  0x71   :  { %p4436_p9 = scmp.ne.s32.totalorder %s106_s18, %s4435_s5  ;;  %p4441_p11 = scmp.lt.s32.totalorder %s4435_s5, %s4435_s5 }
  0x73   :  { %p4442_p12 = por %p4441_p11, %p4440_p10 }
  0x75   :  { %p4443_p13 = pnand %p4442_p12, %p4436_p9 }
  0x77   :  { %4446 = shalt.err (!%p4443_p13)
}
  0x78   :  { %111 = dma.hbm_to_vmem [thread:$0]  %s5842_s8, 512, %s106_s18, [#allocation12], %s4505_s20, %s4505_s20, %s4506_s21  }
  0x79   :  { %s4447_s29 = scalar_lea.hbm %s5845_s11, 2048 }
  0x7a   :  { %p4448_p0 = scmp.ne.s32.totalorder %s5845_s11, %s4447_s29  ;;  %p4451_p1 = scmp.lt.u32.totalorder %s4447_s29, %s5845_s11 }
  0x7c   :  { %p4453_p2 = pnand %p4451_p1, %p4448_p0 }
  0x7e   :  { %4456 = shalt.err (!%p4453_p2)
}
  0x7f   :  { %s4457_s17 = scalar_lea.vmem %s4706_s16, 2048  ;;  %p4462_p4 = scmp.lt.s32.totalorder %s4706_s16, %s4706_s16 }
  0x80   :  { %p4458_p3 = scmp.ne.s32.totalorder %s4706_s16, %s4457_s17  ;;  %p4463_p5 = scmp.lt.s32.totalorder %s4457_s17, %s4457_s17 }
  0x82   :  { %p4464_p6 = por %p4463_p5, %p4462_p4 }
  0x84   :  { %p4465_p7 = pnand %p4464_p6, %p4458_p3 }
  0x86   :  { %4468 = shalt.err (!%p4465_p7)
}
  0x87   :  { %s4517_s8 = smov 64   ;;  %s4518_s20 = smov 4  }
  0x88   :  { %127 = dma.hbm_to_vmem [thread:$0]  %s5845_s11, 2048, %s4706_s16, [#allocation15], %s4517_s8, %s4517_s8, %s4518_s20  }
  0x89   :  { %4491 = dma.done.wait [#allocation3], 256  }
  0x8a   :  { %4492 = vsyncadd [#allocation3], 4294967040 }
  0x8b   :  { %4493 = dma.done.wait [#allocation6], 832  }
  0x8c   :  { %4494 = vsyncadd [#allocation6], 4294966464 }
  0x8d   :  { %4495 = dma.done.wait [#allocation9], 13824  }
  0x8e   :  { %4496 = vsyncadd [#allocation9], 4294953472 }
  0x8f   :  { %4497 = dma.done.wait [#allocation12], 6656  }
  0x90   :  { %4498 = vsyncadd [#allocation12], 4294960640 }
  0x91   :  { %4499 = dma.done.wait [#allocation15], 2048  }
  0x92   :  { %4500 = vsyncadd [#allocation15], 4294965248  ;;  %v5849_v0 = vmov 0   ;;  %v3803_v1 = vld [vmem:[#allocation8 + $0x4] ss:$24 sps:$4 sm:$0xff]   ;;  %vm1723_vm0 = vcmask 1041409  }
  0x93   :  { %470 = vmatprep.mubr.bf16.mxu1 %v5849_v0  ;;  %552 = vmatprep.mubr.bf16.mxu0 %v5849_v0  ;;  %v3805_v2 = vld [vmem:[#allocation8 + $0x14] ss:$24 sps:$4 sm:$0xff]   ;;  %v3807_v3 = vld [vmem:[#allocation8] ss:$24 sps:$4 sm:$0xff]   ;;  %v3808_v4 = vld [vmem:[#allocation8 + $0x10] ss:$24 sps:$4 sm:$0xff]  }
  0x94   :  { %3801 = vset.pattern.permute.xlu0 %v5849_v0  ;;  %3802 = vset.pattern.permute.xlu1 %v5849_v0  ;;  %v3809_v5 = vld [vmem:[#allocation8 + $0x34] ss:$24 sps:$4 sm:$0xff]   ;;  %v3811_v6 = vld [vmem:[#allocation8 + $0x44] ss:$24 sps:$4 sm:$0xff]   ;;  %v3813_v7 = vld [vmem:[#allocation8 + $0x30] ss:$24 sps:$4 sm:$0xff]  }
  0x95   :  { %438 = vmatprep.subr.bf16.mxu1 %v3803_v1  ;;  %520 = vmatprep.subr.bf16.mxu0 %v3805_v2  ;;  %v3814_v8 = vld [vmem:[#allocation8 + $0x40] ss:$24 sps:$4 sm:$0xff]   ;;  %v3817_v9 = vld [vmem:[#allocation8 + $0xc] ss:$24 sps:$4 sm:$0xff]   ;;  %v3823_v13 = vld [vmem:[#allocation8 + $0x3c] ss:$24 sps:$4 sm:$0xff]  }
  0x96   :  { %439 = vmatpush1.bf16.msra.mxu1 %v3807_v3  ;;  %521 = vmatpush1.bf16.msra.mxu0 %v3808_v4  ;;  %v3815_v10 = vld [vmem:[#allocation8 + $0x8] ss:$24 sps:$4 sm:$0xff]   ;;  %v3820_v11 = vld [vmem:[#allocation10 + $0xc] ss:$24 sps:$4 sm:$0xff]   ;;  %v3826_v14 = vld [vmem:[#allocation10 + $0x3c] ss:$24 sps:$4 sm:$0xff]  }
  0x97   :  { %440 = vmatprep.subr.bf16.mxu1 %v3809_v5  ;;  %522 = vmatprep.subr.bf16.mxu0 %v3811_v6  ;;  %v3818_v12 = vld [vmem:[#allocation10 + $0x8] ss:$24 sps:$4 sm:$0xff]   ;;  %v3821_v15 = vld [vmem:[#allocation8 + $0x38] ss:$24 sps:$4 sm:$0xff]   ;;  %v3829_v17 = vld [vmem:[#allocation10 + $0x4] ss:$24 sps:$4 sm:$0xff]  }
  0x98   :  { %v3824_v16 = vld [vmem:[#allocation10 + $0x38] ss:$24 sps:$4 sm:$0xff]   ;;  %v3832_v18 = vld [vmem:[#allocation10 + $0x6c] ss:$24 sps:$4 sm:$0xff]   ;;  %v3830_v20 = vld [vmem:[#allocation10 + $0x68] ss:$24 sps:$4 sm:$0xff]  }
  0x99   :  { %v3827_v19 = vld [vmem:[#allocation10] ss:$24 sps:$4 sm:$0xff]   ;;  %v3835_v21 = vld [vmem:[#allocation10 + $0x34] ss:$24 sps:$4 sm:$0xff]   ;;  %v3833_v23 = vld [vmem:[#allocation10 + $0x30] ss:$24 sps:$4 sm:$0xff]  }
  0x9a   :  { %441 = vmatpush1.bf16.msra.mxu1 %v3813_v7  ;;  %523 = vmatpush1.bf16.msra.mxu0 %v3814_v8  ;;  %v3838_v22 = vld [vmem:[#allocation10 + $0x9c] ss:$24 sps:$4 sm:$0xff]   ;;  %v3836_v24 = vld [vmem:[#allocation10 + $0x98] ss:$24 sps:$4 sm:$0xff]   ;;  %v3844_v26 = vld [vmem:[#allocation10 + $0xcc] ss:$24 sps:$4 sm:$0xff]  }
  0x9b   :  { %479 = vmatprep.subr.bf16.mxu1 %v3817_v9  ;;  %1148 = vmatprep.subr.bf16.mxu0 %v3820_v11  ;;  %v3841_v25 = vld [vmem:[#allocation10 + $0x64] ss:$24 sps:$4 sm:$0xff]   ;;  %v3839_v27 = vld [vmem:[#allocation10 + $0x60] ss:$24 sps:$4 sm:$0xff]   ;;  %v3847_v29 = vld [vmem:[#allocation10 + $0x94] ss:$24 sps:$4 sm:$0xff]  }
  0x9c   :  { %v3842_v28 = vld [vmem:[#allocation10 + $0xc8] ss:$24 sps:$4 sm:$0xff]   ;;  %v3850_v30 = vld [vmem:[#allocation10 + $0xfc] ss:$24 sps:$4 sm:$0xff]   ;;  %v3848_v32 = vld [vmem:[#allocation10 + $0xf8] ss:$24 sps:$4 sm:$0xff]  }
  0x9d   :  { %471 = vmatmul.mubr.bf16.vlgmr.msra.gmra.mrb[0].mxu1 %v5849_v0  ;;  %553 = vmatmul.mubr.bf16.vlgmr.msra.gmra.mrb[0].mxu0 %v5849_v0  ;;  %v3845_v31 = vld [vmem:[#allocation10 + $0x90] ss:$24 sps:$4 sm:$0xff]   ;;  %v3853_v33 = vld [vmem:[#allocation10 + $0xc4] ss:$24 sps:$4 sm:$0xff]   ;;  %v3851_v35 = vld [vmem:[#allocation10 + $0xc0] ss:$24 sps:$4 sm:$0xff]  }
  0x9e   :  { %480 = vmatpush1.bf16.msra.mxu1 %v3815_v10  ;;  %1149 = vmatpush1.bf16.msra.mxu0 %v3818_v12  ;;  %v3856_v34 = vld [vmem:[#allocation10 + $0x12c] ss:$24 sps:$4 sm:$0xff]   ;;  %v3854_v36 = vld [vmem:[#allocation10 + $0x128] ss:$24 sps:$4 sm:$0xff]   ;;  %v3862_v38 = vld [vmem:[#allocation10 + $0x15c] ss:$24 sps:$4 sm:$0xff]  }
  0x9f   :  { %481 = vmatprep.subr.bf16.mxu1 %v3823_v13  ;;  %1150 = vmatprep.subr.bf16.mxu0 %v3826_v14  ;;  %v3859_v37 = vld [vmem:[#allocation10 + $0xf4] ss:$24 sps:$4 sm:$0xff]   ;;  %v3857_v39 = vld [vmem:[#allocation10 + $0xf0] ss:$24 sps:$4 sm:$0xff]   ;;  %v3865_v41 = vld [vmem:[#allocation10 + $0x124] ss:$24 sps:$4 sm:$0xff]  }
  0xa0   :  { %511 = vmatprep.mubr.bf16.mxu1 %v5849_v0  ;;  %1180 = vmatprep.mubr.bf16.mxu0 %v5849_v0  ;;  %v3860_v40 = vld [vmem:[#allocation10 + $0x158] ss:$24 sps:$4 sm:$0xff]   ;;  %v3868_v42 = vld [vmem:[#allocation10 + $0x18c] ss:$24 sps:$4 sm:$0xff]   ;;  %v3866_v44 = vld [vmem:[#allocation10 + $0x188] ss:$24 sps:$4 sm:$0xff]  }
  0xa1   :  { %v3863_v43 = vld [vmem:[#allocation10 + $0x120] ss:$24 sps:$4 sm:$0xff]   ;;  %v3871_v45 = vld [vmem:[#allocation10 + $0x154] ss:$24 sps:$4 sm:$0xff]   ;;  %v3869_v47 = vld [vmem:[#allocation10 + $0x150] ss:$24 sps:$4 sm:$0xff]  }
  0xa2   :  { %482 = vmatpush1.bf16.msra.mxu1 %v3821_v15  ;;  %1151 = vmatpush1.bf16.msra.mxu0 %v3824_v16  ;;  %v3874_v46 = vld [vmem:[#allocation10 + $0x1bc] ss:$24 sps:$4 sm:$0xff]   ;;  %v3872_v48 = vld [vmem:[#allocation10 + $0x1b8] ss:$24 sps:$4 sm:$0xff]   ;;  %v3880_v50 = vld [vmem:[#allocation10 + $0x1ec] ss:$24 sps:$4 sm:$0xff]  }
  0xa3   :  { %1107 = vmatprep.subr.bf16.mxu1 %v3829_v17  ;;  %1152 = vmatprep.subr.bf16.mxu0 %v3832_v18  ;;  %v3877_v49 = vld [vmem:[#allocation10 + $0x184] ss:$24 sps:$4 sm:$0xff]   ;;  %v3875_v51 = vld [vmem:[#allocation10 + $0x180] ss:$24 sps:$4 sm:$0xff]   ;;  %v3883_v53 = vld [vmem:[#allocation10 + $0x1b4] ss:$24 sps:$4 sm:$0xff]  }
  0xa4   :  { %v3878_v52 = vld [vmem:[#allocation10 + $0x1e8] ss:$24 sps:$4 sm:$0xff]   ;;  %v3886_v54 = vld [vmem:[#allocation10 + $0x21c] ss:$24 sps:$4 sm:$0xff]   ;;  %v3884_v56 = vld [vmem:[#allocation10 + $0x218] ss:$24 sps:$4 sm:$0xff]  }
  0xa5   :  { %512 = vmatmul.mubr.bf16.vlgmr.msra.gmra.mrb[4].mxu1 %v5849_v0  ;;  %v3881_v55 = vld [vmem:[#allocation10 + $0x1b0] ss:$24 sps:$4 sm:$0xff]   ;;  %v3889_v57 = vld [vmem:[#allocation10 + $0x1e4] ss:$24 sps:$4 sm:$0xff]   ;;  %v3887_v59 = vld [vmem:[#allocation10 + $0x1e0] ss:$24 sps:$4 sm:$0xff]  }
  0xa6   :  { %1108 = vmatpush1.bf16.msra.mxu1 %v3827_v19  ;;  %1153 = vmatpush1.bf16.msra.mxu0 %v3830_v20  ;;  %v3892_v58 = vld [vmem:[#allocation10 + $0x24c] ss:$24 sps:$4 sm:$0xff]   ;;  %v3890_v60 = vld [vmem:[#allocation10 + $0x248] ss:$24 sps:$4 sm:$0xff]   ;;  %v3898_v62 = vld [vmem:[#allocation10 + $0x27c] ss:$24 sps:$4 sm:$0xff]  }
  0xa7   :  { %1109 = vmatprep.subr.bf16.mxu1 %v3835_v21  ;;  %1154 = vmatprep.subr.bf16.mxu0 %v3838_v22  ;;  %v3895_v61 = vld [vmem:[#allocation10 + $0x214] ss:$24 sps:$4 sm:$0xff]   ;;  %v3893_v63 = vld [vmem:[#allocation10 + $0x210] ss:$24 sps:$4 sm:$0xff]   ;;  %v3901_v2 = vld [vmem:[#allocation10 + $0x244] ss:$24 sps:$4 sm:$0xff]  }
  0xa8   :  { %1139 = vmatprep.mubr.bf16.mxu1 %v5849_v0  ;;  %v3896_v1 = vld [vmem:[#allocation10 + $0x278] ss:$24 sps:$4 sm:$0xff]   ;;  %v3904_v3 = vld [vmem:[#allocation10 + $0x2ac] ss:$24 sps:$4 sm:$0xff]   ;;  %v3902_v5 = vld [vmem:[#allocation10 + $0x2a8] ss:$24 sps:$4 sm:$0xff]  }
  0xa9   :  { %v3899_v4 = vld [vmem:[#allocation10 + $0x240] ss:$24 sps:$4 sm:$0xff]   ;;  %v3907_v6 = vld [vmem:[#allocation10 + $0x274] ss:$24 sps:$4 sm:$0xff]   ;;  %v3905_v8 = vld [vmem:[#allocation10 + $0x270] ss:$24 sps:$4 sm:$0xff]  }
  0xaa   :  { %1110 = vmatpush1.bf16.msra.mxu1 %v3833_v23  ;;  %1155 = vmatpush1.bf16.msra.mxu0 %v3836_v24  ;;  %v3910_v7 = vld [vmem:[#allocation10 + $0x2dc] ss:$24 sps:$4 sm:$0xff]   ;;  %v3908_v9 = vld [vmem:[#allocation10 + $0x2d8] ss:$24 sps:$4 sm:$0xff]   ;;  %vm1726_vm1 = vcmask 58368   ;;  %vm434_vm2 = vcmask 261120  }
  0xab   :  { %1111 = vmatprep.subr.bf16.mxu1 %v3841_v25  ;;  %1156 = vmatprep.subr.bf16.mxu0 %v3844_v26  ;;  %v3913_v10 = vld [vmem:[#allocation10 + $0x2a4] ss:$24 sps:$4 sm:$0xff]   ;;  %v3911_v11 = vld [vmem:[#allocation10 + $0x2a0] ss:$24 sps:$4 sm:$0xff]   ;;  %v3916_v12 = vld [vmem:[#allocation10 + $0x2d4] ss:$24 sps:$4 sm:$0xff]  }
  0xac   :  { %v3914_v13 = vld [vmem:[#allocation10 + $0x2d0] ss:$24 sps:$4 sm:$0xff]   ;;  %v3919_v14 = vld [vmem:[#allocation10 + $0x14] ss:$24 sps:$4 sm:$0xff]   ;;  %v3922_v16 = vld [vmem:[#allocation10 + $0x44] ss:$24 sps:$4 sm:$0xff]  }
  0xad   :  { %v3917_v15 = vld [vmem:[#allocation10 + $0x10] ss:$24 sps:$4 sm:$0xff]   ;;  %v3920_v17 = vld [vmem:[#allocation10 + $0x40] ss:$24 sps:$4 sm:$0xff]   ;;  %v3925_v18 = vld [vmem:[#allocation10 + $0x74] ss:$24 sps:$4 sm:$0xff]  }
  0xae   :  { %1112 = vmatpush1.bf16.msra.mxu1 %v3839_v27  ;;  %1157 = vmatpush1.bf16.msra.mxu0 %v3842_v28  ;;  %v4753_v19 = vld [vmem:[#allocation10 + $0x70] ss:$24 sps:$4 sm:$0xff]   ;;  %v4755_v20 = vld [vmem:[#allocation10 + $0xa4] ss:$24 sps:$4 sm:$0xff]   ;;  %v4757_v21 = vld [vmem:[#allocation10 + $0xa0] ss:$24 sps:$4 sm:$0xff]  }
  0xaf   :  { %1113 = vmatprep.subr.bf16.mxu1 %v3847_v29  ;;  %1158 = vmatprep.subr.bf16.mxu0 %v3850_v30  ;;  %v4759_v22 = vld [vmem:[#allocation10 + $0xd4] ss:$24 sps:$4 sm:$0xff]   ;;  %v4763_v23 = vld [vmem:[#allocation10 + $0xd0] ss:$24 sps:$4 sm:$0xff]   ;;  %v4765_v24 = vld [vmem:[#allocation10 + $0x104] ss:$24 sps:$4 sm:$0xff]  }
  0xb0   :  { %v4769_v25 = vld [vmem:[#allocation10 + $0x100] ss:$24 sps:$4 sm:$0xff]   ;;  %v4771_v26 = vld [vmem:[#allocation10 + $0x134] ss:$24 sps:$4 sm:$0xff]   ;;  %v4775_v27 = vld [vmem:[#allocation10 + $0x130] ss:$24 sps:$4 sm:$0xff]  }
  0xb1   :  { %v4779_v28 = vld [vmem:[#allocation10 + $0x164] ss:$24 sps:$4 sm:$0xff]   ;;  %v4782_v29 = vld [vmem:[#allocation10 + $0x160] ss:$24 sps:$4 sm:$0xff]   ;;  %v4785_v30 = vld [vmem:[#allocation10 + $0x194] ss:$24 sps:$4 sm:$0xff]  }
  0xb2   :  { %1114 = vmatpush1.bf16.msra.mxu1 %v3845_v31  ;;  %1159 = vmatpush1.bf16.msra.mxu0 %v3848_v32  ;;  %v4788_v31 = vld [vmem:[#allocation10 + $0x190] ss:$24 sps:$4 sm:$0xff]   ;;  %v4791_v32 = vld [vmem:[#allocation10 + $0x1c4] ss:$24 sps:$4 sm:$0xff]   ;;  %vm2051_vm3 = vcmask 517568  }
  0xb3   :  { %1115 = vmatprep.subr.bf16.mxu1 %v3853_v33  ;;  %1160 = vmatprep.subr.bf16.mxu0 %v3856_v34  ;;  %v4794_v33 = vld [vmem:[#allocation10 + $0x1c0] ss:$24 sps:$4 sm:$0xff]   ;;  %v4797_v34 = vld [vmem:[#allocation10 + $0x1f4] ss:$24 sps:$4 sm:$0xff]  }
  0xb6   :  { %1116 = vmatpush1.bf16.msra.mxu1 %v3851_v35  ;;  %1161 = vmatpush1.bf16.msra.mxu0 %v3854_v36  ;;  %v4800_v35 = vld [vmem:[#allocation10 + $0x1f0] ss:$24 sps:$4 sm:$0xff]   ;;  %v4803_v36 = vld [vmem:[#allocation10 + $0x224] ss:$24 sps:$4 sm:$0xff]  }
  0xb7   :  { %1117 = vmatprep.subr.bf16.mxu1 %v3859_v37  ;;  %1162 = vmatprep.subr.bf16.mxu0 %v3862_v38  ;;  %v4806_v37 = vld [vmem:[#allocation10 + $0x220] ss:$24 sps:$4 sm:$0xff]   ;;  %v4809_v38 = vld [vmem:[#allocation10 + $0x254] ss:$24 sps:$4 sm:$0xff]  }
  0xba   :  { %1118 = vmatpush1.bf16.msra.mxu1 %v3857_v39  ;;  %1163 = vmatpush1.bf16.msra.mxu0 %v3860_v40  ;;  %v4812_v39 = vld [vmem:[#allocation10 + $0x250] ss:$24 sps:$4 sm:$0xff]   ;;  %v4815_v40 = vld [vmem:[#allocation10 + $0x284] ss:$24 sps:$4 sm:$0xff]  }
  0xbb   :  { %1119 = vmatprep.subr.bf16.mxu1 %v3865_v41  ;;  %1164 = vmatprep.subr.bf16.mxu0 %v3868_v42  ;;  %v4818_v41 = vld [vmem:[#allocation10 + $0x280] ss:$24 sps:$4 sm:$0xff]   ;;  %v4821_v42 = vld [vmem:[#allocation10 + $0x2b4] ss:$24 sps:$4 sm:$0xff]  }
  0xbe   :  { %1120 = vmatpush1.bf16.msra.mxu1 %v3863_v43  ;;  %1165 = vmatpush1.bf16.msra.mxu0 %v3866_v44  ;;  %v4824_v43 = vld [vmem:[#allocation10 + $0x2b0] ss:$24 sps:$4 sm:$0xff]   ;;  %v4827_v44 = vld [vmem:[#allocation10 + $0x2e4] ss:$24 sps:$4 sm:$0xff]  }
  0xbf   :  { %1121 = vmatprep.subr.bf16.mxu1 %v3871_v45  ;;  %1166 = vmatprep.subr.bf16.mxu0 %v3874_v46  ;;  %v4830_v45 = vld [vmem:[#allocation10 + $0x2e0] ss:$24 sps:$4 sm:$0xff]  }
  0xc0   :  { %v3965_v46 = vld [vmem:[#allocation11] ss:$12 sps:$4 sm:$0xff]  }
  0xc2   :  { %1122 = vmatpush1.bf16.msra.mxu1 %v3869_v47  ;;  %1167 = vmatpush1.bf16.msra.mxu0 %v3872_v48  ;;  %v3967_v47 = vld [vmem:[#allocation11 + $0x4] ss:$12 sps:$4 sm:$0xff]   ;;  %v3970_v48 = vld [vmem:[#allocation11 + $0x1c] ss:$12 sps:$4 sm:$0xff]  }
  0xc3   :  { %1123 = vmatprep.subr.bf16.mxu1 %v3877_v49  ;;  %1168 = vmatprep.subr.bf16.mxu0 %v3880_v50  ;;  %v3968_v49 = vld [vmem:[#allocation11 + $0x18] ss:$12 sps:$4 sm:$0xff]   ;;  %v3973_v50 = vld [vmem:[#allocation11 + $0x34] ss:$12 sps:$4 sm:$0xff]  }
  0xc6   :  { %1124 = vmatpush1.bf16.msra.mxu1 %v3875_v51  ;;  %1169 = vmatpush1.bf16.msra.mxu0 %v3878_v52  ;;  %v3971_v51 = vld [vmem:[#allocation11 + $0x30] ss:$12 sps:$4 sm:$0xff]   ;;  %v3976_v52 = vld [vmem:[#allocation11 + $0x4c] ss:$12 sps:$4 sm:$0xff]  }
  0xc7   :  { %1125 = vmatprep.subr.bf16.mxu1 %v3883_v53  ;;  %1170 = vmatprep.subr.bf16.mxu0 %v3886_v54  ;;  %v3974_v53 = vld [vmem:[#allocation11 + $0x48] ss:$12 sps:$4 sm:$0xff]   ;;  %v3979_v54 = vld [vmem:[#allocation11 + $0x64] ss:$12 sps:$4 sm:$0xff]  }
  0xca   :  { %1126 = vmatpush1.bf16.msra.mxu1 %v3881_v55  ;;  %1171 = vmatpush1.bf16.msra.mxu0 %v3884_v56  ;;  %v3977_v55 = vld [vmem:[#allocation11 + $0x60] ss:$12 sps:$4 sm:$0xff]   ;;  %v3982_v56 = vld [vmem:[#allocation11 + $0x7c] ss:$12 sps:$4 sm:$0xff]  }
  0xcb   :  { %1127 = vmatprep.subr.bf16.mxu1 %v3889_v57  ;;  %1172 = vmatprep.subr.bf16.mxu0 %v3892_v58  ;;  %v3980_v57 = vld [vmem:[#allocation11 + $0x78] ss:$12 sps:$4 sm:$0xff]   ;;  %v3985_v58 = vld [vmem:[#allocation11 + $0x94] ss:$12 sps:$4 sm:$0xff]  }
  0xce   :  { %1128 = vmatpush1.bf16.msra.mxu1 %v3887_v59  ;;  %1173 = vmatpush1.bf16.msra.mxu0 %v3890_v60  ;;  %v4835_v59 = vld [vmem:[#allocation11 + $0x90] ss:$12 sps:$4 sm:$0xff]   ;;  %v4837_v60 = vld [vmem:[#allocation11 + $0xac] ss:$12 sps:$4 sm:$0xff]  }
  0xcf   :  { %1129 = vmatprep.subr.bf16.mxu1 %v3895_v61  ;;  %1174 = vmatprep.subr.bf16.mxu0 %v3898_v62  ;;  %5998 = vst [vmem:[#allocation23_spill] sm:$0xff] %v4835_v59  ;;  %5999 = vst [vmem:[#allocation24_spill] sm:$0xff] %v4837_v60  ;;  %v4840_v61 = vld [vmem:[#allocation11 + $0xa8] ss:$12 sps:$4 sm:$0xff]  }
  0xd0   :  { %6000 = vst [vmem:[#allocation25_spill] sm:$0xff] %v4840_v61 }
  0xd2   :  { %1130 = vmatpush1.bf16.msra.mxu1 %v3893_v63  ;;  %1175 = vmatpush1.bf16.msra.mxu0 %v3896_v1  ;;  %v4520_v63 = vmov 1983009808  }
  0xd3   :  { %1131 = vmatprep.subr.bf16.mxu1 %v3901_v2  ;;  %1176 = vmatprep.subr.bf16.mxu0 %v3904_v3  ;;  %v570_v1 = vunpack.c.l.s4 %v4520_v63  ;;  %v5848_v2 = vlaneseq  ;;  %v4892_v63 = vld [vmem:[#allocation11 + $0xf0] ss:$12 sps:$4 sm:$0xff]  }
  0xd4   :  { %6008 = vst [vmem:[#allocation33_spill] sm:$0xff] %v4892_v63 }
  0xd6   :  { %1132 = vmatpush1.bf16.msra.mxu1 %v3899_v4  ;;  %1177 = vmatpush1.bf16.msra.mxu0 %v3902_v5 }
  0xd7   :  { %1133 = vmatprep.subr.bf16.mxu1 %v3907_v6  ;;  %1178 = vmatprep.subr.bf16.mxu0 %v3910_v7 }
  0xda   :  { %1134 = vmatpush1.bf16.msra.mxu1 %v3905_v8  ;;  %1179 = vmatpush1.bf16.msra.mxu0 %v3908_v9  ;;  %v4940_v8 = vld [vmem:[#allocation11 + $0x150] ss:$12 sps:$4 sm:$0xff]  }
  0xdb   :  { %1135 = vmatprep.subr.bf16.mxu1 %v3913_v10  ;;  %1556 = vmatprep.subr.bf16.mxu0 %v3967_v47  ;;  %v4862_v47 = vld [vmem:[#allocation11 + $0x8] ss:$12 sps:$4 sm:$0xff]   ;;  %6018 = vst [vmem:[#allocation43_spill] sm:$0xff] %v4940_v8 }
  0xdd   :  { %1181 = vmatmul.mubr.bf16.vlgmr.msra.gmra.mrb[4].mxu0 %v5849_v0 }
  0xde   :  { %1136 = vmatpush1.bf16.msra.mxu1 %v3911_v11  ;;  %1557 = vmatpush1.bf16.msra.mxu0 %v3965_v46  ;;  %v4860_v46 = vld [vmem:[#allocation11 + $0xc0] ss:$12 sps:$4 sm:$0xff]  }
  0xdf   :  { %1137 = vmatprep.subr.bf16.mxu1 %v3916_v12  ;;  %1558 = vmatprep.subr.bf16.mxu0 %v3970_v48  ;;  %v571_v12 = vunpack.c.0.s8 %v570_v1  ;;  %6004 = vst [vmem:[#allocation29_spill] sm:$0xff] %v4860_v46  ;;  %v4894_v1 = vld [vmem:[#allocation11 + $0x38] ss:$12 sps:$4 sm:$0xff]  }
  0xe2   :  { %1138 = vmatpush1.bf16.msra.mxu1 %v3914_v13  ;;  %1559 = vmatpush1.bf16.msra.mxu0 %v3968_v49  ;;  %v4851_v13 = vshrl.u32 %v5848_v2, 7  ;;  %v4934_v2 = vld [vmem:[#allocation11 + $0x154] ss:$12 sps:$4 sm:$0xff]  }
  0xe3   :  { %1189 = vmatprep.subr.bf16.mxu1 %v3919_v14  ;;  %1560 = vmatprep.subr.bf16.mxu0 %v3973_v50  ;;  %6016 = vst [vmem:[#allocation41_spill] sm:$0xff] %v4934_v2 }
  0xe4   :  { %6001 = vst [vmem:[#allocation26_spill] sm:$0xff] %v4851_v13  ;;  %v4854_v14 = vsub.s32 %v571_v12, %v4851_v13  ;;  %v4916_v12 = vld [vmem:[#allocation11 + $0x120] ss:$12 sps:$4 sm:$0xff]  }
  0xe5   :  { %1140 = vmatmul.mubr.bf16.vlgmr.msra.gmra.mrb[8].mxu1 %v5849_v0  ;;  %6012 = vst [vmem:[#allocation37_spill] sm:$0xff] %v4916_v12 }
  0xe6   :  { %1190 = vmatpush1.bf16.msra.mxu1 %v3917_v15  ;;  %1221 = vmatprep.mubr.bf16.mxu1 %v5849_v0  ;;  %6002 = vst [vmem:[#allocation27_spill] sm:$0xff] %v4854_v14 }
  0xe7   :  { %1191 = vmatprep.subr.bf16.mxu1 %v3922_v16  ;;  %1561 = vmatpush1.bf16.msra.mxu0 %v3971_v51  ;;  %v4856_v16 = vld [vmem:[#allocation11 + $0xc4] ss:$12 sps:$4 sm:$0xff]  }
  0xe8   :  { %1562 = vmatprep.subr.bf16.mxu0 %v3976_v52  ;;  %6003 = vst [vmem:[#allocation28_spill] sm:$0xff] %v4856_v16 }
  0xea   :  { %1192 = vmatpush1.bf16.msra.mxu1 %v3920_v17  ;;  %v4858_v17 = vld [vmem:[#allocation11 + $0xc8] ss:$12 sps:$4 sm:$0xff]  }
  0xeb   :  { %1193 = vmatprep.subr.bf16.mxu1 %v3925_v18  ;;  %1563 = vmatpush1.bf16.msra.mxu0 %v3974_v53  ;;  %v4874_v53 = vld [vmem:[#allocation11 + $0xdc] ss:$12 sps:$4 sm:$0xff]  }
  0xec   :  { %1564 = vmatprep.subr.bf16.mxu0 %v3979_v54  ;;  %6005 = vst [vmem:[#allocation30_spill] sm:$0xff] %v4874_v53  ;;  %v4876_v54 = vld [vmem:[#allocation11 + $0xe0] ss:$12 sps:$4 sm:$0xff]  }
  0xee   :  { %1194 = vmatpush1.bf16.msra.mxu1 %v4753_v19 }
  0xef   :  { %1195 = vmatprep.subr.bf16.mxu1 %v4755_v20  ;;  %1565 = vmatpush1.bf16.msra.mxu0 %v3977_v55  ;;  %v4878_v55 = vld [vmem:[#allocation11 + $0xd8] ss:$12 sps:$4 sm:$0xff]  }
  0xf0   :  { %1566 = vmatprep.subr.bf16.mxu0 %v3982_v56  ;;  %6006 = vst [vmem:[#allocation31_spill] sm:$0xff] %v4878_v55  ;;  %v4880_v56 = vld [vmem:[#allocation11 + $0x20] ss:$12 sps:$4 sm:$0xff]  }
  0xf2   :  { %1196 = vmatpush1.bf16.msra.mxu1 %v4757_v21 }
  0xf3   :  { %1197 = vmatprep.subr.bf16.mxu1 %v4759_v22  ;;  %1567 = vmatpush1.bf16.msra.mxu0 %v3980_v57  ;;  %v4942_v57 = vld [vmem:[#allocation11 + $0x98] ss:$12 sps:$4 sm:$0xff]  }
  0xf4   :  { %1568 = vmatprep.subr.bf16.mxu0 %v3985_v58  ;;  %v4888_v58 = vld [vmem:[#allocation11 + $0xf4] ss:$12 sps:$4 sm:$0xff]   ;;  %6019 = vst [vmem:[#allocation44_spill] sm:$0xff] %v4942_v57 }
  0xf5   :  { %6007 = vst [vmem:[#allocation32_spill] sm:$0xff] %v4888_v58 }
  0xf6   :  { %1198 = vmatpush1.bf16.msra.mxu1 %v4763_v23 }
  0xf7   :  { %1199 = vmatprep.subr.bf16.mxu1 %v4765_v24  ;;  %1569 = vmatpush1.bf16.msra.mxu0 %v4835_v59  ;;  %v4981_v59 = vsub.s32 1, %v4851_v13 }
  0xf8   :  { %1570 = vmatprep.subr.bf16.mxu0 %v4837_v60 }
  0xf9   :  { %6029 = vst [vmem:[#allocation53_spill] sm:$0xff] %v4981_v59 }
  0xfa   :  { %1200 = vmatpush1.bf16.msra.mxu1 %v4769_v25 }
  0xfb   :  { %1201 = vmatprep.subr.bf16.mxu1 %v4771_v26  ;;  %1571 = vmatpush1.bf16.msra.mxu0 %v4840_v61 }
  0xfc   :  { %1572 = vmatprep.subr.bf16.mxu0 %v4856_v16 }
  0xfe   :  { %1202 = vmatpush1.bf16.msra.mxu1 %v4775_v27 }
  0xff   :  { %1203 = vmatprep.subr.bf16.mxu1 %v4779_v28  ;;  %1573 = vmatpush1.bf16.msra.mxu0 %v4860_v46  ;;  %v4974_v46 = vsub.s32 0, %v4851_v13 }
 0x100   :  { %1574 = vmatprep.subr.bf16.mxu0 %v4874_v53 }
 0x101   :  { %6027 = vst [vmem:[#allocation52_spill] sm:$0xff] %v4974_v46 }
 0x102   :  { %1204 = vmatpush1.bf16.msra.mxu1 %v4782_v29 }
 0x103   :  { %1205 = vmatprep.subr.bf16.mxu1 %v4785_v30  ;;  %1575 = vmatpush1.bf16.msra.mxu0 %v4878_v55 }
 0x104   :  { %1576 = vmatprep.subr.bf16.mxu0 %v4888_v58  ;;  %v372_v58 = vld [vmem:[#allocation7] sm:$0xff] }
 0x106   :  { %1206 = vmatpush1.bf16.msra.mxu1 %v4788_v31 }
 0x107   :  { %1207 = vmatprep.subr.bf16.mxu1 %v4791_v32  ;;  %1577 = vmatpush1.bf16.msra.mxu0 %v4892_v63 }
 0x10a   :  { %1208 = vmatpush1.bf16.msra.mxu1 %v4794_v33 }
 0x10b   :  { %1209 = vmatprep.subr.bf16.mxu1 %v4797_v34 }
 0x10e   :  { %1210 = vmatpush1.bf16.msra.mxu1 %v4800_v35 }
 0x10f   :  { %1211 = vmatprep.subr.bf16.mxu1 %v4803_v36 }
 0x112   :  { %1212 = vmatpush1.bf16.msra.mxu1 %v4806_v37 }
 0x113   :  { %1213 = vmatprep.subr.bf16.mxu1 %v4809_v38 }
 0x116   :  { %1214 = vmatpush1.bf16.msra.mxu1 %v4812_v39 }
 0x117   :  { %1215 = vmatprep.subr.bf16.mxu1 %v4815_v40 }
 0x11a   :  { %1216 = vmatpush1.bf16.msra.mxu1 %v4818_v41 }
 0x11b   :  { %1217 = vmatprep.subr.bf16.mxu1 %v4821_v42 }
 0x11e   :  { %1218 = vmatpush1.bf16.msra.mxu1 %v4824_v43 }
 0x11f   :  { %1219 = vmatprep.subr.bf16.mxu1 %v4827_v44 }
 0x122   :  { %1220 = vmatpush1.bf16.msra.mxu1 %v4830_v45 }
 0x123   :  { %3647 = vmatprep.subr.bf16.mxu1 %v4858_v17 }
 0x125   :  { %1222 = vmatmul.mubr.bf16.vlgmr.msra.gmra.mrb[12].mxu1 %v5849_v0  ;;  %v4936_v0 = vld [vmem:[#allocation11 + $0x158] ss:$12 sps:$4 sm:$0xff]  }
 0x126   :  { %3648 = vmatpush3.bf16.msra.mxu1 %v4862_v47  ;;  %6017 = vst [vmem:[#allocation42_spill] sm:$0xff] %v4936_v0 }
 0x127   :  { %3649 = vmatprep.subr.bf16.mxu1 %v4876_v54 }
 0x12a   :  { %3650 = vmatpush3.bf16.msra.mxu1 %v4880_v56 }
 0x170   :  { %v472_v62 = vpop.f32.mrb[0].mxu1  ;;  %v4843_v3 = vpop.f32.mrb[0].mxu0 }
 0x171   :  { %v474_v4 = vpop.f32.mrb[1].mxu1  ;;  %v4846_v5 = vpop.f32.mrb[1].mxu0 }
 0x172   :  { %v567_v6 = vcombine.low %v472_v62, %v474_v4  ;;  %v476_v7 = vpop.f32.mrb[2].mxu1  ;;  %v558_v9 = vpop.f32.mrb[2].mxu0  ;;  %v4890_v62 = vld [vmem:[#allocation11 + $0xf8] ss:$12 sps:$4 sm:$0xff]   ;;  %v4900_v4 = vld [vmem:[#allocation11 + $0x108] ss:$12 sps:$4 sm:$0xff]  }
 0x173   :  { %v477_v10 = vpop.f32.mrb[3].mxu1  ;;  %v559_v11 = vpop.f32.mrb[3].mxu0  ;;  %3651 = vmatprep.subr.bf16.mxu1 %v4890_v62  ;;  %6009 = vst [vmem:[#allocation34_spill] sm:$0xff] %v4900_v4  ;;  %v4904_v7 = vld [vmem:[#allocation11 + $0x110] ss:$12 sps:$4 sm:$0xff]  }
 0x174   :  { %v4869_v51 = vrot.slane %v567_v6, %v4854_v14  ;;  %3652 = vmatpush3.bf16.msra.mxu1 %v4894_v1  ;;  %v4902_v6 = vld [vmem:[#allocation11 + $0x10c] ss:$12 sps:$4 sm:$0xff]   ;;  %v4906_v9 = vld [vmem:[#allocation11 + $0x50] ss:$12 sps:$4 sm:$0xff]   ;;  %v4912_v11 = vld [vmem:[#allocation11 + $0x128] ss:$12 sps:$4 sm:$0xff]  }
 0x175   :  { %6010 = vst [vmem:[#allocation35_spill] sm:$0xff] %v4902_v6  ;;  %v4908_v10 = vld [vmem:[#allocation11 + $0x124] ss:$12 sps:$4 sm:$0xff]   ;;  %1578 = vmatprep.subr.bf16.mxu0 %v4902_v6  ;;  %3653 = vmatprep.subr.bf16.mxu1 %v4904_v7  ;;  %v611_v6 = vsub.s32 3, %v4851_v13 }
 0x176   :  { %6011 = vst [vmem:[#allocation36_spill] sm:$0xff] %v4908_v10  ;;  %1579 = vmatpush1.bf16.msra.mxu0 %v4900_v4  ;;  %v268_v4 = vld [vmem:[%s5840_s6] sm:$0x3f] }
 0x177   :  { %1580 = vmatprep.subr.bf16.mxu0 %v4908_v10  ;;  %v4952_v10 = vld [vmem:[#allocation11 + $0x168] ss:$12 sps:$4 sm:$0xff]  }
 0x178   :  { %v513_v15 = vpop.f32.mrb[4].mxu1  ;;  %3654 = vmatpush3.bf16.msra.mxu1 %v4906_v9  ;;  %6022 = vst [vmem:[#allocation47_spill] sm:$0xff] %v4952_v10 }
 0x179   :  { %v515_v18 = vpop.f32.mrb[5].mxu1  ;;  %3655 = vmatprep.subr.bf16.mxu1 %v4912_v11 }
 0x17a   :  { %v568_v48 = vcombine.low %v513_v15, %v515_v18  ;;  %v517_v49 = vpop.f32.mrb[6].mxu1  ;;  %v4918_v15 = vld [vmem:[#allocation11 + $0x68] ss:$12 sps:$4 sm:$0xff]   ;;  %1581 = vmatpush1.bf16.msra.mxu0 %v4916_v12  ;;  %v4946_v12 = vld [vmem:[#allocation11 + $0x16c] ss:$12 sps:$4 sm:$0xff]  }
 0x17b   :  { %v518_v50 = vpop.f32.mrb[7].mxu1  ;;  %v4922_v18 = vld [vmem:[#allocation11 + $0x13c] ss:$12 sps:$4 sm:$0xff]   ;;  %v4928_v49 = vld [vmem:[#allocation11 + $0x138] ss:$12 sps:$4 sm:$0xff]   ;;  %6020 = vst [vmem:[#allocation45_spill] sm:$0xff] %v4946_v12 }
 0x17c   :  { %v4872_v52 = vrot.slane %v568_v48, %v4854_v14  ;;  %6013 = vst [vmem:[#allocation38_spill] sm:$0xff] %v4922_v18  ;;  %v4924_v48 = vld [vmem:[#allocation11 + $0x140] ss:$12 sps:$4 sm:$0xff]   ;;  %3656 = vmatpush3.bf16.msra.mxu1 %v4918_v15  ;;  %6014 = vst [vmem:[#allocation39_spill] sm:$0xff] %v4928_v49  ;;  %1582 = vmatprep.subr.bf16.mxu0 %v4922_v18  ;;  %v4948_v18 = vld [vmem:[#allocation11 + $0x170] ss:$12 sps:$4 sm:$0xff]  }
 0x17d   :  { %v4930_v50 = vld [vmem:[#allocation11 + $0x80] ss:$12 sps:$4 sm:$0xff]   ;;  %3657 = vmatprep.subr.bf16.mxu1 %v4924_v48  ;;  %6021 = vst [vmem:[#allocation46_spill] sm:$0xff] %v4948_v18 }
 0x17e   :  { %6015 = vst [vmem:[#allocation40_spill] sm:$0xff] %v4930_v50  ;;  %1583 = vmatpush1.bf16.msra.mxu0 %v4928_v49  ;;  %v4954_v49 = vld [vmem:[#allocation11 + $0xb0] ss:$12 sps:$4 sm:$0xff]   ;;  %v6028_v16 = vcombine.low %v4869_v51, %v4872_v52 }
 0x17f   :  { %1584 = vmatprep.subr.bf16.mxu0 %v4934_v2  ;;  %6023 = vst [vmem:[#allocation48_spill] sm:$0xff] %v4954_v49  ;;  %v4960_v2 = vld [vmem:[#allocation8 + $0x4] ss:$24 sps:$4 sm:$0xff]  }
 0x180   :  { %3658 = vmatpush3.bf16.msra.mxu1 %v4930_v50  ;;  %6024 = vst [vmem:[#allocation49_spill] sm:$0xff] %v4960_v2  ;;  %v594_v61 = vadd.f32 %v6028_v16, %v372_v58 }
 0x181   :  { %3659 = vmatprep.subr.bf16.mxu1 %v4936_v0 }
 0x182   :  { %1585 = vmatpush1.bf16.msra.mxu0 %v4940_v8  ;;  %v607_v8 = vsub.s32 2, %v4851_v13 }
 0x183   :  { %1586 = vmatprep.subr.bf16.mxu0 %v4946_v12  ;;  %v4970_v12 = vrot.slane %v268_v4, %v611_v6 }
 0x184   :  { %3660 = vmatpush3.bf16.msra.mxu1 %v4942_v57  ;;  %v4968_v63 = vrot.slane %v268_v4, %v607_v8 }
 0x185   :  { %3661 = vmatprep.subr.bf16.mxu1 %v4948_v18  ;;  %6026 = vst [vmem:[#allocation51_spill] sm:$0xff] %v4970_v12  ;;  %v4988_v18 = vrot.slane %v268_v4, %v4981_v59 }
 0x186   :  { %1587 = vmatpush1.bf16.msra.mxu0 %v4952_v10  ;;  %6025 = vst [vmem:[#allocation50_spill] sm:$0xff] %v4968_v63 }
 0x187   :  { %6031 = vst [vmem:[#allocation55_spill] sm:$0xff] %v4988_v18 }
 0x188   :  { %3662 = vmatpush3.bf16.msra.mxu1 %v4954_v49  ;;  %v4984_v49 = vrot.slane %v268_v4, %v4974_v46 }
 0x189   :  { %2056 = vmatprep.subr.bf16.mxu1 %v4960_v2 }
 0x18a   :  { %6030 = vst [vmem:[#allocation54_spill] sm:$0xff] %v4984_v49 }
 0x1b0   :  { %v1182_v10 = vpop.f32.mrb[4].mxu0 }
 0x1b1   :  { %v1183_v55 = vadd.f32 %v1182_v10, %v4968_v63  ;;  %v1184_v53 = vpop.f32.mrb[5].mxu0  ;;  %v1249_v10 = vrot.slane %v594_v61, 4 }
 0x1b2   :  { %v1185_v60 = vadd.f32 %v1184_v53, %v4970_v12  ;;  %v1186_v8 = vpop.f32.mrb[6].mxu0 }
 0x1b3   :  { %v1187_v6 = vpop.f32.mrb[7].mxu0 }
 0x1b4   :  { %v1253_v2 = vcombine.low %v1183_v55, %v1185_v60 }
 0x1b6   :  { %v1260_v63 = vrot.slane %v1253_v2, %v4854_v14 }
 0x1b8   :  { %v1262_v57 = vadd.f32 %v1260_v63, %v1249_v10  ;;  %v1141_v51 = vpop.f32.mrb[8].mxu1  ;;  %v615_v63 = vsub.s32 4, %v4851_v13  ;;  %v619_v10 = vsub.s32 5, %v4851_v13 }
 0x1b9   :  { %v1142_v16 = vadd.f32 %v1141_v51, %v4984_v49  ;;  %v1143_v52 = vpop.f32.mrb[9].mxu1 }
 0x1ba   :  { %v1144_v53 = vadd.f32 %v1143_v52, %v4988_v18  ;;  %v1145_v58 = vpop.f32.mrb[10].mxu1  ;;  %v3563_v0 = vmul.f32 -1.442695, %v1262_v57  ;;  %v4995_v51 = vrot.slane %v268_v4, %v615_v63  ;;  %v4997_v52 = vrot.slane %v268_v4, %v619_v10 }
 0x1bb   :  { %v1146_v8 = vpop.f32.mrb[11].mxu1 }
 0x1bc   :  { %v1232_v6 = vcombine.low %v1142_v16, %v1144_v53  ;;  %6032 = vst [vmem:[#allocation56_spill] sm:$0xff] %v4995_v51  ;;  %6033 = vst [vmem:[#allocation57_spill] sm:$0xff] %v4997_v52 }
 0x1be   :  { %v1239_v60 = vrot.slane %v1232_v6, %v4854_v14 }
 0x1c0   :  { %v1241_v55 = vadd.f32 %v1239_v60, %v594_v61 }
 0x1c2   :  { %v3562_v12 = vmul.f32 -1.442695, %v1241_v55  ;;  %v373_v55 = vld [vmem:[#allocation7 + $0x8] sm:$0xf] }
 0x1c4   :  { %4051 = vpow2.f32 %v3562_v12 }
 0x1c5   :  { %4053 = vpow2.f32 %v3563_v0  ;;  %v6034_v0 = vcombine.low %v4843_v3, %v4846_v5 }
 0x1c7   :  { %v591_v6 = vrot.slane %v6034_v0, %v4854_v14  ;;  %v5026_v0 = vld [vmem:[#allocation8 + $0x30] ss:$24 sps:$4 sm:$0xff]  }
 0x1c8   :  { %6039 = vst [vmem:[#allocation61_spill] sm:$0xff] %v5026_v0 }
 0x1c9   :  { %v595_v63 = vadd.f32 %v591_v6, %v373_v55  ;;  %v5029_v6 = vld [vmem:[#allocation8 + $0xc] ss:$24 sps:$4 sm:$0xff]  }
 0x1ca   :  { %6040 = vst [vmem:[#allocation62_spill] sm:$0xff] %v5029_v6 }
 0x1ce   :  { %v4052_v2 = vpop.eup %4051 }
 0x1cf   :  { %v1245_v50 = vadd.f32 1.0, %v4052_v2  ;;  %v4054_v16 = vpop.eup %4053 }
 0x1d0   :  { %v1266_v60 = vadd.f32 1.0, %v4054_v16 }
 0x1d1   :  { %4055 = vrcp.f32 %v1245_v50 }
 0x1d2   :  { %4057 = vrcp.f32 %v1266_v60  ;;  %v159_v60 = vld [vmem:[%s5836_s2] sm:$0x3] }
 0x1d3   :  { %v1697_v55 = vrot.slane %v159_v60, %v4981_v59 }
 0x1db   :  { %v4056_v2 = vpop.eup %4055 }
 0x1f8   :  { %v1223_v58 = vpop.f32.mrb[12].mxu1 }
 0x1f9   :  { %v1224_v53 = vadd.f32 %v1223_v58, %v4995_v51  ;;  %v1225_v61 = vpop.f32.mrb[13].mxu1  ;;  %v4058_v51 = vpop.eup %4057 }
 0x1fa   :  { %v1226_v12 = vadd.f32 %v1225_v61, %v4997_v52  ;;  %v1227_v57 = vpop.f32.mrb[14].mxu1  ;;  %v1283_v61 = vsub.f32 1.0, %v4058_v51  ;;  %v1285_v52 = vmul.f32 0.0, %v4058_v51  ;;  %v6037_v51 = vmov 0  }
 0x1fb   :  { %v1228_v8 = vpop.f32.mrb[15].mxu1 }
 0x1fc   :  { %v1271_v50 = vcombine.low %v1224_v53, %v1226_v12  ;;  %v5018_v12 = vld [vmem:[#allocation8] ss:$24 sps:$4 sm:$0xff]  }
 0x1fd   :  { %6036 = vst [vmem:[#allocation59_spill] sm:$0xff] %v5018_v12 }
 0x1fe   :  { %v1278_v4 = vrot.slane %v1271_v50, %v4854_v14  ;;  %v1690_v50 = vrot.slane %v159_v60, %v4974_v46 }
 0x200   :  { %v1280_v10 = vmul.f32 %v4056_v2, %v1278_v4  ;;  %1692 = vbcast.lane.b32.xlu1 %v1690_v50, 256  ;;  %v4521_v4 = vmov 1966171168  }
 0x201   :  { %v1639_v2 = vunpack.c.l.s4 %v4521_v4 }
 0x202   :  { %v1281_v58 = vadd.f32 %v1280_v10, %v595_v63 }
 0x203   :  { %v1640_v63 = vunpack.c.0.s8 %v1639_v2  ;;  %v5046_v2 = vld [vmem:[#allocation5] sm:$0xff] }
 0x204   :  { %4059 = vtanh.f32 %v1281_v58  ;;  %1699 = vbcast.lane.b32.xlu1 %v1697_v55, 256  ;;  %6044 = vst [vmem:[#allocation66_spill] sm:$0xff] %v5046_v2 }
 0x205   :  { %v5038_v10 = vsub.s32 %v1640_v63, %v4851_v13 }
 0x207   :  { %6041 = vst [vmem:[#allocation63_spill] sm:$0xff] %v5038_v10 }
 0x20e   :  { %v4060_v57 = vpop.eup %4059 }
 0x20f   :  { %v1284_v8 = vmul.f32 %v4060_v57, %v1283_v61 }
 0x211   :  { %v5006_v18 = vadd.f32 %v1285_v52, %v1284_v8  ;;  %v5022_v52 = vld [vmem:[#allocation8 + $0x34] ss:$24 sps:$4 sm:$0xff]  }
 0x212   :  { %6038 = vst [vmem:[#allocation60_spill] sm:$0xff] %v5022_v52 }
 0x213   :  { %6035 = vst [vmem:[#allocation58_spill] sm:$0xff] %v5006_v18  ;;  %v1294_v3 = vrot.slane %v5006_v18, %v4854_v14 }
 0x215   :  { %v1295_v5 = vcombine.high %v1294_v3, %v1294_v3  ;;  %v5012_v53 = vpack.c.bf16 %v1294_v3, %v1294_v3 }
 0x217   :  { %v5010_v16 = vpack.c.bf16 %v1295_v5, %v1295_v5 }
 0x219   :  { %1588 = vmatprep.mubr.bf16.mxu0 %v5010_v16  ;;  %1629 = vmatprep.mubr.bf16.mxu1 %v5010_v16 }
 0x21a   :  { %1589 = vmatmul.mubr.bf16.vlgmr.msra.gmra.mrb[8].mxu0 %v5012_v53  ;;  %1630 = vmatmul.mubr.bf16.vlgmr.msra.gmra.mrb[16].mxu1 %v5012_v53 }
 0x21b   :  { %2057 = vmatpush1.bf16.msra.mxu1 %v5018_v12  ;;  %1871 = vmatprep.mubr.bf16.mxu0 %v6037_v51  ;;  %v5050_v12 = vld [vmem:[#allocation5 + $0x8] sm:$0xff] }
 0x21c   :  { %2058 = vmatprep.subr.bf16.mxu1 %v5022_v52  ;;  %2088 = vmatprep.mubr.bf16.mxu1 %v6037_v51  ;;  %6045 = vst [vmem:[#allocation67_spill] sm:$0xff] %v5050_v12 }
 0x21f   :  { %2059 = vmatpush1.bf16.msra.mxu1 %v5026_v0 }
 0x220   :  { %2097 = vmatprep.subr.bf16.mxu1 %v5029_v6 }
 0x2ed   :  { %v1590_v58 = vpop.f32.mrb[8].mxu0  ;;  %v3663_v61 = vpop.f32.mrb[16].mxu1 }
 0x2ee   :  { %v1644_v57 = vrot.slane %v1590_v58, %v5038_v10  ;;  %v5041_v8 = vpop.f32.mrb[9].mxu0  ;;  %v3664_v3 = vpop.f32.mrb[17].mxu1 }
 0x2ef   :  { %6042 = vst [vmem:[#allocation64_spill] sm:$0xff] %v5041_v8  ;;  %v5043_v5 = vadd.f32 %v3664_v3, %v3663_v61  ;;  %v1594_v6 = vpop.f32.mrb[10].mxu0  ;;  %v3666_v50 = vpop.f32.mrb[18].mxu1 }
 0x2f0   :  { %v1645_v0 = vcombine.high %v1644_v57, %v1644_v57  ;;  %v1652_v60 = vrot.slane %v1644_v57, %v5038_v10  ;;  %v1595_v55 = vpop.f32.mrb[11].mxu0  ;;  %v3667_v4 = vpop.f32.mrb[19].mxu1  ;;  %v5058_v57 = vld [vmem:[%s5844_s10] ss:$0 sm:$0xff] }
 0x2f1   :  { %6043 = vst [vmem:[#allocation65_spill] sm:$0xff] %v5043_v5  ;;  %6046 = vst [vmem:[#allocation68_spill] sm:$0xff] %v5058_v57  ;;  %v5062_v55 = vpop.permute.xlu1 %1692 }
 0x2f2   :  { %v1659_v63 = vrot.slane %v1645_v0, %v5038_v10  ;;  %v1663_v52 = vrot.slane %v1652_v60, %v4974_v46  ;;  %6047 = vst [vmem:[#allocation69_spill] sm:$0xff] %v5062_v55 }
 0x2f4   :  { %v1667_v58 = vrot.slane %v1659_v63, %v4974_v46  ;;  %v1670_v61 = vadd.f32 %v1663_v52, %v5046_v2 }
 0x2f5   :  { %v5065_v63 = vpop.permute.xlu1 %1699 }
 0x2f6   :  { %v1671_v6 = vadd.f32 %v1667_v58, %v5050_v12  ;;  %4061 = vtanh.f32 %v1670_v61  ;;  %6048 = vst [vmem:[#allocation70_spill] sm:$0xff] %v5065_v63 }
 0x2f8   :  { %4063 = vtanh.f32 %v1671_v6  ;;  %v6049_v6 = vlaneseq }
 0x2fa   :  { %v5069_v12 = vand.u32 127, %v6049_v6 }
 0x2fc   :  { %6050 = vst [vmem:[#allocation71_spill] sm:$0xff] %v5069_v12 }
 0x300   :  { %v4062_v3 = vpop.eup %4061 }
 0x301   :  { %v1680_v0 = vmul.f32 %v4062_v3, %v5058_v57  ;;  %v5073_v3 = vsub.s32 %v5069_v12, %v4851_v13 }
 0x302   :  { %v4064_v50 = vpop.eup %4063 }
 0x303   :  { %1682 = vadd.xlane.f32.xlu0 %v1680_v0  ;;  %v1681_v60 = vmul.f32 %v4064_v50, %v5058_v57  ;;  %6051 = vst [vmem:[#allocation72_spill] sm:$0xff] %v5073_v3 }
 0x307   :  { %1684 = vadd.xlane.f32.xlu0 %v1681_v60 }
 0x390   :  { %v1683_v52 = vpop.xlane.xlu0 %1682 }
 0x391   :  { %v1703_v4 = vadd.f32 %v5062_v55, %v1683_v52 }
 0x393   :  { %1708 = vperm.xlu0 %3801, %v1703_v4  }
 0x394   :  { %v1685_v58 = vpop.xlane.xlu0 %1684 }
 0x395   :  { %v1704_v61 = vadd.f32 %v5065_v63, %v1685_v58 }
 0x397   :  { %1711 = vperm.xlu1 %3802, %v1704_v61  }
 0x412   :  { %v1709_v0 = vpop.permute.xlu0 %1708 }
 0x413   :  { %v1718_v60 = vrot.slane %v1709_v0, %v5073_v3 }
 0x416   :  { %v1712_v50 = vpop.permute.xlu1 %1711 }
 0x417   :  { %v1722_v52 = vrot.slane %v1712_v50, %v5073_v3 }
 0x419   :  { %v1724_v55 = vsel %vm1723_vm0, %v1722_v52, %v1718_v60 }
 0x41a   :  { %v1727_v58 = vsel %vm1726_vm1, %v1724_v55, -inf }
 0x41b   :  { %1728 = vmax.xlane.f32.xlu1 %v1727_v58 }
 0x4a8   :  { %v1729_v63 = vpop.xlane.xlu1 %1728 }
 0x4a9   :  { %v1734_v6 = vrot.slane %v1729_v63, %v4974_v46  ;;  %v1738_v57 = vrot.slane %v1729_v63, %v4981_v59 }
 0x4ab   :  { %v1741_v2 = vsub.f32 %v1703_v4, %v1734_v6  ;;  %v1742_v10 = vsub.f32 %v1704_v61, %v1738_v57  ;;  %v5087_v61 = vld [vmem:[#allocation13 + $0x4] ss:$8 sps:$4 sm:$0xff]   ;;  %v5089_v6 = vld [vmem:[#allocation13] ss:$8 sps:$4 sm:$0xff]  }
 0x4ac   :  { %6052 = vst [vmem:[#allocation73_spill] sm:$0xff] %v5087_v61  ;;  %6053 = vst [vmem:[#allocation74_spill] sm:$0xff] %v5089_v6  ;;  %1839 = vmatprep.subr.bf16.mxu0 %v5087_v61 }
 0x4ad   :  { %v1743_v18 = vmul.f32 1.442695, %v1741_v2  ;;  %v1745_v13 = vmul.f32 1.442695, %v1742_v10  ;;  %1840 = vmatpush1.bf16.msra.mxu0 %v5089_v6 }
 0x4af   :  { %4065 = vpow2.f32 %v1743_v18 }
 0x4b0   :  { %4067 = vpow2.f32 %v1745_v13 }
 0x4b9   :  { %v4066_v0 = vpop.eup %4065 }
 0x4ba   :  { %v4068_v12 = vpop.eup %4067  ;;  %1750 = vperm.xlu1 %3802, %v4066_v0  }
 0x4bb   :  { %1753 = vperm.xlu0 %3801, %v4068_v12  }
 0x539   :  { %v1751_v50 = vpop.permute.xlu1 %1750 }
 0x53a   :  { %v1754_v60 = vpop.permute.xlu0 %1753  ;;  %v1758_v55 = vrot.slane %v1751_v50, %v5073_v3  ;;  %v5093_v50 = vld [vmem:[#allocation13 + $0x14] ss:$8 sps:$4 sm:$0xff]  }
 0x53b   :  { %v1762_v52 = vrot.slane %v1754_v60, %v5073_v3  ;;  %6054 = vst [vmem:[#allocation75_spill] sm:$0xff] %v5093_v50  ;;  %v5095_v60 = vld [vmem:[#allocation13 + $0x10] ss:$8 sps:$4 sm:$0xff]   ;;  %1841 = vmatprep.subr.bf16.mxu0 %v5093_v50 }
 0x53c   :  { %6055 = vst [vmem:[#allocation76_spill] sm:$0xff] %v5095_v60  ;;  %1842 = vmatpush1.bf16.msra.mxu0 %v5095_v60 }
 0x53d   :  { %v1763_v58 = vsel %vm1723_vm0, %v1762_v52, %v1758_v55  ;;  %v5105_v52 = vld [vmem:[#allocation2 + $0x8] sm:$0xff] }
 0x53e   :  { %v1765_v63 = vsel %vm1726_vm1, %v1763_v58, 0.0  ;;  %6058 = vst [vmem:[#allocation79_spill] sm:$0xff] %v5105_v52 }
 0x53f   :  { %1766 = vadd.xlane.f32.xlu0 %v1765_v63 }
 0x5cc   :  { %v1767_v57 = vpop.xlane.xlu0 %1766 }
 0x5cd   :  { %4069 = vrcp.f32 %v1767_v57 }
 0x5d7   :  { %v4070_v10 = vpop.eup %4069 }
 0x5d8   :  { %v1773_v13 = vrot.slane %v4070_v10, %v4974_v46  ;;  %v1777_v2 = vrot.slane %v4070_v10, %v4981_v59 }
 0x5da   :  { %v1780_v18 = vmul.f32 %v4066_v0, %v1773_v13  ;;  %v1781_v4 = vmul.f32 %v4068_v12, %v1777_v2  ;;  %v5099_v0 = vld [vmem:[#allocation2] sm:$0xff] }
 0x5db   :  { %6056 = vst [vmem:[#allocation77_spill] sm:$0xff] %v5099_v0 }
 0x5dc   :  { %1784 = vperm.xlu1 %3802, %v1780_v18  }
 0x5e0   :  { %1789 = vperm.xlu1 %3802, %v1781_v4  }
 0x65b   :  { %v5101_v12 = vpop.permute.xlu1 %1784 }
 0x65c   :  { %6057 = vst [vmem:[#allocation78_spill] sm:$0xff] %v5101_v12  ;;  %v1792_v55 = vmul.f32 %v5101_v12, %v5099_v0 }
 0x65e   :  { %v1794_v58 = vsel %vm434_vm2, %v1792_v55, 0.0 }
 0x65f   :  { %v1795_v63 = vrot.slane %v1794_v58, 4  ;;  %v5108_v57 = vpop.permute.xlu1 %1789 }
 0x660   :  { %v1793_v10 = vmul.f32 %v5108_v57, %v5105_v52 }
 0x661   :  { %v1796_v13 = vadd.f32 %v1795_v63, %v1794_v58  ;;  %v5120_v58 = vld [vmem:[#allocation8 + $0x8] ss:$24 sps:$4 sm:$0xff]   ;;  %v5162_v63 = vld [vmem:[#allocation14 + $0x10] sm:$0xff]  }
 0x662   :  { %v1801_v18 = vsel %vm434_vm2, %v1793_v10, 0.0  ;;  %v5165_v10 = vld [vmem:[#allocation14 + $0x58] sm:$0xff]  }
 0x663   :  { %v1797_v2 = vrot.slane %v1796_v13, 2  ;;  %v1802_v4 = vrot.slane %v1801_v18, 4  ;;  %6061 = vst [vmem:[#allocation82_spill] sm:$0xff] %v5165_v10 }
 0x665   :  { %v1798_v3 = vadd.f32 %v1797_v2, %v1796_v13  ;;  %v1803_v60 = vadd.f32 %v1802_v4, %v1801_v18  ;;  %v5167_v13 = vld [vmem:[#allocation10 + $0x60] ss:$24 sps:$4 sm:$0xff]   ;;  %v5170_v18 = vld [vmem:[#allocation10 + $0x94] ss:$24 sps:$4 sm:$0xff]  }
 0x666   :  { %6062 = vst [vmem:[#allocation83_spill] sm:$0xff] %v5167_v13  ;;  %6063 = vst [vmem:[#allocation84_spill] sm:$0xff] %v5170_v18  ;;  %v5174_v2 = vld [vmem:[#allocation14 + $0x18] sm:$0xff]   ;;  %v5177_v4 = vld [vmem:[#allocation14 + $0x60] sm:$0xff]  }
 0x667   :  { %v1799_v50 = vrot.slane %v1798_v3, 1  ;;  %v1804_v6 = vrot.slane %v1803_v60, 2  ;;  %6064 = vst [vmem:[#allocation85_spill] sm:$0xff] %v5177_v4 }
 0x669   :  { %v1800_v0 = vadd.f32 %v1799_v50, %v1798_v3  ;;  %v1805_v12 = vadd.f32 %v1804_v6, %v1803_v60  ;;  %v5124_v3 = vld [vmem:[#allocation8 + $0x3c] ss:$24 sps:$4 sm:$0xff]   ;;  %v5150_v50 = vld [vmem:[#allocation14 + $0x8] sm:$0xff]  }
 0x66a   :  { %v5145_v6 = vld [vmem:[#allocation10 + $0x34] ss:$24 sps:$4 sm:$0xff]  }
 0x66b   :  { %v1806_v61 = vrot.slane %v1805_v12, 1  ;;  %v1808_v49 = vpack.c.bf16 %v1800_v0, %v1800_v0  ;;  %v5153_v60 = vld [vmem:[#allocation14 + $0x50] sm:$0xff]  }
 0x66c   :  { %v5155_v0 = vld [vmem:[#allocation10 + $0x30] ss:$24 sps:$4 sm:$0xff]  }
 0x66d   :  { %v1807_v55 = vadd.f32 %v1806_v61, %v1805_v12  ;;  %v1812_v5 = vunpack.c.l.b16 %v1808_v49  ;;  %v5135_v49 = vld [vmem:[#allocation14 + $0x40] sm:$0xff]   ;;  %6059 = vst [vmem:[#allocation80_spill] sm:$0xff] %v5155_v0 }
 0x66e   :  { %v5141_v61 = vld [vmem:[#allocation10] ss:$24 sps:$4 sm:$0xff]   ;;  %3669 = vmatprep.subr.bf16.mxu0 %v5135_v49  ;;  %v5158_v12 = vld [vmem:[#allocation10 + $0x64] ss:$24 sps:$4 sm:$0xff]  }
 0x66f   :  { %v1809_v14 = vpack.c.bf16 %v1807_v55, %v1807_v55  ;;  %6060 = vst [vmem:[#allocation81_spill] sm:$0xff] %v5158_v12  ;;  %v5179_v55 = vld [vmem:[#allocation10 + $0x90] ss:$24 sps:$4 sm:$0xff]  }
 0x670   :  { %6065 = vst [vmem:[#allocation86_spill] sm:$0xff] %v5179_v55 }
 0x671   :  { %v1813_v8 = vunpack.c.l.b16 %v1809_v14  ;;  %v5127_v14 = vld [vmem:[#allocation8 + $0x38] ss:$24 sps:$4 sm:$0xff]  }
 0x673   :  { %v1814_v59 = vsel %vm1723_vm0, %v1813_v8, %v1812_v5  ;;  %v5137_v8 = vld [vmem:[#allocation14] sm:$0xff]   ;;  %v5139_v5 = vld [vmem:[#allocation14 + $0x48] sm:$0xff]  }
 0x674   :  { %v5114_v52 = vpack.c.b16 %v1814_v59, %v1814_v59  ;;  %v5130_v59 = vld [vmem:[#allocation10 + $0x4] ss:$24 sps:$4 sm:$0xff]  }
 0x676   :  { %3617 = vmatmul.mubr.msk.bf16.vlgmr.msra.gmra.mrb[12].mxu0 %vm434_vm2, %v5114_v52  ;;  %3635 = vmatmul.mubr.msk.bf16.vlgmr.msra.gmra.mrb[20].mxu1 %vm434_vm2, %v5114_v52 }
 0x677   :  { %2098 = vmatpush1.bf16.msra.mxu1 %v5120_v58  ;;  %2129 = vmatprep.mubr.bf16.mxu1 %v6037_v51 }
 0x678   :  { %2099 = vmatprep.subr.bf16.mxu1 %v5124_v3  ;;  %3670 = vmatpush3.bf16.msra.mxu0 %v5137_v8 }
 0x679   :  { %3671 = vmatprep.subr.bf16.mxu0 %v5139_v5 }
 0x67b   :  { %2100 = vmatpush1.bf16.msra.mxu1 %v5127_v14 }
 0x67c   :  { %2214 = vmatprep.subr.bf16.mxu1 %v5130_v59  ;;  %3672 = vmatpush3.bf16.msra.mxu0 %v5150_v50 }
 0x67d   :  { %3673 = vmatprep.subr.bf16.mxu0 %v5153_v60 }
 0x67e   :  { %3636 = vmatmul.mubr.msk.bf16.vlgmr.msra.gmra.mrb[24].mxu1 %vm434_vm2, %v5114_v52 }
 0x67f   :  { %2215 = vmatpush1.bf16.msra.mxu1 %v5141_v61  ;;  %2246 = vmatprep.mubr.bf16.mxu1 %v5010_v16 }
 0x680   :  { %2216 = vmatprep.subr.bf16.mxu1 %v5145_v6  ;;  %3674 = vmatpush3.bf16.msra.mxu0 %v5162_v63 }
 0x681   :  { %3675 = vmatprep.subr.bf16.mxu0 %v5165_v10  ;;  %v5194_v10 = vld [vmem:[#allocation10 + $0xf4] ss:$24 sps:$4 sm:$0xff]  }
 0x682   :  { %6070 = vst [vmem:[#allocation91_spill] sm:$0xff] %v5194_v10 }
 0x683   :  { %2217 = vmatpush1.bf16.msra.mxu1 %v5155_v0  ;;  %v5191_v0 = vld [vmem:[#allocation10 + $0xc0] ss:$24 sps:$4 sm:$0xff]  }
 0x684   :  { %2218 = vmatprep.subr.bf16.mxu1 %v5158_v12  ;;  %v5182_v12 = vld [vmem:[#allocation10 + $0xc4] ss:$24 sps:$4 sm:$0xff]   ;;  %3676 = vmatpush3.bf16.msra.mxu0 %v5174_v2  ;;  %6069 = vst [vmem:[#allocation90_spill] sm:$0xff] %v5191_v0 }
 0x685   :  { %6066 = vst [vmem:[#allocation87_spill] sm:$0xff] %v5182_v12  ;;  %3677 = vmatprep.subr.bf16.mxu0 %v5177_v4  ;;  %v5204_v4 = vld [vmem:[#allocation10 + $0x124] ss:$24 sps:$4 sm:$0xff]  }
 0x686   :  { %6072 = vst [vmem:[#allocation93_spill] sm:$0xff] %v5204_v4 }
 0x687   :  { %2219 = vmatpush1.bf16.msra.mxu1 %v5167_v13  ;;  %v5186_v13 = vld [vmem:[#allocation14 + $0x20] sm:$0xff]  }
 0x688   :  { %2220 = vmatprep.subr.bf16.mxu1 %v5170_v18  ;;  %6067 = vst [vmem:[#allocation88_spill] sm:$0xff] %v5186_v13  ;;  %v5189_v18 = vld [vmem:[#allocation14 + $0x68] sm:$0xff]   ;;  %3678 = vmatpush3.bf16.msra.mxu0 %v5186_v13 }
 0x689   :  { %6068 = vst [vmem:[#allocation89_spill] sm:$0xff] %v5189_v18  ;;  %3679 = vmatprep.subr.bf16.mxu0 %v5189_v18  ;;  %v5214_v13 = vld [vmem:[#allocation10 + $0x150] ss:$24 sps:$4 sm:$0xff]   ;;  %v5217_v18 = vld [vmem:[#allocation10 + $0x184] ss:$24 sps:$4 sm:$0xff]  }
 0x68a   :  { %6075 = vst [vmem:[#allocation96_spill] sm:$0xff] %v5214_v13  ;;  %6076 = vst [vmem:[#allocation97_spill] sm:$0xff] %v5217_v18 }
 0x68b   :  { %2221 = vmatpush1.bf16.msra.mxu1 %v5179_v55  ;;  %v5198_v55 = vld [vmem:[#allocation14 + $0x28] sm:$0xff]  }
 0x68c   :  { %2222 = vmatprep.subr.bf16.mxu1 %v5182_v12  ;;  %v5201_v12 = vld [vmem:[#allocation10 + $0xf0] ss:$24 sps:$4 sm:$0xff]   ;;  %3680 = vmatpush3.bf16.msra.mxu0 %v5198_v55 }
 0x68d   :  { %6071 = vst [vmem:[#allocation92_spill] sm:$0xff] %v5201_v12 }
 0x68f   :  { %2223 = vmatpush1.bf16.msra.mxu1 %v5191_v0  ;;  %v5208_v0 = vld [vmem:[#allocation10 + $0x120] ss:$24 sps:$4 sm:$0xff]  }
 0x690   :  { %2224 = vmatprep.subr.bf16.mxu1 %v5194_v10  ;;  %6073 = vst [vmem:[#allocation94_spill] sm:$0xff] %v5208_v0  ;;  %v5211_v10 = vld [vmem:[#allocation10 + $0x154] ss:$24 sps:$4 sm:$0xff]  }
 0x691   :  { %6074 = vst [vmem:[#allocation95_spill] sm:$0xff] %v5211_v10 }
 0x693   :  { %2225 = vmatpush1.bf16.msra.mxu1 %v5201_v12  ;;  %v5220_v12 = vld [vmem:[#allocation10 + $0x180] ss:$24 sps:$4 sm:$0xff]  }
 0x694   :  { %2226 = vmatprep.subr.bf16.mxu1 %v5204_v4  ;;  %6077 = vst [vmem:[#allocation98_spill] sm:$0xff] %v5220_v12  ;;  %v5223_v4 = vld [vmem:[#allocation10 + $0x1b4] ss:$24 sps:$4 sm:$0xff]  }
 0x695   :  { %6078 = vst [vmem:[#allocation99_spill] sm:$0xff] %v5223_v4 }
 0x697   :  { %2227 = vmatpush1.bf16.msra.mxu1 %v5208_v0  ;;  %v5226_v0 = vld [vmem:[#allocation10 + $0x1b0] ss:$24 sps:$4 sm:$0xff]  }
 0x698   :  { %2228 = vmatprep.subr.bf16.mxu1 %v5211_v10  ;;  %6079 = vst [vmem:[#allocation100_spill] sm:$0xff] %v5226_v0  ;;  %v5229_v10 = vld [vmem:[#allocation10 + $0x1e4] ss:$24 sps:$4 sm:$0xff]  }
 0x699   :  { %6080 = vst [vmem:[#allocation101_spill] sm:$0xff] %v5229_v10 }
 0x69b   :  { %2229 = vmatpush1.bf16.msra.mxu1 %v5214_v13  ;;  %v5232_v13 = vld [vmem:[#allocation10 + $0x1e0] ss:$24 sps:$4 sm:$0xff]  }
 0x69c   :  { %2230 = vmatprep.subr.bf16.mxu1 %v5217_v18  ;;  %6081 = vst [vmem:[#allocation102_spill] sm:$0xff] %v5232_v13  ;;  %v5235_v18 = vld [vmem:[#allocation10 + $0x214] ss:$24 sps:$4 sm:$0xff]  }
 0x69d   :  { %6082 = vst [vmem:[#allocation103_spill] sm:$0xff] %v5235_v18 }
 0x69f   :  { %2231 = vmatpush1.bf16.msra.mxu1 %v5220_v12  ;;  %v5238_v12 = vld [vmem:[#allocation10 + $0x210] ss:$24 sps:$4 sm:$0xff]  }
 0x6a0   :  { %2232 = vmatprep.subr.bf16.mxu1 %v5223_v4  ;;  %6083 = vst [vmem:[#allocation104_spill] sm:$0xff] %v5238_v12  ;;  %v5241_v4 = vld [vmem:[#allocation10 + $0x244] ss:$24 sps:$4 sm:$0xff]  }
 0x6a1   :  { %6084 = vst [vmem:[#allocation105_spill] sm:$0xff] %v5241_v4 }
 0x6a3   :  { %2233 = vmatpush1.bf16.msra.mxu1 %v5226_v0  ;;  %v5244_v0 = vld [vmem:[#allocation10 + $0x240] ss:$24 sps:$4 sm:$0xff]  }
 0x6a4   :  { %2234 = vmatprep.subr.bf16.mxu1 %v5229_v10  ;;  %6085 = vst [vmem:[#allocation106_spill] sm:$0xff] %v5244_v0  ;;  %v5247_v10 = vld [vmem:[#allocation10 + $0x274] ss:$24 sps:$4 sm:$0xff]  }
 0x6a5   :  { %6086 = vst [vmem:[#allocation107_spill] sm:$0xff] %v5247_v10 }
 0x6a7   :  { %2235 = vmatpush1.bf16.msra.mxu1 %v5232_v13  ;;  %v5250_v13 = vld [vmem:[#allocation10 + $0x270] ss:$24 sps:$4 sm:$0xff]  }
 0x6a8   :  { %2236 = vmatprep.subr.bf16.mxu1 %v5235_v18  ;;  %6087 = vst [vmem:[#allocation108_spill] sm:$0xff] %v5250_v13  ;;  %v5253_v18 = vld [vmem:[#allocation10 + $0x2a4] ss:$24 sps:$4 sm:$0xff]  }
 0x6ab   :  { %2237 = vmatpush1.bf16.msra.mxu1 %v5238_v12  ;;  %v5256_v12 = vld [vmem:[#allocation10 + $0x2a0] ss:$24 sps:$4 sm:$0xff]  }
 0x6ac   :  { %2238 = vmatprep.subr.bf16.mxu1 %v5241_v4  ;;  %6088 = vst [vmem:[#allocation109_spill] sm:$0xff] %v5256_v12  ;;  %v5259_v4 = vld [vmem:[#allocation10 + $0x2d4] ss:$24 sps:$4 sm:$0xff]  }
 0x6ad   :  { %6089 = vst [vmem:[#allocation110_spill] sm:$0xff] %v5259_v4 }
 0x6af   :  { %2239 = vmatpush1.bf16.msra.mxu1 %v5244_v0  ;;  %v5262_v0 = vld [vmem:[#allocation10 + $0x2d0] ss:$24 sps:$4 sm:$0xff]  }
 0x6b0   :  { %2240 = vmatprep.subr.bf16.mxu1 %v5247_v10  ;;  %6090 = vst [vmem:[#allocation111_spill] sm:$0xff] %v5262_v0  ;;  %v5265_v10 = vld [vmem:[#allocation10 + $0x14] ss:$24 sps:$4 sm:$0xff]  }
 0x6b1   :  { %6091 = vst [vmem:[#allocation112_spill] sm:$0xff] %v5265_v10 }
 0x6b3   :  { %2241 = vmatpush1.bf16.msra.mxu1 %v5250_v13  ;;  %v5269_v13 = vld [vmem:[#allocation10 + $0x10] ss:$24 sps:$4 sm:$0xff]  }
 0x6b4   :  { %2242 = vmatprep.subr.bf16.mxu1 %v5253_v18  ;;  %6092 = vst [vmem:[#allocation113_spill] sm:$0xff] %v5269_v13 }
 0x6b7   :  { %2243 = vmatpush1.bf16.msra.mxu1 %v5256_v12  ;;  %v5273_v12 = vld [vmem:[#allocation10 + $0x44] ss:$24 sps:$4 sm:$0xff]  }
 0x6b8   :  { %2244 = vmatprep.subr.bf16.mxu1 %v5259_v4  ;;  %6093 = vst [vmem:[#allocation114_spill] sm:$0xff] %v5273_v12  ;;  %v5276_v4 = vld [vmem:[#allocation10 + $0x40] ss:$24 sps:$4 sm:$0xff]  }
 0x6b9   :  { %6094 = vst [vmem:[#allocation115_spill] sm:$0xff] %v5276_v4 }
 0x6bb   :  { %2245 = vmatpush1.bf16.msra.mxu1 %v5262_v0  ;;  %v5279_v0 = vld [vmem:[#allocation10 + $0x74] ss:$24 sps:$4 sm:$0xff]  }
 0x6bc   :  { %2296 = vmatprep.subr.bf16.mxu1 %v5265_v10  ;;  %v5284_v10 = vld [vmem:[#allocation14 + $0x70] sm:$0xff]  }
 0x6bd   :  { %3681 = vmatprep.subr.bf16.mxu0 %v5284_v10 }
 0x6be   :  { %2247 = vmatmul.mubr.bf16.vlgmr.msra.gmra.mrb[28].mxu1 %v5012_v53 }
 0x6bf   :  { %2297 = vmatpush1.bf16.msra.mxu1 %v5269_v13  ;;  %2328 = vmatprep.mubr.bf16.mxu1 %v5010_v16  ;;  %v5286_v13 = vld [vmem:[#allocation14 + $0x30] sm:$0xff]  }
 0x6c0   :  { %2298 = vmatprep.subr.bf16.mxu1 %v5273_v12  ;;  %3682 = vmatpush3.bf16.msra.mxu0 %v5286_v13  ;;  %v5294_v12 = vld [vmem:[#allocation14 + $0x38] sm:$0xff]  }
 0x6c3   :  { %2299 = vmatpush1.bf16.msra.mxu1 %v5276_v4  ;;  %v5292_v4 = vld [vmem:[#allocation14 + $0x78] sm:$0xff]  }
 0x6c4   :  { %2300 = vmatprep.subr.bf16.mxu1 %v5279_v0  ;;  %3683 = vmatprep.subr.bf16.mxu0 %v5292_v4 }
 0x6c5   :  { %3684 = vmatpush3.bf16.msra.mxu0 %v5294_v12 }
 0x6c7   :  { %2301 = vmatpush1.bf16.msra.mxu1 %v4753_v19  ;;  %v5300_v19 = vld [vmem:[#allocation8 + $0x14] ss:$24 sps:$4 sm:$0xff]  }
 0x6c8   :  { %2302 = vmatprep.subr.bf16.mxu1 %v4755_v20  ;;  %2138 = vmatprep.subr.bf16.mxu0 %v5300_v19  ;;  %v6095_v20 = vld [vmem:[#allocation40_spill] sm:$0xff] }
 0x6cb   :  { %2303 = vmatpush1.bf16.msra.mxu1 %v4757_v21  ;;  %v6096_v21 = vld [vmem:[#allocation42_spill] sm:$0xff] }
 0x6cc   :  { %2304 = vmatprep.subr.bf16.mxu1 %v4759_v22  ;;  %v6097_v22 = vld [vmem:[#allocation44_spill] sm:$0xff] }
 0x6cf   :  { %2305 = vmatpush1.bf16.msra.mxu1 %v4763_v23  ;;  %v6098_v23 = vld [vmem:[#allocation46_spill] sm:$0xff] }
 0x6d0   :  { %2306 = vmatprep.subr.bf16.mxu1 %v4765_v24  ;;  %v6099_v24 = vld [vmem:[#allocation48_spill] sm:$0xff] }
 0x6d3   :  { %2307 = vmatpush1.bf16.msra.mxu1 %v4769_v25  ;;  %v6100_v25 = vld [vmem:[#allocation49_spill] sm:$0xff] }
 0x6d4   :  { %2308 = vmatprep.subr.bf16.mxu1 %v4771_v26  ;;  %v337_v26 = vld [vmem:[%s5843_s9] sm:$0x3] }
 0x6d7   :  { %2309 = vmatpush1.bf16.msra.mxu1 %v4775_v27  ;;  %v5346_v27 = vrot.slane %v337_v26, %v4974_v46 }
 0x6d8   :  { %2310 = vmatprep.subr.bf16.mxu1 %v4779_v28 }
 0x6db   :  { %2311 = vmatpush1.bf16.msra.mxu1 %v4782_v29 }
 0x6dc   :  { %2312 = vmatprep.subr.bf16.mxu1 %v4785_v30  ;;  %v6101_v30 = vld [vmem:[#allocation53_spill] sm:$0xff] }
 0x6df   :  { %2313 = vmatpush1.bf16.msra.mxu1 %v4788_v31  ;;  %v5349_v31 = vrot.slane %v337_v26, %v6101_v30  ;;  %v5388_v26 = vld [vmem:[#allocation10 + $0x6c] ss:$24 sps:$4 sm:$0xff]  }
 0x6e0   :  { %2314 = vmatprep.subr.bf16.mxu1 %v4791_v32  ;;  %v6102_v32 = vld [vmem:[#allocation64_spill] sm:$0xff] }
 0x6e3   :  { %2315 = vmatpush1.bf16.msra.mxu1 %v4794_v33 }
 0x6e4   :  { %2316 = vmatprep.subr.bf16.mxu1 %v4797_v34 }
 0x6e7   :  { %2317 = vmatpush1.bf16.msra.mxu1 %v4800_v35 }
 0x6e8   :  { %2318 = vmatprep.subr.bf16.mxu1 %v4803_v36  ;;  %v6103_v36 = vld [vmem:[#allocation65_spill] sm:$0xff] }
 0x6eb   :  { %2319 = vmatpush1.bf16.msra.mxu1 %v4806_v37 }
 0x6ec   :  { %2320 = vmatprep.subr.bf16.mxu1 %v4809_v38 }
 0x6ef   :  { %2321 = vmatpush1.bf16.msra.mxu1 %v4812_v39 }
 0x6f0   :  { %2322 = vmatprep.subr.bf16.mxu1 %v4815_v40 }
 0x6f3   :  { %2323 = vmatpush1.bf16.msra.mxu1 %v4818_v41 }
 0x6f4   :  { %2324 = vmatprep.subr.bf16.mxu1 %v4821_v42 }
 0x6f7   :  { %2325 = vmatpush1.bf16.msra.mxu1 %v4824_v43 }
 0x6f8   :  { %2326 = vmatprep.subr.bf16.mxu1 %v4827_v44 }
 0x6fb   :  { %2327 = vmatpush1.bf16.msra.mxu1 %v4830_v45 }
 0x6fc   :  { %3691 = vmatprep.subr.bf16.mxu1 %v4858_v17 }
 0x6fe   :  { %2329 = vmatmul.mubr.bf16.vlgmr.msra.gmra.mrb[32].mxu1 %v5012_v53 }
 0x6ff   :  { %3692 = vmatpush3.bf16.msra.mxu1 %v4862_v47 }
 0x700   :  { %3693 = vmatprep.subr.bf16.mxu1 %v4876_v54 }
 0x703   :  { %3694 = vmatpush3.bf16.msra.mxu1 %v4880_v56 }
 0x704   :  { %3695 = vmatprep.subr.bf16.mxu1 %v4890_v62  ;;  %v5355_v62 = vld [vmem:[#allocation8 + $0x10] ss:$24 sps:$4 sm:$0xff]  }
 0x707   :  { %3696 = vmatpush3.bf16.msra.mxu1 %v4894_v1 }
 0x708   :  { %3697 = vmatprep.subr.bf16.mxu1 %v4904_v7 }
 0x70b   :  { %3698 = vmatpush3.bf16.msra.mxu1 %v4906_v9  ;;  %v5359_v9 = vld [vmem:[#allocation8 + $0x44] ss:$24 sps:$4 sm:$0xff]  }
 0x70c   :  { %3699 = vmatprep.subr.bf16.mxu1 %v4912_v11  ;;  %v6104_v11 = vld [vmem:[#allocation27_spill] sm:$0xff] }
 0x70f   :  { %3700 = vmatpush3.bf16.msra.mxu1 %v4918_v15 }
 0x710   :  { %3701 = vmatprep.subr.bf16.mxu1 %v4924_v48 }
 0x713   :  { %3702 = vmatpush3.bf16.msra.mxu1 %v6095_v20 }
 0x714   :  { %3703 = vmatprep.subr.bf16.mxu1 %v6096_v21  ;;  %v5370_v21 = vld [vmem:[#allocation8 + $0x40] ss:$24 sps:$4 sm:$0xff]  }
 0x717   :  { %3704 = vmatpush3.bf16.msra.mxu1 %v6097_v22  ;;  %v5373_v22 = vld [vmem:[#allocation10 + $0xc] ss:$24 sps:$4 sm:$0xff]  }
 0x718   :  { %3705 = vmatprep.subr.bf16.mxu1 %v6098_v23  ;;  %v5378_v23 = vld [vmem:[#allocation10 + $0x8] ss:$24 sps:$4 sm:$0xff]  }
 0x71b   :  { %3706 = vmatpush3.bf16.msra.mxu1 %v6099_v24  ;;  %v5382_v24 = vld [vmem:[#allocation10 + $0x3c] ss:$24 sps:$4 sm:$0xff]  }
 0x71c   :  { %2746 = vmatprep.subr.bf16.mxu1 %v6100_v25  ;;  %v5385_v25 = vld [vmem:[#allocation10 + $0x38] ss:$24 sps:$4 sm:$0xff]  }
 0x749   :  { %v1873_v28 = vpop.f32.mrb[12].mxu0  ;;  %v2090_v29 = vpop.f32.mrb[20].mxu1 }
 0x74a   :  { %v1880_v33 = vadd.f32 %v1873_v28, %v6102_v32  ;;  %v1875_v34 = vpop.f32.mrb[13].mxu0  ;;  %v2092_v35 = vpop.f32.mrb[21].mxu1  ;;  %v5391_v28 = vld [vmem:[#allocation10 + $0x68] ss:$24 sps:$4 sm:$0xff]  }
 0x74b   :  { %v1881_v37 = vadd.f32 %v6103_v36, %v1875_v34  ;;  %v2185_v38 = vcombine.low %v2090_v29, %v2092_v35  ;;  %v1877_v39 = vpop.f32.mrb[14].mxu0  ;;  %v2094_v40 = vpop.f32.mrb[22].mxu1  ;;  %v5400_v29 = vld [vmem:[#allocation10 + $0xcc] ss:$24 sps:$4 sm:$0xff]   ;;  %v5403_v32 = vld [vmem:[#allocation10 + $0xc8] ss:$24 sps:$4 sm:$0xff]  }
 0x74c   :  { %v1893_v41 = vadd.f32 %v5346_v27, %v1880_v33  ;;  %v1878_v42 = vpop.f32.mrb[15].mxu0  ;;  %v2095_v43 = vpop.f32.mrb[23].mxu1  ;;  %v5406_v33 = vld [vmem:[#allocation10 + $0xfc] ss:$24 sps:$4 sm:$0xff]   ;;  %v5409_v34 = vld [vmem:[#allocation10 + $0xf8] ss:$24 sps:$4 sm:$0xff]  }
 0x74d   :  { %v1894_v44 = vadd.f32 %v5349_v31, %v1881_v37  ;;  %v5363_v15 = vrot.slane %v2185_v38, %v6104_v11  ;;  %6105 = vst [vmem:[#allocation40_spill] sm:$0xff] %v5409_v34  ;;  %v5412_v35 = vld [vmem:[#allocation10 + $0x12c] ss:$24 sps:$4 sm:$0xff]   ;;  %v5415_v36 = vld [vmem:[#allocation10 + $0x128] ss:$24 sps:$4 sm:$0xff]  }
 0x74e   :  { %v1895_v17 = vpack.c.bf16 %v1893_v41, %v1893_v41  ;;  %6106 = vst [vmem:[#allocation42_spill] sm:$0xff] %v5412_v35  ;;  %6107 = vst [vmem:[#allocation44_spill] sm:$0xff] %v5415_v36  ;;  %v5418_v37 = vld [vmem:[#allocation10 + $0x15c] ss:$24 sps:$4 sm:$0xff]   ;;  %v5421_v38 = vld [vmem:[#allocation10 + $0x158] ss:$24 sps:$4 sm:$0xff]  }
 0x74f   :  { %v1896_v45 = vpack.c.bf16 %v1894_v44, %v1894_v44  ;;  %6108 = vst [vmem:[#allocation46_spill] sm:$0xff] %v5418_v37  ;;  %6109 = vst [vmem:[#allocation48_spill] sm:$0xff] %v5421_v38  ;;  %v5424_v39 = vld [vmem:[#allocation10 + $0x18c] ss:$24 sps:$4 sm:$0xff]   ;;  %v5427_v40 = vld [vmem:[#allocation10 + $0x188] ss:$24 sps:$4 sm:$0xff]  }
 0x750   :  { %6110 = vst [vmem:[#allocation49_spill] sm:$0xff] %v5424_v39  ;;  %6111 = vst [vmem:[#allocation64_spill] sm:$0xff] %v5427_v40  ;;  %v5430_v41 = vld [vmem:[#allocation10 + $0x1bc] ss:$24 sps:$4 sm:$0xff]   ;;  %v5433_v42 = vld [vmem:[#allocation10 + $0x1b8] ss:$24 sps:$4 sm:$0xff]  }
 0x751   :  { %2031 = vmatprep.mubr.bf16.mxu0 %v1896_v45  ;;  %v2131_v47 = vpop.f32.mrb[24].mxu1  ;;  %6112 = vst [vmem:[#allocation65_spill] sm:$0xff] %v5430_v41  ;;  %6113 = vst [vmem:[#allocation27_spill] sm:$0xff] %v5433_v42  ;;  %v5436_v43 = vld [vmem:[#allocation10 + $0x1ec] ss:$24 sps:$4 sm:$0xff]  }
 0x752   :  { %2032 = vmatmul.mubr.bf16.vlgmr.msra.gmra.mrb[16].mxu0 %v1895_v17  ;;  %v2133_v54 = vpop.f32.mrb[25].mxu1  ;;  %6114 = vst [vmem:[#allocation116_spill] sm:$0xff] %v5436_v43  ;;  %v5439_v44 = vld [vmem:[#allocation10 + $0x1e8] ss:$24 sps:$4 sm:$0xff]   ;;  %v5442_v45 = vld [vmem:[#allocation10 + $0x21c] ss:$24 sps:$4 sm:$0xff]  }
 0x753   :  { %v2186_v56 = vcombine.low %v2131_v47, %v2133_v54  ;;  %2139 = vmatpush1.bf16.msra.mxu0 %v5355_v62  ;;  %v2135_v1 = vpop.f32.mrb[26].mxu1  ;;  %2170 = vmatprep.mubr.bf16.mxu0 %v6037_v51  ;;  %6115 = vst [vmem:[#allocation117_spill] sm:$0xff] %v5439_v44  ;;  %6116 = vst [vmem:[#allocation118_spill] sm:$0xff] %v5442_v45  ;;  %v5445_v17 = vld [vmem:[#allocation10 + $0x218] ss:$24 sps:$4 sm:$0xff]  }
 0x754   :  { %v2136_v7 = vpop.f32.mrb[27].mxu1  ;;  %2140 = vmatprep.subr.bf16.mxu0 %v5359_v9  ;;  %6117 = vst [vmem:[#allocation119_spill] sm:$0xff] %v5445_v17  ;;  %v5448_v47 = vld [vmem:[#allocation10 + $0x24c] ss:$24 sps:$4 sm:$0xff]   ;;  %v5451_v54 = vld [vmem:[#allocation10 + $0x248] ss:$24 sps:$4 sm:$0xff]  }
 0x755   :  { %v5366_v48 = vrot.slane %v2186_v56, %v6104_v11  ;;  %6118 = vst [vmem:[#allocation120_spill] sm:$0xff] %v5448_v47  ;;  %6119 = vst [vmem:[#allocation121_spill] sm:$0xff] %v5451_v54  ;;  %v5454_v56 = vld [vmem:[#allocation10 + $0x27c] ss:$24 sps:$4 sm:$0xff]   ;;  %v5457_v1 = vld [vmem:[#allocation10 + $0x278] ss:$24 sps:$4 sm:$0xff]  }
 0x756   :  { %6120 = vst [vmem:[#allocation122_spill] sm:$0xff] %v5454_v56  ;;  %6121 = vst [vmem:[#allocation123_spill] sm:$0xff] %v5457_v1  ;;  %v5460_v7 = vld [vmem:[#allocation10 + $0x2ac] ss:$24 sps:$4 sm:$0xff]  }
 0x757   :  { %2141 = vmatpush1.bf16.msra.mxu0 %v5370_v21  ;;  %6122 = vst [vmem:[#allocation124_spill] sm:$0xff] %v5460_v7 }
 0x758   :  { %2255 = vmatprep.subr.bf16.mxu0 %v5373_v22 }
 0x75a   :  { %3637 = vmatmul.mubr.msk.bf16.vlgmr.msra.gmra.mrb[20].mxu0 %vm434_vm2, %v5114_v52  ;;  %v5394_v52 = vld [vmem:[#allocation10 + $0x9c] ss:$24 sps:$4 sm:$0xff]  }
 0x75b   :  { %2256 = vmatpush1.bf16.msra.mxu0 %v5378_v23  ;;  %2287 = vmatprep.mubr.bf16.mxu0 %v5010_v16  ;;  %v5397_v16 = vld [vmem:[#allocation10 + $0x98] ss:$24 sps:$4 sm:$0xff]  }
 0x75c   :  { %2257 = vmatprep.subr.bf16.mxu0 %v5382_v24 }
 0x75f   :  { %2258 = vmatpush1.bf16.msra.mxu0 %v5385_v25 }
 0x760   :  { %2259 = vmatprep.subr.bf16.mxu0 %v5388_v26 }
 0x763   :  { %2260 = vmatpush1.bf16.msra.mxu0 %v5391_v28 }
 0x764   :  { %2261 = vmatprep.subr.bf16.mxu0 %v5394_v52 }
 0x767   :  { %2262 = vmatpush1.bf16.msra.mxu0 %v5397_v16 }
 0x768   :  { %2263 = vmatprep.subr.bf16.mxu0 %v5400_v29 }
 0x76b   :  { %2264 = vmatpush1.bf16.msra.mxu0 %v5403_v32 }
 0x76c   :  { %2265 = vmatprep.subr.bf16.mxu0 %v5406_v33 }
 0x76f   :  { %2266 = vmatpush1.bf16.msra.mxu0 %v5409_v34 }
 0x770   :  { %2267 = vmatprep.subr.bf16.mxu0 %v5412_v35 }
 0x773   :  { %2268 = vmatpush1.bf16.msra.mxu0 %v5415_v36 }
 0x774   :  { %2269 = vmatprep.subr.bf16.mxu0 %v5418_v37 }
 0x777   :  { %2270 = vmatpush1.bf16.msra.mxu0 %v5421_v38  ;;  %v6164_v38 = vld [vmem:[#allocation71_spill] sm:$0xff] }
 0x778   :  { %2271 = vmatprep.subr.bf16.mxu0 %v5424_v39 }
 0x77b   :  { %2272 = vmatpush1.bf16.msra.mxu0 %v5427_v40  ;;  %v5468_v40 = vld [vmem:[#allocation10 + $0x2dc] ss:$24 sps:$4 sm:$0xff]  }
 0x77c   :  { %2273 = vmatprep.subr.bf16.mxu0 %v5430_v41  ;;  %6126 = vst [vmem:[#allocation126_spill] sm:$0xff] %v5468_v40 }
 0x77f   :  { %2274 = vmatpush1.bf16.msra.mxu0 %v5433_v42 }
 0x780   :  { %2275 = vmatprep.subr.bf16.mxu0 %v5436_v43 }
 0x783   :  { %2276 = vmatpush1.bf16.msra.mxu0 %v5439_v44  ;;  %v6124_v44 = vld [vmem:[#allocation55_spill] sm:$0xff] }
 0x784   :  { %2277 = vmatprep.subr.bf16.mxu0 %v5442_v45 }
 0x787   :  { %2278 = vmatpush1.bf16.msra.mxu0 %v5445_v17  ;;  %v6123_v17 = vld [vmem:[#allocation54_spill] sm:$0xff] }
 0x788   :  { %2279 = vmatprep.subr.bf16.mxu0 %v5448_v47 }
 0x78b   :  { %2280 = vmatpush1.bf16.msra.mxu0 %v5451_v54  ;;  %v5465_v54 = vld [vmem:[#allocation10 + $0x2a8] ss:$24 sps:$4 sm:$0xff]  }
 0x78c   :  { %2281 = vmatprep.subr.bf16.mxu0 %v5454_v56  ;;  %6125 = vst [vmem:[#allocation125_spill] sm:$0xff] %v5465_v54  ;;  %v2054_v56 = vld [vmem:[#allocation7 + $0xc] sm:$0xff] }
 0x78f   :  { %2282 = vmatpush1.bf16.msra.mxu0 %v5457_v1 }
 0x790   :  { %2283 = vmatprep.subr.bf16.mxu0 %v5460_v7  ;;  %v6127_v7 = vcombine.low %v5363_v15, %v5366_v48  ;;  %v5488_v15 = vld [vmem:[#allocation11 + $0x1c] ss:$12 sps:$4 sm:$0xff]   ;;  %v5491_v48 = vld [vmem:[#allocation11 + $0x18] ss:$12 sps:$4 sm:$0xff]  }
 0x791   :  { %v2248_v20 = vpop.f32.mrb[28].mxu1  ;;  %6131 = vst [vmem:[#allocation130_spill] sm:$0xff] %v5488_v15  ;;  %6132 = vst [vmem:[#allocation131_spill] sm:$0xff] %v5491_v48 }
 0x792   :  { %v2249_v45 = vadd.f32 %v2248_v20, %v6123_v17  ;;  %v2250_v47 = vpop.f32.mrb[29].mxu1  ;;  %v5474_v39 = vadd.f32 %v6127_v7, %v2054_v56  ;;  %v5497_v56 = vld [vmem:[#allocation11 + $0x30] ss:$12 sps:$4 sm:$0xff]  }
 0x793   :  { %v2251_v43 = vadd.f32 %v2250_v47, %v6124_v44  ;;  %v2252_v42 = vpop.f32.mrb[30].mxu1  ;;  %2284 = vmatpush1.bf16.msra.mxu0 %v5465_v54  ;;  %v5477_v47 = vld [vmem:[#allocation10 + $0x2d8] ss:$24 sps:$4 sm:$0xff]   ;;  %6134 = vst [vmem:[#allocation133_spill] sm:$0xff] %v5497_v56 }
 0x794   :  { %v2253_v41 = vpop.f32.mrb[31].mxu1  ;;  %2285 = vmatprep.subr.bf16.mxu0 %v5468_v40  ;;  %6128 = vst [vmem:[#allocation127_spill] sm:$0xff] %v5477_v47  ;;  %v5480_v42 = vld [vmem:[#allocation11 + $0x4] ss:$12 sps:$4 sm:$0xff]   ;;  %v6163_v17 = vld [vmem:[#allocation73_spill] sm:$0xff] }
 0x795   :  { %v2339_v1 = vcombine.low %v2249_v45, %v2251_v43  ;;  %6129 = vst [vmem:[#allocation128_spill] sm:$0xff] %v5480_v42  ;;  %v5485_v43 = vld [vmem:[#allocation11] ss:$12 sps:$4 sm:$0xff]   ;;  %v5506_v7 = vld [vmem:[#allocation11 + $0x64] ss:$12 sps:$4 sm:$0xff]  }
 0x796   :  { %6130 = vst [vmem:[#allocation129_spill] sm:$0xff] %v5485_v43  ;;  %v5494_v45 = vld [vmem:[#allocation11 + $0x34] ss:$12 sps:$4 sm:$0xff]   ;;  %6137 = vst [vmem:[#allocation136_spill] sm:$0xff] %v5506_v7 }
 0x797   :  { %v2346_v20 = vrot.slane %v2339_v1, %v6104_v11  ;;  %2286 = vmatpush1.bf16.msra.mxu0 %v5477_v47  ;;  %6133 = vst [vmem:[#allocation132_spill] sm:$0xff] %v5494_v45  ;;  %v5503_v1 = vld [vmem:[#allocation11 + $0x48] ss:$12 sps:$4 sm:$0xff]  }
 0x798   :  { %2407 = vmatprep.subr.bf16.mxu0 %v5480_v42  ;;  %6136 = vst [vmem:[#allocation135_spill] sm:$0xff] %v5503_v1  ;;  %v6148_v42 = vld [vmem:[#allocation31_spill] sm:$0xff]  ;;  %v6150_v47 = vld [vmem:[#allocation33_spill] sm:$0xff] }
 0x799   :  { %v2348_v41 = vadd.f32 %v2346_v20, %v5474_v39  ;;  %v5509_v20 = vld [vmem:[#allocation11 + $0x60] ss:$12 sps:$4 sm:$0xff]  }
 0x79a   :  { %2288 = vmatmul.mubr.bf16.vlgmr.msra.gmra.mrb[24].mxu0 %v5012_v53  ;;  %v5500_v53 = vld [vmem:[#allocation11 + $0x4c] ss:$12 sps:$4 sm:$0xff]   ;;  %6138 = vst [vmem:[#allocation137_spill] sm:$0xff] %v5509_v20 }
 0x79b   :  { %2408 = vmatpush1.bf16.msra.mxu0 %v5485_v43  ;;  %6135 = vst [vmem:[#allocation134_spill] sm:$0xff] %v5500_v53  ;;  %v6146_v43 = vld [vmem:[#allocation29_spill] sm:$0xff] }
 0x79c   :  { %2409 = vmatprep.subr.bf16.mxu0 %v5488_v15  ;;  %v6145_v15 = vld [vmem:[#allocation28_spill] sm:$0xff] }
 0x79f   :  { %2410 = vmatpush1.bf16.msra.mxu0 %v5491_v48  ;;  %v6143_v48 = vld [vmem:[#allocation24_spill] sm:$0xff] }
 0x7a0   :  { %2411 = vmatprep.subr.bf16.mxu0 %v5494_v45  ;;  %v5512_v45 = vld [vmem:[#allocation11 + $0x7c] ss:$12 sps:$4 sm:$0xff]  }
 0x7a1   :  { %6139 = vst [vmem:[#allocation138_spill] sm:$0xff] %v5512_v45 }
 0x7a3   :  { %2412 = vmatpush1.bf16.msra.mxu0 %v5497_v56  ;;  %v5515_v56 = vld [vmem:[#allocation11 + $0x78] ss:$12 sps:$4 sm:$0xff]  }
 0x7a4   :  { %2413 = vmatprep.subr.bf16.mxu0 %v5500_v53  ;;  %6140 = vst [vmem:[#allocation139_spill] sm:$0xff] %v5515_v56  ;;  %v5518_v53 = vld [vmem:[#allocation11 + $0x94] ss:$12 sps:$4 sm:$0xff]  }
 0x7a5   :  { %6141 = vst [vmem:[#allocation140_spill] sm:$0xff] %v5518_v53 }
 0x7a7   :  { %2414 = vmatpush1.bf16.msra.mxu0 %v5503_v1  ;;  %v6142_v1 = vld [vmem:[#allocation23_spill] sm:$0xff] }
 0x7a8   :  { %2415 = vmatprep.subr.bf16.mxu0 %v5506_v7  ;;  %v6144_v7 = vld [vmem:[#allocation25_spill] sm:$0xff] }
 0x7ab   :  { %2416 = vmatpush1.bf16.msra.mxu0 %v5509_v20  ;;  %v3638_v20 = vmul.f32 -1.442695, %v2348_v41  ;;  %v6154_v41 = vld [vmem:[#allocation37_spill] sm:$0xff] }
 0x7ac   :  { %2417 = vmatprep.subr.bf16.mxu0 %v5512_v45  ;;  %v6147_v45 = vld [vmem:[#allocation30_spill] sm:$0xff] }
 0x7ad   :  { %4071 = vpow2.f32 %v3638_v20  ;;  %v6158_v20 = vld [vmem:[#allocation56_spill] sm:$0xff] }
 0x7af   :  { %2418 = vmatpush1.bf16.msra.mxu0 %v5515_v56  ;;  %v6149_v56 = vld [vmem:[#allocation32_spill] sm:$0xff] }
 0x7b0   :  { %2419 = vmatprep.subr.bf16.mxu0 %v5518_v53  ;;  %v6151_v53 = vld [vmem:[#allocation35_spill] sm:$0xff] }
 0x7b3   :  { %2420 = vmatpush1.bf16.msra.mxu0 %v6142_v1 }
 0x7b4   :  { %2421 = vmatprep.subr.bf16.mxu0 %v6143_v48  ;;  %v6152_v48 = vld [vmem:[#allocation34_spill] sm:$0xff] }
 0x7b7   :  { %2422 = vmatpush1.bf16.msra.mxu0 %v6144_v7  ;;  %v4072_v1 = vpop.eup %4071  ;;  %v6153_v7 = vld [vmem:[#allocation36_spill] sm:$0xff] }
 0x7b8   :  { %2423 = vmatprep.subr.bf16.mxu0 %v6145_v15  ;;  %v2352_v15 = vadd.f32 1.0, %v4072_v1  ;;  %v6161_v1 = vld [vmem:[#allocation45_spill] sm:$0xff] }
 0x7ba   :  { %4073 = vrcp.f32 %v2352_v15  ;;  %v6162_v15 = vld [vmem:[#allocation47_spill] sm:$0xff] }
 0x7bb   :  { %2424 = vmatpush1.bf16.msra.mxu0 %v6146_v43  ;;  %v6155_v43 = vld [vmem:[#allocation38_spill] sm:$0xff] }
 0x7bc   :  { %2425 = vmatprep.subr.bf16.mxu0 %v6147_v45  ;;  %v6156_v45 = vld [vmem:[#allocation39_spill] sm:$0xff] }
 0x7bf   :  { %2426 = vmatpush1.bf16.msra.mxu0 %v6148_v42  ;;  %v6157_v42 = vld [vmem:[#allocation41_spill] sm:$0xff] }
 0x7c0   :  { %2427 = vmatprep.subr.bf16.mxu0 %v6149_v56 }
 0x7c3   :  { %2428 = vmatpush1.bf16.msra.mxu0 %v6150_v47 }
 0x7c4   :  { %2429 = vmatprep.subr.bf16.mxu0 %v6151_v53  ;;  %v6159_v53 = vld [vmem:[#allocation57_spill] sm:$0xff] }
 0x7c7   :  { %2430 = vmatpush1.bf16.msra.mxu0 %v6152_v48  ;;  %v6160_v48 = vld [vmem:[#allocation43_spill] sm:$0xff] }
 0x7c8   :  { %2431 = vmatprep.subr.bf16.mxu0 %v6153_v7 }
 0x7cb   :  { %2432 = vmatpush1.bf16.msra.mxu0 %v6154_v41 }
 0x7cc   :  { %2433 = vmatprep.subr.bf16.mxu0 %v6155_v43 }
 0x7cf   :  { %2434 = vmatpush1.bf16.msra.mxu0 %v6156_v45  ;;  %v4074_v45 = vpop.eup %4073 }
 0x7d0   :  { %2435 = vmatprep.subr.bf16.mxu0 %v6157_v42 }
 0x7d1   :  { %v2330_v56 = vpop.f32.mrb[32].mxu1 }
 0x7d2   :  { %v2331_v47 = vadd.f32 %v2330_v56, %v6158_v20  ;;  %v2332_v40 = vpop.f32.mrb[33].mxu1  ;;  %v2040_v56 = vadd.s32 4294967240, %v6164_v38  ;;  %v6165_v20 = vld [vmem:[#allocation26_spill] sm:$0xff] }
 0x7d3   :  { %v2333_v54 = vadd.f32 %v2332_v40, %v6159_v53  ;;  %v2334_v44 = vpop.f32.mrb[34].mxu1  ;;  %2436 = vmatpush1.bf16.msra.mxu0 %v6160_v48  ;;  %v2055_v53 = vld [vmem:[#allocation7 + $0x14] sm:$0xf] }
 0x7d4   :  { %v2335_v7 = vpop.f32.mrb[35].mxu1  ;;  %2437 = vmatprep.subr.bf16.mxu0 %v6161_v1  ;;  %v5546_v37 = vsub.s32 %v2040_v56, %v6165_v20  ;;  %v5551_v44 = vld [vmem:[%s5846_s12] ss:$0 sm:$0xff] }
 0x7d5   :  { %v2378_v41 = vcombine.low %v2331_v47, %v2333_v54  ;;  %6167 = vst [vmem:[#allocation24_spill] sm:$0xff] %v5551_v44 }
 0x7d6   :  { %6166 = vst [vmem:[#allocation23_spill] sm:$0xff] %v5546_v37  ;;  %v2048_v47 = vrot.slane %v5108_v57, %v5546_v37 }
 0x7d7   :  { %v2385_v43 = vrot.slane %v2378_v41, %v6104_v11  ;;  %2438 = vmatpush1.bf16.msra.mxu0 %v6162_v15 }
 0x7d8   :  { %2643 = vmatprep.subr.bf16.mxu0 %v6163_v17  ;;  %v6168_v17 = vld [vmem:[#allocation78_spill] sm:$0xff] }
 0x7d9   :  { %v2387_v42 = vmul.f32 %v4074_v45, %v2385_v43  ;;  %v2044_v41 = vrot.slane %v6168_v17, %v5546_v37  ;;  %v6169_v17 = vld [vmem:[#allocation50_spill] sm:$0xff] }
 0x7db   :  { %v2049_v20 = vsel %vm1723_vm0, %v2048_v47, %v2044_v41 }
 0x825   :  { %v3685_v40 = vpop.f32.mrb[16].mxu0 }
 0x826   :  { %v3686_v54 = vpop.f32.mrb[17].mxu0 }
 0x827   :  { %v3687_v48 = vadd.f32 %v3686_v54, %v3685_v40  ;;  %v3688_v7 = vpop.f32.mrb[18].mxu0 }
 0x828   :  { %v3689_v1 = vpop.f32.mrb[19].mxu0 }
 0x829   :  { %v2034_v38 = vadd.f32 %v3687_v48, %v5551_v44  ;;  %v6170_v44 = vld [vmem:[#allocation51_spill] sm:$0xff] }
 0x82b   :  { %2039 = vst [vmem:[#allocation16] sm:$0x3] %v2034_v38 }
 0x82c   :  { %2052 = vst.msk [vmem:[#allocation16] sm:$0x3] %vm2051_vm3, %v2049_v20  ;;  %v2356_v20 = vrot.slane %v5474_v39, 4 }
 0x82d   :  { %v2172_v43 = vpop.f32.mrb[20].mxu0 }
 0x82e   :  { %v2174_v15 = vpop.f32.mrb[21].mxu0 }
 0x82f   :  { %v2202_v45 = vcombine.low %v2172_v43, %v2174_v15  ;;  %v2176_v56 = vpop.f32.mrb[22].mxu0 }
 0x830   :  { %v2177_v57 = vpop.f32.mrb[23].mxu0 }
 0x831   :  { %v2209_v40 = vrot.slane %v2202_v45, %v6104_v11 }
 0x833   :  { %v2213_v54 = vadd.f32 %v2209_v40, %v2055_v53 }
 0x835   :  { %v2388_v7 = vadd.f32 %v2387_v42, %v2213_v54 }
 0x86d   :  { %v2289_v1 = vpop.f32.mrb[24].mxu0 }
 0x86e   :  { %v2290_v37 = vadd.f32 %v2289_v1, %v6169_v17  ;;  %v2291_v48 = vpop.f32.mrb[25].mxu0  ;;  %v6171_v1 = vld [vmem:[#allocation58_spill] sm:$0xff] }
 0x86f   :  { %v2292_v36 = vadd.f32 %v2291_v48, %v6170_v44  ;;  %v2293_v47 = vpop.f32.mrb[26].mxu0 }
 0x870   :  { %v2294_v41 = vpop.f32.mrb[27].mxu0 }
 0x871   :  { %v2360_v38 = vcombine.low %v2290_v37, %v2292_v36 }
 0x873   :  { %v2367_v43 = vrot.slane %v2360_v38, %v6104_v11  ;;  %v6174_v38 = vld [vmem:[#allocation59_spill] sm:$0xff] }
 0x875   :  { %v2369_v15 = vadd.f32 %v2367_v43, %v2356_v20  ;;  %v6175_v20 = vld [vmem:[#allocation75_spill] sm:$0xff]  ;;  %v6176_v43 = vld [vmem:[#allocation60_spill] sm:$0xff] }
 0x877   :  { %v3639_v56 = vmul.f32 -1.442695, %v2369_v15  ;;  %v6177_v15 = vld [vmem:[#allocation76_spill] sm:$0xff] }
 0x879   :  { %4075 = vpow2.f32 %v3639_v56  ;;  %v6178_v56 = vld [vmem:[#allocation61_spill] sm:$0xff] }
 0x883   :  { %v4076_v57 = vpop.eup %4075 }
 0x884   :  { %v2373_v45 = vadd.f32 1.0, %v4076_v57  ;;  %v6179_v57 = vld [vmem:[#allocation62_spill] sm:$0xff] }
 0x886   :  { %4077 = vrcp.f32 %v2373_v45 }
 0x887   :  { %4079 = vtanh.f32 %v2388_v7  ;;  %v6173_v7 = vld [vmem:[#allocation74_spill] sm:$0xff] }
 0x890   :  { %v4078_v53 = vpop.eup %4077 }
 0x891   :  { %v2390_v42 = vsub.f32 1.0, %v4078_v53  ;;  %v4080_v40 = vpop.eup %4079  ;;  %v2392_v48 = vmul.f32 %v4078_v53, %v6171_v1 }
 0x893   :  { %v2391_v54 = vmul.f32 %v4080_v40, %v2390_v42  ;;  %v6180_v42 = vld [vmem:[#allocation63_spill] sm:$0xff] }
 0x895   :  { %v5566_v47 = vadd.f32 %v2392_v48, %v2391_v54 }
 0x897   :  { %6172 = vst [vmem:[#allocation25_spill] sm:$0xff] %v5566_v47  ;;  %v2401_v36 = vrot.slane %v5566_v47, %v6104_v11  ;;  %v6182_v47 = vld [vmem:[#allocation67_spill] sm:$0xff] }
 0x899   :  { %v2402_v37 = vcombine.high %v2401_v36, %v2401_v36  ;;  %v5572_v41 = vpack.c.bf16 %v2401_v36, %v2401_v36 }
 0x89b   :  { %v5570_v39 = vpack.c.bf16 %v2402_v37, %v2402_v37 }
 0x89d   :  { %2439 = vmatprep.mubr.bf16.mxu0 %v5570_v39  ;;  %2480 = vmatprep.mubr.bf16.mxu1 %v5570_v39 }
 0x89e   :  { %2440 = vmatmul.mubr.bf16.vlgmr.msra.gmra.mrb[28].mxu0 %v5572_v41  ;;  %2481 = vmatmul.mubr.bf16.vlgmr.msra.gmra.mrb[36].mxu1 %v5572_v41 }
 0x89f   :  { %2644 = vmatpush1.bf16.msra.mxu0 %v6173_v7  ;;  %2747 = vmatpush1.bf16.msra.mxu1 %v6174_v38 }
 0x8a0   :  { %2645 = vmatprep.subr.bf16.mxu0 %v6175_v20  ;;  %2748 = vmatprep.subr.bf16.mxu1 %v6176_v43 }
 0x8a1   :  { %2675 = vmatprep.mubr.bf16.mxu0 %v6037_v51  ;;  %2778 = vmatprep.mubr.bf16.mxu1 %v6037_v51 }
 0x8a3   :  { %2646 = vmatpush1.bf16.msra.mxu0 %v6177_v15  ;;  %2749 = vmatpush1.bf16.msra.mxu1 %v6178_v56 }
 0x8a4   :  { %2787 = vmatprep.subr.bf16.mxu1 %v6179_v57  ;;  %3713 = vmatprep.subr.bf16.mxu0 %v5135_v49  ;;  %v6181_v57 = vld [vmem:[#allocation66_spill] sm:$0xff] }
 0x971   :  { %v2441_v45 = vpop.f32.mrb[28].mxu0  ;;  %v3707_v53 = vpop.f32.mrb[36].mxu1 }
 0x972   :  { %v2495_v40 = vrot.slane %v2441_v45, %v6180_v42  ;;  %v5589_v54 = vpop.f32.mrb[29].mxu0  ;;  %v3708_v1 = vpop.f32.mrb[37].mxu1 }
 0x973   :  { %v5591_v48 = vadd.f32 %v3708_v1, %v3707_v53  ;;  %v2445_v36 = vpop.f32.mrb[30].mxu0  ;;  %v3710_v37 = vpop.f32.mrb[38].mxu1  ;;  %v6183_v1 = vld [vmem:[#allocation68_spill] sm:$0xff] }
 0x974   :  { %v2496_v7 = vcombine.high %v2495_v40, %v2495_v40  ;;  %v2503_v38 = vrot.slane %v2495_v40, %v6180_v42  ;;  %v2446_v20 = vpop.f32.mrb[31].mxu0  ;;  %v3711_v43 = vpop.f32.mrb[39].mxu1 }
 0x976   :  { %v2510_v15 = vrot.slane %v2496_v7, %v6180_v42  ;;  %v2514_v49 = vrot.slane %v2503_v38, %v4974_v46  ;;  %v6184_v7 = vld [vmem:[#allocation69_spill] sm:$0xff]  ;;  %v6185_v42 = vld [vmem:[#allocation70_spill] sm:$0xff] }
 0x978   :  { %v2518_v56 = vrot.slane %v2510_v15, %v4974_v46  ;;  %v2521_v45 = vadd.f32 %v2514_v49, %v6181_v57 }
 0x97a   :  { %v2522_v44 = vadd.f32 %v2518_v56, %v6182_v47  ;;  %4081 = vtanh.f32 %v2521_v45  ;;  %v6186_v56 = vld [vmem:[#allocation72_spill] sm:$0xff] }
 0x97c   :  { %4083 = vtanh.f32 %v2522_v44 }
 0x984   :  { %v4082_v53 = vpop.eup %4081 }
 0x985   :  { %v2525_v36 = vmul.f32 %v4082_v53, %v6183_v1 }
 0x986   :  { %v4084_v37 = vpop.eup %4083 }
 0x987   :  { %2527 = vadd.xlane.f32.xlu1 %v2525_v36  ;;  %v2526_v40 = vmul.f32 %v4084_v37, %v6183_v1 }
 0x989   :  { %2529 = vadd.xlane.f32.xlu0 %v2526_v40 }
 0xa14   :  { %v2528_v20 = vpop.xlane.xlu1 %2527 }
 0xa15   :  { %v2531_v43 = vadd.f32 %v2528_v20, %v6184_v7 }
 0xa16   :  { %v2530_v38 = vpop.xlane.xlu0 %2529 }
 0xa17   :  { %v2532_v15 = vadd.f32 %v2530_v38, %v6185_v42  ;;  %2536 = vperm.xlu0 %3801, %v2531_v43  }
 0xa19   :  { %2539 = vperm.xlu1 %3802, %v2532_v15  }
 0xa96   :  { %v2537_v49 = vpop.permute.xlu0 %2536 }
 0xa97   :  { %v2544_v44 = vrot.slane %v2537_v49, %v6186_v56 }
 0xa98   :  { %v2540_v47 = vpop.permute.xlu1 %2539 }
 0xa99   :  { %v2548_v57 = vrot.slane %v2540_v47, %v6186_v56 }
 0xa9b   :  { %v2549_v45 = vsel %vm1723_vm0, %v2548_v57, %v2544_v44 }
 0xa9c   :  { %v2551_v53 = vsel %vm1726_vm1, %v2549_v45, -inf }
 0xa9d   :  { %2552 = vmax.xlane.f32.xlu0 %v2551_v53 }
 0xb2a   :  { %v2553_v1 = vpop.xlane.xlu0 %2552 }
 0xb2b   :  { %v2558_v36 = vrot.slane %v2553_v1, %v4974_v46  ;;  %v2562_v37 = vrot.slane %v2553_v1, %v6101_v30 }
 0xb2d   :  { %v2565_v40 = vsub.f32 %v2531_v43, %v2558_v36  ;;  %v2566_v20 = vsub.f32 %v2532_v15, %v2562_v37 }
 0xb2f   :  { %v2567_v38 = vmul.f32 1.442695, %v2565_v40  ;;  %v2569_v42 = vmul.f32 1.442695, %v2566_v20 }
 0xb31   :  { %4085 = vpow2.f32 %v2567_v38  ;;  %v6188_v38 = vld [vmem:[#allocation77_spill] sm:$0xff] }
 0xb32   :  { %4087 = vpow2.f32 %v2569_v42 }
 0xb3b   :  { %v4086_v7 = vpop.eup %4085 }
 0xb3c   :  { %2574 = vperm.xlu1 %3802, %v4086_v7   ;;  %v4088_v49 = vpop.eup %4087 }
 0xb40   :  { %2577 = vperm.xlu1 %3802, %v4088_v49  }
 0xbbb   :  { %v2575_v47 = vpop.permute.xlu1 %2574 }
 0xbbc   :  { %v2582_v57 = vrot.slane %v2575_v47, %v6186_v56 }
 0xbbf   :  { %v2578_v44 = vpop.permute.xlu1 %2577 }
 0xbc0   :  { %v2586_v45 = vrot.slane %v2578_v44, %v6186_v56 }
 0xbc2   :  { %v2587_v53 = vsel %vm1723_vm0, %v2586_v45, %v2582_v57 }
 0xbc3   :  { %v2589_v1 = vsel %vm1726_vm1, %v2587_v53, 0.0  ;;  %v6189_v53 = vld [vmem:[#allocation79_spill] sm:$0xff] }
 0xbc4   :  { %2590 = vadd.xlane.f32.xlu1 %v2589_v1 }
 0xc51   :  { %v2591_v43 = vpop.xlane.xlu1 %2590 }
 0xc52   :  { %4089 = vrcp.f32 %v2591_v43 }
 0xc5c   :  { %v4090_v15 = vpop.eup %4089 }
 0xc5d   :  { %v2597_v42 = vrot.slane %v4090_v15, %v4974_v46  ;;  %v2601_v37 = vrot.slane %v4090_v15, %v6101_v30 }
 0xc5f   :  { %v2604_v36 = vmul.f32 %v4086_v7, %v2597_v42  ;;  %v2605_v40 = vmul.f32 %v4088_v49, %v2601_v37 }
 0xc61   :  { %2608 = vperm.xlu0 %3801, %v2604_v36  }
 0xc65   :  { %2613 = vperm.xlu0 %3801, %v2605_v40  }
 0xce0   :  { %v5615_v20 = vpop.permute.xlu0 %2608 }
 0xce1   :  { %6187 = vst [vmem:[#allocation28_spill] sm:$0xff] %v5615_v20  ;;  %v2616_v47 = vmul.f32 %v5615_v20, %v6188_v38 }
 0xce3   :  { %v2618_v44 = vsel %vm434_vm2, %v2616_v47, 0.0 }
 0xce4   :  { %v2619_v57 = vrot.slane %v2618_v44, 4  ;;  %v5620_v45 = vpop.permute.xlu0 %2613 }
 0xce5   :  { %v2617_v1 = vmul.f32 %v5620_v45, %v6189_v53 }
 0xce6   :  { %v2620_v43 = vadd.f32 %v2619_v57, %v2618_v44  ;;  %v6215_v44 = vld [vmem:[#allocation105_spill] sm:$0xff]  ;;  %v6216_v57 = vld [vmem:[#allocation106_spill] sm:$0xff] }
 0xce7   :  { %v2625_v7 = vsel %vm434_vm2, %v2617_v1, 0.0  ;;  %v6217_v1 = vld [vmem:[#allocation107_spill] sm:$0xff] }
 0xce8   :  { %v2621_v15 = vrot.slane %v2620_v43, 2  ;;  %v2626_v42 = vrot.slane %v2625_v7, 4 }
 0xcea   :  { %v2622_v49 = vadd.f32 %v2621_v15, %v2620_v43  ;;  %v2627_v36 = vadd.f32 %v2626_v42, %v2625_v7  ;;  %v6218_v43 = vld [vmem:[#allocation108_spill] sm:$0xff]  ;;  %v6219_v7 = vld [vmem:[#allocation109_spill] sm:$0xff]  ;;  %v6220_v15 = vld [vmem:[#allocation110_spill] sm:$0xff] }
 0xceb   :  { %v6221_v42 = vld [vmem:[#allocation111_spill] sm:$0xff] }
 0xcec   :  { %v2623_v37 = vrot.slane %v2622_v49, 1  ;;  %v2628_v40 = vrot.slane %v2627_v36, 2 }
 0xcee   :  { %v2624_v30 = vadd.f32 %v2623_v37, %v2622_v49  ;;  %v2629_v56 = vadd.f32 %v2628_v40, %v2627_v36  ;;  %v6222_v49 = vld [vmem:[#allocation112_spill] sm:$0xff]  ;;  %v6223_v36 = vld [vmem:[#allocation113_spill] sm:$0xff]  ;;  %v6224_v37 = vld [vmem:[#allocation114_spill] sm:$0xff] }
 0xcef   :  { %v6225_v40 = vld [vmem:[#allocation115_spill] sm:$0xff] }
 0xcf0   :  { %v2630_v38 = vrot.slane %v2629_v56, 1  ;;  %v2632_v46 = vpack.c.bf16 %v2624_v30, %v2624_v30  ;;  %v6203_v30 = vld [vmem:[#allocation93_spill] sm:$0xff] }
 0xcf2   :  { %v2631_v47 = vadd.f32 %v2630_v38, %v2629_v56  ;;  %v2636_v20 = vunpack.c.l.b16 %v2632_v46  ;;  %v6190_v46 = vld [vmem:[#allocation82_spill] sm:$0xff]  ;;  %v6211_v56 = vld [vmem:[#allocation101_spill] sm:$0xff] }
 0xcf3   :  { %v4206_v38 = vld [vmem:[#allocation10 + $0xa4] ss:$24 sps:$4 sm:$0xff]  }
 0xcf4   :  { %v2633_v17 = vpack.c.bf16 %v2631_v47, %v2631_v47  ;;  %v4207_v47 = vld [vmem:[#allocation10 + $0xa0] ss:$24 sps:$4 sm:$0xff]  }
 0xcf6   :  { %v2637_v35 = vunpack.c.l.b16 %v2633_v17  ;;  %v6208_v17 = vld [vmem:[#allocation98_spill] sm:$0xff] }
 0xcf8   :  { %v2638_v34 = vsel %vm1723_vm0, %v2637_v35, %v2636_v20  ;;  %v6207_v35 = vld [vmem:[#allocation97_spill] sm:$0xff]  ;;  %v6212_v20 = vld [vmem:[#allocation102_spill] sm:$0xff] }
 0xcf9   :  { %v5626_v53 = vpack.c.b16 %v2638_v34, %v2638_v34  ;;  %v6204_v34 = vld [vmem:[#allocation94_spill] sm:$0xff] }
 0xcfb   :  { %3640 = vmatmul.mubr.msk.bf16.vlgmr.msra.gmra.mrb[32].mxu0 %vm434_vm2, %v5626_v53  ;;  %3641 = vmatmul.mubr.msk.bf16.vlgmr.msra.gmra.mrb[40].mxu1 %vm434_vm2, %v5626_v53 }
 0xcfc   :  { %2788 = vmatpush1.bf16.msra.mxu1 %v5120_v58  ;;  %2819 = vmatprep.mubr.bf16.mxu1 %v6037_v51  ;;  %v6191_v58 = vld [vmem:[#allocation80_spill] sm:$0xff] }
 0xcfd   :  { %2789 = vmatprep.subr.bf16.mxu1 %v5124_v3  ;;  %3714 = vmatpush3.bf16.msra.mxu0 %v5137_v8  ;;  %v6192_v3 = vld [vmem:[#allocation81_spill] sm:$0xff]  ;;  %v6195_v8 = vld [vmem:[#allocation84_spill] sm:$0xff] }
 0xcfe   :  { %3715 = vmatprep.subr.bf16.mxu0 %v5139_v5  ;;  %v6196_v5 = vld [vmem:[#allocation88_spill] sm:$0xff] }
 0xd00   :  { %2790 = vmatpush1.bf16.msra.mxu1 %v5127_v14  ;;  %v6193_v14 = vld [vmem:[#allocation85_spill] sm:$0xff] }
 0xd01   :  { %2904 = vmatprep.subr.bf16.mxu1 %v5130_v59  ;;  %3716 = vmatpush3.bf16.msra.mxu0 %v5150_v50  ;;  %v6194_v59 = vld [vmem:[#allocation83_spill] sm:$0xff] }
 0xd02   :  { %3717 = vmatprep.subr.bf16.mxu0 %v5153_v60  ;;  %v6199_v50 = vld [vmem:[#allocation87_spill] sm:$0xff]  ;;  %v6200_v60 = vld [vmem:[#allocation90_spill] sm:$0xff] }
 0xd03   :  { %3642 = vmatmul.mubr.msk.bf16.vlgmr.msra.gmra.mrb[44].mxu1 %vm434_vm2, %v5626_v53 }
 0xd04   :  { %2905 = vmatpush1.bf16.msra.mxu1 %v5141_v61  ;;  %2936 = vmatprep.mubr.bf16.mxu1 %v5570_v39  ;;  %v6197_v61 = vld [vmem:[#allocation89_spill] sm:$0xff] }
 0xd05   :  { %2906 = vmatprep.subr.bf16.mxu1 %v5145_v6  ;;  %3718 = vmatpush3.bf16.msra.mxu0 %v5162_v63  ;;  %v6198_v6 = vld [vmem:[#allocation86_spill] sm:$0xff]  ;;  %v6201_v63 = vld [vmem:[#allocation91_spill] sm:$0xff] }
 0xd06   :  { %3719 = vmatprep.subr.bf16.mxu0 %v6190_v46  ;;  %v4208_v46 = vld [vmem:[#allocation10 + $0xd4] ss:$24 sps:$4 sm:$0xff]  }
 0xd08   :  { %2907 = vmatpush1.bf16.msra.mxu1 %v6191_v58  ;;  %v4209_v58 = vld [vmem:[#allocation10 + $0xd0] ss:$24 sps:$4 sm:$0xff]  }
 0xd09   :  { %2908 = vmatprep.subr.bf16.mxu1 %v6192_v3  ;;  %3720 = vmatpush3.bf16.msra.mxu0 %v5174_v2  ;;  %v6202_v2 = vld [vmem:[#allocation92_spill] sm:$0xff]  ;;  %v4210_v3 = vld [vmem:[#allocation10 + $0x104] ss:$24 sps:$4 sm:$0xff]  }
 0xd0a   :  { %3721 = vmatprep.subr.bf16.mxu0 %v6193_v14  ;;  %v4211_v14 = vld [vmem:[#allocation10 + $0x100] ss:$24 sps:$4 sm:$0xff]  }
 0xd0c   :  { %2909 = vmatpush1.bf16.msra.mxu1 %v6194_v59  ;;  %v4212_v59 = vld [vmem:[#allocation10 + $0x134] ss:$24 sps:$4 sm:$0xff]  }
 0xd0d   :  { %2910 = vmatprep.subr.bf16.mxu1 %v6195_v8  ;;  %3722 = vmatpush3.bf16.msra.mxu0 %v6196_v5  ;;  %v4213_v8 = vld [vmem:[#allocation10 + $0x130] ss:$24 sps:$4 sm:$0xff]   ;;  %v4214_v5 = vld [vmem:[#allocation10 + $0x164] ss:$24 sps:$4 sm:$0xff]  }
 0xd0e   :  { %3723 = vmatprep.subr.bf16.mxu0 %v6197_v61  ;;  %v4216_v61 = vld [vmem:[#allocation10 + $0x194] ss:$24 sps:$4 sm:$0xff]  }
 0xd10   :  { %2911 = vmatpush1.bf16.msra.mxu1 %v6198_v6  ;;  %v4217_v6 = vld [vmem:[#allocation10 + $0x190] ss:$24 sps:$4 sm:$0xff]  }
 0xd11   :  { %2912 = vmatprep.subr.bf16.mxu1 %v6199_v50  ;;  %3724 = vmatpush3.bf16.msra.mxu0 %v5198_v55  ;;  %v6205_v55 = vld [vmem:[#allocation95_spill] sm:$0xff] }
 0xd12   :  { %3725 = vmatprep.subr.bf16.mxu0 %v5284_v10  ;;  %v6206_v10 = vld [vmem:[#allocation96_spill] sm:$0xff]  ;;  %v4218_v50 = vld [vmem:[#allocation10 + $0x1c4] ss:$24 sps:$4 sm:$0xff]  }
 0xd14   :  { %2913 = vmatpush1.bf16.msra.mxu1 %v6200_v60  ;;  %v4219_v60 = vld [vmem:[#allocation10 + $0x1c0] ss:$24 sps:$4 sm:$0xff]  }
 0xd15   :  { %2914 = vmatprep.subr.bf16.mxu1 %v6201_v63  ;;  %3726 = vmatpush3.bf16.msra.mxu0 %v5286_v13  ;;  %v6209_v13 = vld [vmem:[#allocation99_spill] sm:$0xff] }
 0xd16   :  { %3727 = vmatprep.subr.bf16.mxu0 %v5292_v4  ;;  %v6210_v4 = vld [vmem:[#allocation100_spill] sm:$0xff] }
 0xd17   :  { %v4220_v63 = vld [vmem:[#allocation10 + $0x1f4] ss:$24 sps:$4 sm:$0xff]  }
 0xd18   :  { %2915 = vmatpush1.bf16.msra.mxu1 %v6202_v2  ;;  %v4221_v2 = vld [vmem:[#allocation10 + $0x1f0] ss:$24 sps:$4 sm:$0xff]  }
 0xd19   :  { %2916 = vmatprep.subr.bf16.mxu1 %v6203_v30  ;;  %3728 = vmatpush3.bf16.msra.mxu0 %v5294_v12  ;;  %v6213_v12 = vld [vmem:[#allocation103_spill] sm:$0xff] }
 0xd1a   :  { %2828 = vmatprep.subr.bf16.mxu0 %v5300_v19  ;;  %v6214_v19 = vld [vmem:[#allocation104_spill] sm:$0xff]  ;;  %v4222_v30 = vld [vmem:[#allocation10 + $0x224] ss:$24 sps:$4 sm:$0xff]  }
 0xd1c   :  { %2917 = vmatpush1.bf16.msra.mxu1 %v6204_v34  ;;  %v4223_v34 = vld [vmem:[#allocation10 + $0x220] ss:$24 sps:$4 sm:$0xff]  }
 0xd1d   :  { %2918 = vmatprep.subr.bf16.mxu1 %v6205_v55  ;;  %v4224_v55 = vld [vmem:[#allocation10 + $0x254] ss:$24 sps:$4 sm:$0xff]  }
 0xd20   :  { %2919 = vmatpush1.bf16.msra.mxu1 %v6206_v10  ;;  %v4225_v10 = vld [vmem:[#allocation10 + $0x250] ss:$24 sps:$4 sm:$0xff]  }
 0xd21   :  { %2920 = vmatprep.subr.bf16.mxu1 %v6207_v35  ;;  %v4226_v35 = vld [vmem:[#allocation10 + $0x284] ss:$24 sps:$4 sm:$0xff]  }
 0xd24   :  { %2921 = vmatpush1.bf16.msra.mxu1 %v6208_v17  ;;  %v4227_v17 = vld [vmem:[#allocation10 + $0x280] ss:$24 sps:$4 sm:$0xff]  }
 0xd25   :  { %2922 = vmatprep.subr.bf16.mxu1 %v6209_v13  ;;  %v4228_v13 = vld [vmem:[#allocation10 + $0x2b4] ss:$24 sps:$4 sm:$0xff]  }
 0xd28   :  { %2923 = vmatpush1.bf16.msra.mxu1 %v6210_v4  ;;  %v4229_v4 = vld [vmem:[#allocation10 + $0x2b0] ss:$24 sps:$4 sm:$0xff]  }
 0xd29   :  { %2924 = vmatprep.subr.bf16.mxu1 %v6211_v56  ;;  %v4230_v56 = vld [vmem:[#allocation10 + $0x2e4] ss:$24 sps:$4 sm:$0xff]  }
 0xd2c   :  { %2925 = vmatpush1.bf16.msra.mxu1 %v6212_v20  ;;  %v4231_v20 = vld [vmem:[#allocation10 + $0x2e0] ss:$24 sps:$4 sm:$0xff]  }
 0xd2d   :  { %2926 = vmatprep.subr.bf16.mxu1 %v6213_v12  ;;  %v4232_v12 = vld [vmem:[#allocation11 + $0xc8] ss:$12 sps:$4 sm:$0xff]  }
 0xd30   :  { %2927 = vmatpush1.bf16.msra.mxu1 %v6214_v19  ;;  %v4233_v19 = vld [vmem:[#allocation11 + $0x8] ss:$12 sps:$4 sm:$0xff]  }
 0xd31   :  { %2928 = vmatprep.subr.bf16.mxu1 %v6215_v44  ;;  %v4234_v44 = vld [vmem:[#allocation11 + $0xe0] ss:$12 sps:$4 sm:$0xff]  }
 0xd34   :  { %2929 = vmatpush1.bf16.msra.mxu1 %v6216_v57  ;;  %v4235_v57 = vld [vmem:[#allocation11 + $0x20] ss:$12 sps:$4 sm:$0xff]  }
 0xd35   :  { %2930 = vmatprep.subr.bf16.mxu1 %v6217_v1  ;;  %v4236_v1 = vld [vmem:[#allocation11 + $0xf8] ss:$12 sps:$4 sm:$0xff]  }
 0xd38   :  { %2931 = vmatpush1.bf16.msra.mxu1 %v6218_v43  ;;  %v4237_v43 = vld [vmem:[#allocation11 + $0x38] ss:$12 sps:$4 sm:$0xff]  }
 0xd39   :  { %2932 = vmatprep.subr.bf16.mxu1 %v5253_v18  ;;  %v4205_v18 = vld [vmem:[#allocation10 + $0x70] ss:$24 sps:$4 sm:$0xff]  }
 0xd3c   :  { %2933 = vmatpush1.bf16.msra.mxu1 %v6219_v7  ;;  %v4238_v7 = vld [vmem:[#allocation11 + $0x110] ss:$12 sps:$4 sm:$0xff]  }
 0xd3d   :  { %2934 = vmatprep.subr.bf16.mxu1 %v6220_v15  ;;  %v4239_v15 = vld [vmem:[#allocation11 + $0x50] ss:$12 sps:$4 sm:$0xff]  }
 0xd40   :  { %2935 = vmatpush1.bf16.msra.mxu1 %v6221_v42  ;;  %v4240_v42 = vld [vmem:[#allocation11 + $0x128] ss:$12 sps:$4 sm:$0xff]  }
 0xd41   :  { %2986 = vmatprep.subr.bf16.mxu1 %v6222_v49  ;;  %v4241_v49 = vld [vmem:[#allocation11 + $0x68] ss:$12 sps:$4 sm:$0xff]  }
 0xd43   :  { %2937 = vmatmul.mubr.bf16.vlgmr.msra.gmra.mrb[48].mxu1 %v5572_v41 }
 0xd44   :  { %2987 = vmatpush1.bf16.msra.mxu1 %v6223_v36  ;;  %3018 = vmatprep.mubr.bf16.mxu1 %v5570_v39  ;;  %v4242_v36 = vld [vmem:[#allocation11 + $0x140] ss:$12 sps:$4 sm:$0xff]  }
 0xd45   :  { %2988 = vmatprep.subr.bf16.mxu1 %v6224_v37  ;;  %v4243_v37 = vld [vmem:[#allocation11 + $0x80] ss:$12 sps:$4 sm:$0xff]  }
 0xd48   :  { %2989 = vmatpush1.bf16.msra.mxu1 %v6225_v40  ;;  %v4244_v40 = vld [vmem:[#allocation11 + $0x158] ss:$12 sps:$4 sm:$0xff]  }
 0xd49   :  { %2990 = vmatprep.subr.bf16.mxu1 %v5279_v0  ;;  %v4215_v0 = vld [vmem:[#allocation10 + $0x160] ss:$24 sps:$4 sm:$0xff]  }
 0xd4c   :  { %2991 = vmatpush1.bf16.msra.mxu1 %v4205_v18  ;;  %v4245_v18 = vld [vmem:[#allocation11 + $0x98] ss:$12 sps:$4 sm:$0xff]  }
 0xd4d   :  { %2992 = vmatprep.subr.bf16.mxu1 %v4206_v38  ;;  %v4246_v38 = vld [vmem:[#allocation11 + $0x170] ss:$12 sps:$4 sm:$0xff]  }
 0xd50   :  { %2993 = vmatpush1.bf16.msra.mxu1 %v4207_v47  ;;  %v4247_v47 = vld [vmem:[#allocation11 + $0xb0] ss:$12 sps:$4 sm:$0xff]  }
 0xd51   :  { %2994 = vmatprep.subr.bf16.mxu1 %v4208_v46 }
 0xd54   :  { %2995 = vmatpush1.bf16.msra.mxu1 %v4209_v58 }
 0xd55   :  { %2996 = vmatprep.subr.bf16.mxu1 %v4210_v3 }
 0xd58   :  { %2997 = vmatpush1.bf16.msra.mxu1 %v4211_v14 }
 0xd59   :  { %2998 = vmatprep.subr.bf16.mxu1 %v4212_v59 }
 0xd5c   :  { %2999 = vmatpush1.bf16.msra.mxu1 %v4213_v8 }
 0xd5d   :  { %3000 = vmatprep.subr.bf16.mxu1 %v4214_v5 }
 0xd60   :  { %3001 = vmatpush1.bf16.msra.mxu1 %v4215_v0 }
 0xd61   :  { %3002 = vmatprep.subr.bf16.mxu1 %v4216_v61 }
 0xd64   :  { %3003 = vmatpush1.bf16.msra.mxu1 %v4217_v6 }
 0xd65   :  { %3004 = vmatprep.subr.bf16.mxu1 %v4218_v50 }
 0xd68   :  { %3005 = vmatpush1.bf16.msra.mxu1 %v4219_v60 }
 0xd69   :  { %3006 = vmatprep.subr.bf16.mxu1 %v4220_v63 }
 0xd6c   :  { %3007 = vmatpush1.bf16.msra.mxu1 %v4221_v2 }
 0xd6d   :  { %3008 = vmatprep.subr.bf16.mxu1 %v4222_v30 }
 0xd70   :  { %3009 = vmatpush1.bf16.msra.mxu1 %v4223_v34 }
 0xd71   :  { %3010 = vmatprep.subr.bf16.mxu1 %v4224_v55 }
 0xd74   :  { %3011 = vmatpush1.bf16.msra.mxu1 %v4225_v10 }
 0xd75   :  { %3012 = vmatprep.subr.bf16.mxu1 %v4226_v35 }
 0xd78   :  { %3013 = vmatpush1.bf16.msra.mxu1 %v4227_v17 }
 0xd79   :  { %3014 = vmatprep.subr.bf16.mxu1 %v4228_v13 }
 0xd7c   :  { %3015 = vmatpush1.bf16.msra.mxu1 %v4229_v4  ;;  %v6242_v4 = vld [vmem:[#allocation123_spill] sm:$0xff] }
 0xd7d   :  { %3016 = vmatprep.subr.bf16.mxu1 %v4230_v56  ;;  %v6243_v56 = vld [vmem:[#allocation124_spill] sm:$0xff] }
 0xd80   :  { %3017 = vmatpush1.bf16.msra.mxu1 %v4231_v20 }
 0xd81   :  { %3735 = vmatprep.subr.bf16.mxu1 %v4232_v12  ;;  %v6244_v12 = vld [vmem:[#allocation54_spill] sm:$0xff] }
 0xd83   :  { %3019 = vmatmul.mubr.bf16.vlgmr.msra.gmra.mrb[52].mxu1 %v5572_v41 }
 0xd84   :  { %3736 = vmatpush3.bf16.msra.mxu1 %v4233_v19 }
 0xd85   :  { %3737 = vmatprep.subr.bf16.mxu1 %v4234_v44 }
 0xd88   :  { %3738 = vmatpush3.bf16.msra.mxu1 %v4235_v57  ;;  %v6245_v57 = vld [vmem:[#allocation55_spill] sm:$0xff] }
 0xd89   :  { %3739 = vmatprep.subr.bf16.mxu1 %v4236_v1 }
 0xd8c   :  { %3740 = vmatpush3.bf16.msra.mxu1 %v4237_v43 }
 0xd8d   :  { %3741 = vmatprep.subr.bf16.mxu1 %v4238_v7  ;;  %v6246_v7 = vld [vmem:[#allocation125_spill] sm:$0xff] }
 0xd90   :  { %3742 = vmatpush3.bf16.msra.mxu1 %v4239_v15  ;;  %v2744_v15 = vld [vmem:[#allocation7 + $0x18] sm:$0xff] }
 0xd91   :  { %3743 = vmatprep.subr.bf16.mxu1 %v4240_v42 }
 0xd94   :  { %3744 = vmatpush3.bf16.msra.mxu1 %v4241_v49  ;;  %v6247_v49 = vld [vmem:[#allocation126_spill] sm:$0xff] }
 0xd95   :  { %3745 = vmatprep.subr.bf16.mxu1 %v4242_v36 }
 0xd98   :  { %3746 = vmatpush3.bf16.msra.mxu1 %v4243_v37 }
 0xd99   :  { %3747 = vmatprep.subr.bf16.mxu1 %v4244_v40 }
 0xd9c   :  { %3748 = vmatpush3.bf16.msra.mxu1 %v4245_v18  ;;  %v6248_v18 = vld [vmem:[#allocation127_spill] sm:$0xff] }
 0xd9d   :  { %3749 = vmatprep.subr.bf16.mxu1 %v4246_v38  ;;  %v6249_v38 = vld [vmem:[#allocation128_spill] sm:$0xff] }
 0xda0   :  { %3750 = vmatpush3.bf16.msra.mxu1 %v4247_v47 }
 0xdce   :  { %v2677_v46 = vpop.f32.mrb[32].mxu0  ;;  %v2780_v58 = vpop.f32.mrb[40].mxu1 }
 0xdcf   :  { %v2684_v3 = vadd.f32 %v2677_v46, %v5589_v54  ;;  %v2679_v14 = vpop.f32.mrb[33].mxu0  ;;  %v2782_v59 = vpop.f32.mrb[41].mxu1  ;;  %v6250_v46 = vld [vmem:[#allocation129_spill] sm:$0xff] }
 0xdd0   :  { %v2685_v8 = vadd.f32 %v5591_v48, %v2679_v14  ;;  %v2875_v5 = vcombine.low %v2780_v58, %v2782_v59  ;;  %v2681_v0 = vpop.f32.mrb[34].mxu0  ;;  %v2784_v61 = vpop.f32.mrb[42].mxu1  ;;  %v6251_v58 = vld [vmem:[#allocation130_spill] sm:$0xff]  ;;  %v6253_v14 = vld [vmem:[#allocation132_spill] sm:$0xff]  ;;  %v6254_v59 = vld [vmem:[#allocation133_spill] sm:$0xff] }
 0xdd1   :  { %v2686_v6 = vadd.f32 %v2684_v3, %v5346_v27  ;;  %v2682_v50 = vpop.f32.mrb[35].mxu0  ;;  %v2785_v60 = vpop.f32.mrb[43].mxu1  ;;  %v6252_v3 = vld [vmem:[#allocation131_spill] sm:$0xff]  ;;  %v6257_v0 = vld [vmem:[#allocation136_spill] sm:$0xff]  ;;  %v6258_v61 = vld [vmem:[#allocation137_spill] sm:$0xff] }
 0xdd2   :  { %v2687_v63 = vadd.f32 %v2685_v8, %v5349_v31  ;;  %v2883_v35 = vrot.slane %v2875_v5, %v6104_v11  ;;  %v6255_v8 = vld [vmem:[#allocation134_spill] sm:$0xff]  ;;  %v6256_v5 = vld [vmem:[#allocation135_spill] sm:$0xff]  ;;  %v6261_v50 = vld [vmem:[#allocation140_spill] sm:$0xff] }
 0xdd3   :  { %v2688_v30 = vpack.c.bf16 %v2686_v6, %v2686_v6  ;;  %v6259_v6 = vld [vmem:[#allocation138_spill] sm:$0xff] }
 0xdd4   :  { %v2689_v2 = vpack.c.bf16 %v2687_v63, %v2687_v63  ;;  %v4248_v60 = vld [vmem:[#allocation11 + $0x90] ss:$12 sps:$4 sm:$0xff]   ;;  %v4249_v63 = vld [vmem:[#allocation11 + $0xac] ss:$12 sps:$4 sm:$0xff]  }
 0xdd6   :  { %2722 = vmatprep.mubr.bf16.mxu0 %v2689_v2  ;;  %v2821_v34 = vpop.f32.mrb[44].mxu1  ;;  %v4250_v2 = vld [vmem:[#allocation11 + $0xa8] ss:$12 sps:$4 sm:$0xff]  }
 0xdd7   :  { %2723 = vmatmul.mubr.bf16.vlgmr.msra.gmra.mrb[36].mxu0 %v2688_v30  ;;  %v2823_v55 = vpop.f32.mrb[45].mxu1  ;;  %v4251_v30 = vld [vmem:[#allocation11 + $0xc4] ss:$12 sps:$4 sm:$0xff]  }
 0xdd8   :  { %v2876_v54 = vcombine.low %v2821_v34, %v2823_v55  ;;  %2829 = vmatpush1.bf16.msra.mxu0 %v5355_v62  ;;  %v2825_v10 = vpop.f32.mrb[46].mxu1  ;;  %2860 = vmatprep.mubr.bf16.mxu0 %v6037_v51  ;;  %v6226_v62 = vld [vmem:[#allocation40_spill] sm:$0xff] }
 0xdd9   :  { %v2826_v48 = vpop.f32.mrb[47].mxu1  ;;  %2830 = vmatprep.subr.bf16.mxu0 %v5359_v9  ;;  %v6227_v9 = vld [vmem:[#allocation42_spill] sm:$0xff] }
 0xdda   :  { %v2890_v17 = vrot.slane %v2876_v54, %v6104_v11  ;;  %v4252_v55 = vld [vmem:[#allocation11 + $0xc0] ss:$12 sps:$4 sm:$0xff]   ;;  %v4253_v54 = vld [vmem:[#allocation11 + $0xdc] ss:$12 sps:$4 sm:$0xff]   ;;  %v4254_v10 = vld [vmem:[#allocation11 + $0xd8] ss:$12 sps:$4 sm:$0xff]  }
 0xddb   :  { %v4255_v48 = vld [vmem:[#allocation11 + $0xf4] ss:$12 sps:$4 sm:$0xff]  }
 0xddc   :  { %v2891_v13 = vcombine.low %v2883_v35, %v2890_v17  ;;  %2831 = vmatpush1.bf16.msra.mxu0 %v5370_v21  ;;  %v6228_v21 = vld [vmem:[#allocation44_spill] sm:$0xff] }
 0xddd   :  { %2945 = vmatprep.subr.bf16.mxu0 %v5373_v22  ;;  %v6229_v22 = vld [vmem:[#allocation46_spill] sm:$0xff]  ;;  %v4257_v17 = vld [vmem:[#allocation11 + $0x10c] ss:$12 sps:$4 sm:$0xff]  }
 0xdde   :  { %v5741_v37 = vadd.f32 %v2891_v13, %v2744_v15  ;;  %v4256_v35 = vld [vmem:[#allocation11 + $0xf0] ss:$12 sps:$4 sm:$0xff]  }
 0xddf   :  { %3643 = vmatmul.mubr.msk.bf16.vlgmr.msra.gmra.mrb[40].mxu0 %vm434_vm2, %v5626_v53  ;;  %v6241_v53 = vld [vmem:[#allocation122_spill] sm:$0xff] }
 0xde0   :  { %2946 = vmatpush1.bf16.msra.mxu0 %v5378_v23  ;;  %2977 = vmatprep.mubr.bf16.mxu0 %v5570_v39  ;;  %v6230_v23 = vld [vmem:[#allocation48_spill] sm:$0xff]  ;;  %v6240_v39 = vld [vmem:[#allocation121_spill] sm:$0xff] }
 0xde1   :  { %2947 = vmatprep.subr.bf16.mxu0 %v5382_v24  ;;  %v6231_v24 = vld [vmem:[#allocation49_spill] sm:$0xff] }
 0xde4   :  { %2948 = vmatpush1.bf16.msra.mxu0 %v5385_v25  ;;  %v6232_v25 = vld [vmem:[#allocation64_spill] sm:$0xff] }
 0xde5   :  { %2949 = vmatprep.subr.bf16.mxu0 %v5388_v26  ;;  %v6233_v26 = vld [vmem:[#allocation65_spill] sm:$0xff] }
 0xde8   :  { %2950 = vmatpush1.bf16.msra.mxu0 %v5391_v28  ;;  %v6234_v28 = vld [vmem:[#allocation27_spill] sm:$0xff] }
 0xde9   :  { %2951 = vmatprep.subr.bf16.mxu0 %v5394_v52  ;;  %v6235_v52 = vld [vmem:[#allocation116_spill] sm:$0xff] }
 0xdec   :  { %2952 = vmatpush1.bf16.msra.mxu0 %v5397_v16  ;;  %v6236_v16 = vld [vmem:[#allocation117_spill] sm:$0xff] }
 0xded   :  { %2953 = vmatprep.subr.bf16.mxu0 %v5400_v29  ;;  %v6237_v29 = vld [vmem:[#allocation118_spill] sm:$0xff] }
 0xdf0   :  { %2954 = vmatpush1.bf16.msra.mxu0 %v5403_v32  ;;  %v6238_v32 = vld [vmem:[#allocation119_spill] sm:$0xff] }
 0xdf1   :  { %2955 = vmatprep.subr.bf16.mxu0 %v5406_v33  ;;  %v6239_v33 = vld [vmem:[#allocation120_spill] sm:$0xff] }
 0xdf4   :  { %2956 = vmatpush1.bf16.msra.mxu0 %v6226_v62  ;;  %v4258_v62 = vld [vmem:[#allocation11 + $0x108] ss:$12 sps:$4 sm:$0xff]  }
 0xdf5   :  { %2957 = vmatprep.subr.bf16.mxu0 %v6227_v9  ;;  %v4259_v9 = vld [vmem:[#allocation11 + $0x124] ss:$12 sps:$4 sm:$0xff]  }
 0xdf8   :  { %2958 = vmatpush1.bf16.msra.mxu0 %v6228_v21 }
 0xdf9   :  { %2959 = vmatprep.subr.bf16.mxu0 %v6229_v22  ;;  %v4260_v22 = vld [vmem:[#allocation11 + $0x120] ss:$12 sps:$4 sm:$0xff]  }
 0xdfc   :  { %2960 = vmatpush1.bf16.msra.mxu0 %v6230_v23  ;;  %v4261_v23 = vld [vmem:[#allocation11 + $0x13c] ss:$12 sps:$4 sm:$0xff]  }
 0xdfd   :  { %2961 = vmatprep.subr.bf16.mxu0 %v6231_v24  ;;  %v4262_v24 = vld [vmem:[#allocation11 + $0x138] ss:$12 sps:$4 sm:$0xff]  }
 0xe00   :  { %2962 = vmatpush1.bf16.msra.mxu0 %v6232_v25  ;;  %v4263_v25 = vld [vmem:[#allocation11 + $0x154] ss:$12 sps:$4 sm:$0xff]  }
 0xe01   :  { %2963 = vmatprep.subr.bf16.mxu0 %v6233_v26 }
 0xe04   :  { %2964 = vmatpush1.bf16.msra.mxu0 %v6234_v28  ;;  %v6262_v28 = vld [vmem:[#allocation56_spill] sm:$0xff] }
 0xe05   :  { %2965 = vmatprep.subr.bf16.mxu0 %v6235_v52 }
 0xe08   :  { %2966 = vmatpush1.bf16.msra.mxu0 %v6236_v16 }
 0xe09   :  { %2967 = vmatprep.subr.bf16.mxu0 %v6237_v29  ;;  %v6263_v29 = vld [vmem:[#allocation57_spill] sm:$0xff] }
 0xe0c   :  { %2968 = vmatpush1.bf16.msra.mxu0 %v6238_v32 }
 0xe0d   :  { %2969 = vmatprep.subr.bf16.mxu0 %v6239_v33 }
 0xe10   :  { %2970 = vmatpush1.bf16.msra.mxu0 %v6240_v39  ;;  %v4264_v39 = vld [vmem:[#allocation11 + $0x150] ss:$12 sps:$4 sm:$0xff]  }
 0xe11   :  { %2971 = vmatprep.subr.bf16.mxu0 %v6241_v53 }
 0xe14   :  { %2972 = vmatpush1.bf16.msra.mxu0 %v6242_v4  ;;  %v4265_v4 = vld [vmem:[#allocation11 + $0x16c] ss:$12 sps:$4 sm:$0xff]  }
 0xe15   :  { %2973 = vmatprep.subr.bf16.mxu0 %v6243_v56 }
 0xe16   :  { %v2938_v20 = vpop.f32.mrb[48].mxu1 }
 0xe17   :  { %v2939_v19 = vadd.f32 %v2938_v20, %v6244_v12  ;;  %v2940_v44 = vpop.f32.mrb[49].mxu1  ;;  %v4266_v12 = vld [vmem:[#allocation11 + $0x168] ss:$12 sps:$4 sm:$0xff]  }
 0xe18   :  { %v2941_v1 = vadd.f32 %v2940_v44, %v6245_v57  ;;  %v2942_v43 = vpop.f32.mrb[50].mxu1  ;;  %2974 = vmatpush1.bf16.msra.mxu0 %v6246_v7  ;;  %v4267_v44 = vld [vmem:[#allocation13 + $0x4] ss:$8 sps:$4 sm:$0xff]  }
 0xe19   :  { %v2943_v42 = vpop.f32.mrb[51].mxu1  ;;  %2975 = vmatprep.subr.bf16.mxu0 %v6247_v49  ;;  %v6264_v7 = vld [vmem:[#allocation23_spill] sm:$0xff] }
 0xe1a   :  { %v3029_v36 = vcombine.low %v2939_v19, %v2941_v1  ;;  %v2739_v15 = vrot.slane %v5620_v45, %v6264_v7 }
 0xe1c   :  { %v3036_v40 = vrot.slane %v3029_v36, %v6104_v11  ;;  %2976 = vmatpush1.bf16.msra.mxu0 %v6248_v18 }
 0xe1d   :  { %3097 = vmatprep.subr.bf16.mxu0 %v6249_v38  ;;  %v6266_v38 = vld [vmem:[#allocation24_spill] sm:$0xff] }
 0xe1e   :  { %v3038_v47 = vadd.f32 %v3036_v40, %v5741_v37  ;;  %v6265_v40 = vld [vmem:[#allocation28_spill] sm:$0xff] }
 0xe1f   :  { %2978 = vmatmul.mubr.bf16.vlgmr.msra.gmra.mrb[44].mxu0 %v5572_v41  ;;  %v6260_v41 = vld [vmem:[#allocation139_spill] sm:$0xff]  ;;  %v2735_v18 = vrot.slane %v6265_v40, %v6264_v7 }
 0xe20   :  { %3098 = vmatpush1.bf16.msra.mxu0 %v6250_v46  ;;  %v3644_v34 = vmul.f32 -1.442695, %v3038_v47  ;;  %v4272_v40 = vld [vmem:[#allocation5] sm:$0xff] }
 0xe21   :  { %3099 = vmatprep.subr.bf16.mxu0 %v6251_v58  ;;  %v2740_v46 = vsel %vm1723_vm0, %v2739_v15, %v2735_v18 }
 0xe22   :  { %4091 = vpow2.f32 %v3644_v34 }
 0xe24   :  { %3100 = vmatpush1.bf16.msra.mxu0 %v6252_v3 }
 0xe25   :  { %3101 = vmatprep.subr.bf16.mxu0 %v6253_v14 }
 0xe28   :  { %3102 = vmatpush1.bf16.msra.mxu0 %v6254_v59 }
 0xe29   :  { %3103 = vmatprep.subr.bf16.mxu0 %v6255_v8  ;;  %v2745_v8 = vld [vmem:[#allocation7 + $0x20] sm:$0xf] }
 0xe2c   :  { %3104 = vmatpush1.bf16.msra.mxu0 %v6256_v5  ;;  %v4092_v13 = vpop.eup %4091 }
 0xe2d   :  { %3105 = vmatprep.subr.bf16.mxu0 %v6257_v0  ;;  %v3042_v21 = vadd.f32 1.0, %v4092_v13 }
 0xe2f   :  { %4093 = vrcp.f32 %v3042_v21 }
 0xe30   :  { %3106 = vmatpush1.bf16.msra.mxu0 %v6258_v61 }
 0xe31   :  { %3107 = vmatprep.subr.bf16.mxu0 %v6259_v6 }
 0xe34   :  { %3108 = vmatpush1.bf16.msra.mxu0 %v6260_v41  ;;  %v6267_v41 = vld [vmem:[#allocation50_spill] sm:$0xff] }
 0xe35   :  { %3109 = vmatprep.subr.bf16.mxu0 %v6261_v50 }
 0xe38   :  { %3110 = vmatpush1.bf16.msra.mxu0 %v4248_v60 }
 0xe39   :  { %3111 = vmatprep.subr.bf16.mxu0 %v4249_v63  ;;  %v4094_v19 = vpop.eup %4093  ;;  %v6268_v63 = vld [vmem:[#allocation51_spill] sm:$0xff] }
 0xe3c   :  { %3112 = vmatpush1.bf16.msra.mxu0 %v4250_v2 }
 0xe3d   :  { %3113 = vmatprep.subr.bf16.mxu0 %v4251_v30 }
 0xe40   :  { %3114 = vmatpush1.bf16.msra.mxu0 %v4252_v55 }
 0xe41   :  { %3115 = vmatprep.subr.bf16.mxu0 %v4253_v54  ;;  %v3046_v54 = vrot.slane %v5741_v37, 4 }
 0xe44   :  { %3116 = vmatpush1.bf16.msra.mxu0 %v4254_v10 }
 0xe45   :  { %3117 = vmatprep.subr.bf16.mxu0 %v4255_v48 }
 0xe48   :  { %3118 = vmatpush1.bf16.msra.mxu0 %v4256_v35 }
 0xe49   :  { %3119 = vmatprep.subr.bf16.mxu0 %v4257_v17 }
 0xe4c   :  { %3120 = vmatpush1.bf16.msra.mxu0 %v4258_v62 }
 0xe4d   :  { %3121 = vmatprep.subr.bf16.mxu0 %v4259_v9 }
 0xe50   :  { %3122 = vmatpush1.bf16.msra.mxu0 %v4260_v22 }
 0xe51   :  { %3123 = vmatprep.subr.bf16.mxu0 %v4261_v23  ;;  %v6269_v23 = vld [vmem:[#allocation25_spill] sm:$0xff] }
 0xe54   :  { %3124 = vmatpush1.bf16.msra.mxu0 %v4262_v24 }
 0xe55   :  { %3125 = vmatprep.subr.bf16.mxu0 %v4263_v25 }
 0xe56   :  { %v3020_v26 = vpop.f32.mrb[52].mxu1 }
 0xe57   :  { %v3021_v52 = vadd.f32 %v3020_v26, %v6262_v28  ;;  %v3022_v16 = vpop.f32.mrb[53].mxu1 }
 0xe58   :  { %v3023_v32 = vadd.f32 %v3022_v16, %v6263_v29  ;;  %v3024_v33 = vpop.f32.mrb[54].mxu1  ;;  %3126 = vmatpush1.bf16.msra.mxu0 %v4264_v39  ;;  %v4268_v16 = vld [vmem:[#allocation13] ss:$8 sps:$4 sm:$0xff]   ;;  %v4269_v29 = vld [vmem:[#allocation13 + $0x14] ss:$8 sps:$4 sm:$0xff]  }
 0xe59   :  { %v3025_v53 = vpop.f32.mrb[55].mxu1  ;;  %3127 = vmatprep.subr.bf16.mxu0 %v4265_v4  ;;  %v4271_v33 = vld [vmem:[#allocation14 + $0x40] sm:$0xff]  }
 0xe5a   :  { %v3068_v56 = vcombine.low %v3021_v52, %v3023_v32  ;;  %v4270_v32 = vld [vmem:[#allocation13 + $0x10] ss:$8 sps:$4 sm:$0xff]  }
 0xe5c   :  { %v3075_v20 = vrot.slane %v3068_v56, %v6104_v11  ;;  %3128 = vmatpush1.bf16.msra.mxu0 %v4266_v12 }
 0xe5d   :  { %3333 = vmatprep.subr.bf16.mxu0 %v4267_v44 }
 0xe5e   :  { %v3077_v57 = vmul.f32 %v4094_v19, %v3075_v20 }
 0xeaa   :  { %v3729_v1 = vpop.f32.mrb[36].mxu0 }
 0xeab   :  { %v3730_v43 = vpop.f32.mrb[37].mxu0 }
 0xeac   :  { %v3731_v42 = vadd.f32 %v3730_v43, %v3729_v1  ;;  %v3732_v49 = vpop.f32.mrb[38].mxu0 }
 0xead   :  { %v3733_v36 = vpop.f32.mrb[39].mxu0 }
 0xeae   :  { %v2725_v47 = vadd.f32 %v3731_v42, %v6266_v38  ;;  %v6271_v42 = vld [vmem:[#allocation52_spill] sm:$0xff] }
 0xeaf   :  { %v4273_v38 = vld [vmem:[#allocation5 + $0x8] sm:$0xff] }
 0xeb0   :  { %2731 = vst [vmem:[#allocation16 + $0x2] sm:$0x3] %v2725_v47 }
 0xeb1   :  { %2742 = vst.msk [vmem:[#allocation16 + $0x2] sm:$0x3] %vm2051_vm3, %v2740_v46 }
 0xeb2   :  { %v2862_v58 = vpop.f32.mrb[40].mxu0 }
 0xeb3   :  { %v2864_v3 = vpop.f32.mrb[41].mxu0 }
 0xeb4   :  { %v2892_v14 = vcombine.low %v2862_v58, %v2864_v3  ;;  %v2866_v59 = vpop.f32.mrb[42].mxu0  ;;  %v4274_v58 = vld [vmem:[%s5844_s10] ss:$0 sm:$0xff]  ;;  %s4522_s10 = smov [#allocation16]  }
 0xeb5   :  { %v2867_v5 = vpop.f32.mrb[43].mxu0  ;;  %s3438_s25 = sshll.u32 %s4522_s10, 4  ;;  %s3439_s25 = int_to_ptr.vmem [resolvable:$true] %s3438_s25 }
 0xeb6   :  { %v2899_v45 = vrot.slane %v2892_v14, %v6104_v11  ;;  %v6272_v5 = vld [vmem:[#allocation69_spill] sm:$0xff]  ;;  %s4469_s26 = scalar_lea.vmem %s3439_s25, 96  ;;  %p4474_p9 = scmp.lt.s32.totalorder %s3439_s25, %s3439_s25 }
 0xeb7   :  { %p4470_p8 = scmp.ne.s32.totalorder %s3439_s25, %s4469_s26  ;;  %p4475_p10 = scmp.lt.s32.totalorder %s4469_s26, %s4469_s26 }
 0xeb8   :  { %v2903_v0 = vadd.f32 %v2899_v45, %v2745_v8 }
 0xeb9   :  { %p4476_p11 = por %p4475_p10, %p4474_p9 }
 0xeba   :  { %v3078_v61 = vadd.f32 %v3077_v57, %v2903_v0 }
 0xebb   :  { %p4477_p12 = pnand %p4476_p11, %p4470_p8 }
 0xef2   :  { %v2979_v6 = vpop.f32.mrb[44].mxu0 }
 0xef3   :  { %v2980_v50 = vadd.f32 %v2979_v6, %v6267_v41  ;;  %v2981_v60 = vpop.f32.mrb[45].mxu0 }
 0xef4   :  { %v2982_v2 = vadd.f32 %v2981_v60, %v6268_v63  ;;  %v2983_v30 = vpop.f32.mrb[46].mxu0  ;;  %v6274_v60 = vld [vmem:[#allocation72_spill] sm:$0xff] }
 0xef5   :  { %v2984_v34 = vpop.f32.mrb[47].mxu0 }
 0xef6   :  { %v3050_v55 = vcombine.low %v2980_v50, %v2982_v2 }
 0xef8   :  { %v3057_v10 = vrot.slane %v3050_v55, %v6104_v11 }
 0xefa   :  { %v3059_v48 = vadd.f32 %v3057_v10, %v3046_v54  ;;  %v6275_v10 = vld [vmem:[#allocation53_spill] sm:$0xff] }
 0xefc   :  { %v3645_v35 = vmul.f32 -1.442695, %v3059_v48 }
 0xefe   :  { %4095 = vpow2.f32 %v3645_v35 }
 0xf08   :  { %v4096_v17 = vpop.eup %4095 }
 0xf09   :  { %v3063_v13 = vadd.f32 1.0, %v4096_v17 }
 0xf0b   :  { %4097 = vrcp.f32 %v3063_v13 }
 0xf0c   :  { %4099 = vtanh.f32 %v3078_v61  ;;  %v6273_v61 = vld [vmem:[#allocation70_spill] sm:$0xff] }
 0xf15   :  { %v4098_v62 = vpop.eup %4097 }
 0xf16   :  { %v3080_v9 = vsub.f32 1.0, %v4098_v62  ;;  %v4100_v21 = vpop.eup %4099  ;;  %v3082_v24 = vmul.f32 %v4098_v62, %v6269_v23 }
 0xf18   :  { %v3081_v22 = vmul.f32 %v4100_v21, %v3080_v9 }
 0xf1a   :  { %v3083_v25 = vadd.f32 %v3082_v24, %v3081_v22 }
 0xf1c   :  { %v3091_v26 = vrot.slane %v3083_v25, %v6104_v11  ;;  %v6270_v11 = vld [vmem:[#allocation63_spill] sm:$0xff] }
 0xf1e   :  { %v3092_v28 = vcombine.high %v3091_v26, %v3091_v26  ;;  %v3095_v52 = vpack.c.bf16 %v3091_v26, %v3091_v26 }
 0xf20   :  { %v3096_v37 = vpack.c.bf16 %v3092_v28, %v3092_v28 }
 0xf22   :  { %3129 = vmatprep.mubr.bf16.mxu0 %v3096_v37  ;;  %3170 = vmatprep.mubr.bf16.mxu1 %v3096_v37 }
 0xf23   :  { %3130 = vmatmul.mubr.bf16.vlgmr.msra.gmra.mrb[48].mxu0 %v3095_v52  ;;  %3171 = vmatmul.mubr.bf16.vlgmr.msra.gmra.mrb[56].mxu1 %v3095_v52 }
 0xf24   :  { %3334 = vmatpush1.bf16.msra.mxu0 %v4268_v16  ;;  %3365 = vmatprep.mubr.bf16.mxu0 %v6037_v51 }
 0xf25   :  { %3335 = vmatprep.subr.bf16.mxu0 %v4269_v29 }
 0xf28   :  { %3336 = vmatpush1.bf16.msra.mxu0 %v4270_v32 }
 0xf29   :  { %3757 = vmatprep.subr.bf16.mxu0 %v4271_v33 }
 0xff6   :  { %v3131_v39 = vpop.f32.mrb[48].mxu0  ;;  %v3751_v53 = vpop.f32.mrb[56].mxu1 }
 0xff7   :  { %v3185_v4 = vrot.slane %v3131_v39, %v6270_v11  ;;  %v5779_v56 = vpop.f32.mrb[49].mxu0  ;;  %v3752_v20 = vpop.f32.mrb[57].mxu1 }
 0xff8   :  { %v5781_v12 = vadd.f32 %v3752_v20, %v3751_v53  ;;  %v3135_v19 = vpop.f32.mrb[50].mxu0  ;;  %v3754_v44 = vpop.f32.mrb[58].mxu1  ;;  %v4275_v53 = vld [vmem:[#allocation2] sm:$0xff] }
 0xff9   :  { %v3186_v57 = vcombine.high %v3185_v4, %v3185_v4  ;;  %v3193_v51 = vrot.slane %v3185_v4, %v6270_v11  ;;  %v3136_v1 = vpop.f32.mrb[51].mxu0  ;;  %v3755_v43 = vpop.f32.mrb[59].mxu1 }
 0xffb   :  { %v3200_v15 = vrot.slane %v3186_v57, %v6270_v11  ;;  %v3204_v49 = vrot.slane %v3193_v51, %v6271_v42  ;;  %v4276_v57 = vld [vmem:[#allocation2 + $0x8] sm:$0xff] }
 0xffd   :  { %v3208_v36 = vrot.slane %v3200_v15, %v6271_v42  ;;  %v3211_v18 = vadd.f32 %v4272_v40, %v3204_v49 }
 0xfff   :  { %v3212_v47 = vadd.f32 %v4273_v38, %v3208_v36  ;;  %4101 = vtanh.f32 %v3211_v18 }
0x1001   :  { %4103 = vtanh.f32 %v3212_v47 }
0x1009   :  { %v4102_v46 = vpop.eup %4101 }
0x100a   :  { %v3215_v3 = vmul.f32 %v4274_v58, %v4102_v46 }
0x100b   :  { %v4104_v14 = vpop.eup %4103 }
0x100c   :  { %3217 = vadd.xlane.f32.xlu0 %v3215_v3  ;;  %v3216_v59 = vmul.f32 %v4274_v58, %v4104_v14 }
0x100e   :  { %3219 = vadd.xlane.f32.xlu1 %v3216_v59 }
0x1099   :  { %v3218_v8 = vpop.xlane.xlu0 %3217 }
0x109a   :  { %v3221_v45 = vadd.f32 %v3218_v8, %v6272_v5 }
0x109b   :  { %v3220_v0 = vpop.xlane.xlu1 %3219 }
0x109c   :  { %3226 = vperm.xlu1 %3802, %v3221_v45   ;;  %v3222_v6 = vadd.f32 %v3220_v0, %v6273_v61  ;;  %v4277_v61 = vld [vmem:[#allocation14] sm:$0xff]  }
0x10a0   :  { %3229 = vperm.xlu1 %3802, %v3222_v6  }
0x111b   :  { %v3227_v41 = vpop.permute.xlu1 %3226 }
0x111c   :  { %v3234_v63 = vrot.slane %v3227_v41, %v6274_v60  ;;  %v4279_v41 = vld [vmem:[#allocation14 + $0x8] sm:$0xff]  }
0x111f   :  { %v3230_v50 = vpop.permute.xlu1 %3229 }
0x1120   :  { %v3238_v2 = vrot.slane %v3230_v50, %v6274_v60  ;;  %v4280_v50 = vld [vmem:[#allocation14 + $0x50] sm:$0xff]  }
0x1122   :  { %v3239_v30 = vsel %vm1723_vm0, %v3238_v2, %v3234_v63  ;;  %v4282_v63 = vld [vmem:[#allocation14 + $0x58] sm:$0xff]  }
0x1123   :  { %v3241_v34 = vsel %vm1726_vm1, %v3239_v30, -inf  ;;  %v4283_v2 = vld [vmem:[#allocation14 + $0x18] sm:$0xff]   ;;  %v4284_v30 = vld [vmem:[#allocation14 + $0x60] sm:$0xff]  }
0x1124   :  { %3242 = vmax.xlane.f32.xlu1 %v3241_v34  ;;  %v4285_v34 = vld [vmem:[#allocation14 + $0x20] sm:$0xff]  }
0x11b1   :  { %v3243_v55 = vpop.xlane.xlu1 %3242 }
0x11b2   :  { %v3248_v54 = vrot.slane %v3243_v55, %v6271_v42  ;;  %v3252_v48 = vrot.slane %v3243_v55, %v6275_v10  ;;  %v4286_v55 = vld [vmem:[#allocation14 + $0x68] sm:$0xff]  }
0x11b4   :  { %v3255_v35 = vsub.f32 %v3221_v45, %v3248_v54  ;;  %v3256_v17 = vsub.f32 %v3222_v6, %v3252_v48  ;;  %v4278_v6 = vld [vmem:[#allocation14 + $0x48] sm:$0xff]   ;;  %v4289_v48 = vld [vmem:[#allocation14 + $0x30] sm:$0xff]  }
0x11b5   :  { %v4287_v54 = vld [vmem:[#allocation14 + $0x28] sm:$0xff]  }
0x11b6   :  { %v3257_v13 = vmul.f32 1.442695, %v3255_v35  ;;  %v3259_v62 = vmul.f32 1.442695, %v3256_v17  ;;  %v4290_v35 = vld [vmem:[#allocation14 + $0x78] sm:$0xff]  }
0x11b7   :  { %v4291_v17 = vld [vmem:[#allocation14 + $0x38] sm:$0xff]  }
0x11b8   :  { %4105 = vpow2.f32 %v3257_v13 }
0x11b9   :  { %4107 = vpow2.f32 %v3259_v62 }
0x11c2   :  { %v4106_v9 = vpop.eup %4105 }
0x11c3   :  { %3264 = vperm.xlu0 %3801, %v4106_v9   ;;  %v4108_v21 = vpop.eup %4107 }
0x11c7   :  { %3267 = vperm.xlu0 %3801, %v4108_v21  }
0x1242   :  { %v3265_v22 = vpop.permute.xlu0 %3264 }
0x1243   :  { %v3272_v24 = vrot.slane %v3265_v22, %v6274_v60 }
0x1246   :  { %v3268_v23 = vpop.permute.xlu0 %3267 }
0x1247   :  { %v3276_v25 = vrot.slane %v3268_v23, %v6274_v60  ;;  %v4281_v60 = vld [vmem:[#allocation14 + $0x10] sm:$0xff]  }
0x1249   :  { %v3277_v26 = vsel %vm1723_vm0, %v3276_v25, %v3272_v24 }
0x124a   :  { %v3279_v28 = vsel %vm1726_vm1, %v3277_v26, 0.0 }
0x124b   :  { %3280 = vadd.xlane.f32.xlu0 %v3279_v28 }
0x12d8   :  { %v3281_v37 = vpop.xlane.xlu0 %3280 }
0x12d9   :  { %4109 = vrcp.f32 %v3281_v37 }
0x12e3   :  { %v4110_v52 = vpop.eup %4109 }
0x12e4   :  { %v3287_v16 = vrot.slane %v4110_v52, %v6271_v42  ;;  %v3291_v32 = vrot.slane %v4110_v52, %v6275_v10  ;;  %v4288_v10 = vld [vmem:[#allocation14 + $0x70] sm:$0xff]  }
0x12e6   :  { %v3294_v29 = vmul.f32 %v4106_v9, %v3287_v16  ;;  %v3295_v33 = vmul.f32 %v4108_v21, %v3291_v32 }
0x12e8   :  { %3298 = vperm.xlu1 %3802, %v3294_v29  }
0x12ec   :  { %3303 = vperm.xlu1 %3802, %v3295_v33  }
0x1367   :  { %v3299_v39 = vpop.permute.xlu1 %3298 }
0x1368   :  { %v3306_v11 = vmul.f32 %v4275_v53, %v3299_v39  ;;  %v3425_v44 = vrot.slane %v3299_v39, %v6264_v7 }
0x136a   :  { %v3308_v4 = vsel %vm434_vm2, %v3306_v11, 0.0 }
0x136b   :  { %v3309_v20 = vrot.slane %v3308_v4, 4  ;;  %v3304_v19 = vpop.permute.xlu1 %3303 }
0x136c   :  { %v3307_v51 = vmul.f32 %v4276_v57, %v3304_v19  ;;  %v3429_v1 = vrot.slane %v3304_v19, %v6264_v7 }
0x136d   :  { %v3310_v43 = vadd.f32 %v3309_v20, %v3308_v4 }
0x136e   :  { %v3315_v15 = vsel %vm434_vm2, %v3307_v51, 0.0  ;;  %v5809_v42 = vsel %vm1723_vm0, %v3429_v1, %v3425_v44 }
0x136f   :  { %v3311_v49 = vrot.slane %v3310_v43, 2  ;;  %v3316_v36 = vrot.slane %v3315_v15, 4 }
0x1371   :  { %v3312_v40 = vadd.f32 %v3311_v49, %v3310_v43  ;;  %v3317_v18 = vadd.f32 %v3316_v36, %v3315_v15 }
0x1373   :  { %v3313_v38 = vrot.slane %v3312_v40, 1  ;;  %v3318_v47 = vrot.slane %v3317_v18, 2 }
0x1375   :  { %v3314_v46 = vadd.f32 %v3313_v38, %v3312_v40  ;;  %v3319_v58 = vadd.f32 %v3318_v47, %v3317_v18 }
0x1377   :  { %v3320_v3 = vrot.slane %v3319_v58, 1  ;;  %v3322_v14 = vpack.c.bf16 %v3314_v46, %v3314_v46 }
0x1379   :  { %v3321_v59 = vadd.f32 %v3320_v3, %v3319_v58  ;;  %v3326_v5 = vunpack.c.l.b16 %v3322_v14 }
0x137b   :  { %v3323_v8 = vpack.c.bf16 %v3321_v59, %v3321_v59 }
0x137d   :  { %v3327_v7 = vunpack.c.l.b16 %v3323_v8 }
0x137f   :  { %v3328_v45 = vsel %vm1723_vm0, %v3327_v7, %v3326_v5 }
0x1380   :  { %v3329_v0 = vpack.c.b16 %v3328_v45, %v3328_v45 }
0x1382   :  { %3646 = vmatmul.mubr.msk.bf16.vlgmr.msra.gmra.mrb[52].mxu0 %vm434_vm2, %v3329_v0 }
0x1383   :  { %3758 = vmatpush3.bf16.msra.mxu0 %v4277_v61 }
0x1384   :  { %3759 = vmatprep.subr.bf16.mxu0 %v4278_v6 }
0x1387   :  { %3760 = vmatpush3.bf16.msra.mxu0 %v4279_v41 }
0x1388   :  { %3761 = vmatprep.subr.bf16.mxu0 %v4280_v50 }
0x138b   :  { %3762 = vmatpush3.bf16.msra.mxu0 %v4281_v60 }
0x138c   :  { %3763 = vmatprep.subr.bf16.mxu0 %v4282_v63 }
0x138f   :  { %3764 = vmatpush3.bf16.msra.mxu0 %v4283_v2 }
0x1390   :  { %3765 = vmatprep.subr.bf16.mxu0 %v4284_v30 }
0x1393   :  { %3766 = vmatpush3.bf16.msra.mxu0 %v4285_v34 }
0x1394   :  { %3767 = vmatprep.subr.bf16.mxu0 %v4286_v55 }
0x1397   :  { %3768 = vmatpush3.bf16.msra.mxu0 %v4287_v54 }
0x1398   :  { %3769 = vmatprep.subr.bf16.mxu0 %v4288_v10 }
0x139b   :  { %3770 = vmatpush3.bf16.msra.mxu0 %v4289_v48 }
0x139c   :  { %3771 = vmatprep.subr.bf16.mxu0 %v4290_v35 }
0x139f   :  { %3772 = vmatpush3.bf16.msra.mxu0 %v4291_v17 }
0x1455   :  { %v3367_v13 = vpop.f32.mrb[52].mxu0 }
0x1456   :  { %v3374_v62 = vadd.f32 %v3367_v13, %v5779_v56  ;;  %v3369_v9 = vpop.f32.mrb[53].mxu0 }
0x1457   :  { %v3375_v21 = vadd.f32 %v5781_v12, %v3369_v9  ;;  %v3371_v22 = vpop.f32.mrb[54].mxu0  ;;  %v4292_v12 = vld [vmem:[%s5846_s12] ss:$0 sm:$0xff] }
0x1458   :  { %v3376_v23 = vadd.f32 %v3374_v62, %v5346_v27  ;;  %v3372_v24 = vpop.f32.mrb[55].mxu0 }
0x1459   :  { %v3377_v25 = vadd.f32 %v3375_v21, %v5349_v31 }
0x145a   :  { %v3378_v28 = vpack.c.bf16 %v3376_v23, %v3376_v23 }
0x145b   :  { %v3379_v26 = vpack.c.bf16 %v3377_v25, %v3377_v25 }
0x145d   :  { %3412 = vmatprep.mubr.bf16.mxu0 %v3379_v26 }
0x145e   :  { %3413 = vmatmul.mubr.bf16.vlgmr.msra.gmra.mrb[56].mxu0 %v3378_v28 }
0x1531   :  { %v3773_v37 = vpop.f32.mrb[56].mxu0 }
0x1532   :  { %v3774_v52 = vpop.f32.mrb[57].mxu0 }
0x1533   :  { %v3775_v16 = vadd.f32 %v3774_v52, %v3773_v37  ;;  %v3776_v29 = vpop.f32.mrb[58].mxu0 }
0x1534   :  { %v3777_v56 = vpop.f32.mrb[59].mxu0 }
0x1535   :  { %v3415_v32 = vadd.f32 %v4292_v12, %v3775_v16 }
0x1537   :  { %3421 = vst [vmem:[#allocation16 + $0x4] sm:$0x3] %v3415_v32 }
0x1538   :  { %3432 = vst.msk [vmem:[#allocation16 + $0x4] sm:$0x3] %vm2051_vm3, %v5809_v42 }
0x1539   :  { %4480 = shalt.err (!%p4477_p12)
}
0x153a   :  { %s4481_s29 = scalar_lea.hbm %s5847_s13, 96 }
0x153b   :  { %p4482_p13 = scmp.ne.s32.totalorder %s5847_s13, %s4481_s29  ;;  %p4485_p0 = scmp.lt.u32.totalorder %s4481_s29, %s5847_s13 }
0x153d   :  { %p4487_p1 = pnand %p4485_p0, %p4482_p13 }
0x153f   :  { %4490 = shalt.err (!%p4487_p1)
}
0x1540   :  { %s4523_s28 = smov 32   ;;  %s4524_s17 = smov 2  }
0x1541   :  { %3444 = dma.vmem_to_hbm [thread:$0]  %s3439_s25, 96, %s5847_s13, [#allocation4], %s4523_s28, %s4523_s28, %s4524_s17  }
0x1542   :  { %4501 = dma.done.wait [#allocation4], 96  }
0x1543   :  { %4502 = vsyncadd [#allocation4], 4294967200 }
0x1544   :  { %3448 = vsyncpa [#allocation3], 1 }
0x1545   :  { %3449 = vsyncpa [#allocation6], 1 }
0x1546   :  { %3450 = vsyncpa [#allocation9], 1 }
0x1547   :  { %3451 = vsyncpa [#allocation12], 1 }
0x1548   :  { %3452 = vsyncpa [#allocation15], 1 }
0x1549   :  { %3453 = vsyncpa [#allocation4], 1 }

</bundles_post_ra>
